<compile_context>
chip_gen: v5e
topology: v5e:2x2
jax: 0.10.0
libtpu: 0.0.40
codegen_flags: <defaults>
</compile_context>

<pallas_src>
import functools

import jax
import jax.numpy as jnp
from jax.experimental import pallas as pl
from jax.experimental.pallas import tpu as pltpu

_LANE = 128


def _round_up(n, m):
    return ((n + m - 1) // m) * m


def _elu(x):
    # ELU(alpha=1): x if x > 0 else exp(x) - 1  (exp -> EUP; avoid expm1).
    return jnp.where(x > 0, x, jnp.exp(jnp.minimum(x, 0.0)) - 1.0)


def _residual_block_kernel(H, W, Cin, p1_ref, w1_ref, b1_ref, w2_ref, b2_ref,
                           out_ref):
    """Fused ResidualBlock forward for one batch element (grid over B).

    p1_ref  : (1, H*W, K1P)  f32  conv1 im2col patches, tap-major K, zero-padded
                                  to K1P lanes; centre tap == original x.
    w1_ref  : (K1P, Cout)    bf16 conv1 weights with BN1 scale folded in.
    b1_ref  : (1, Cout)      f32  BN1 shift.
    w2_ref  : (K2P, Cout)    bf16 conv2 weights (tap-major K) with BN2 scale.
    b2_ref  : (1, Cout)      f32  BN2 shift.
    out_ref : (1, H*W, Cout) f32
    """
    NPIX, Cout = out_ref.shape[1], out_ref.shape[2]
    K2P = w2_ref.shape[0]

    p1 = p1_ref[0]                                   # (NPIX, K1P) f32

    # Residual = centre tap (dy=dx=2) of the conv1 patches: no separate
    # residual input / duplicate padded copy of x in HBM.
    ctr = (2 * 5 + 2) * Cin
    res = p1[:, ctr:ctr + Cin]                       # (NPIX, Cin) f32, exact x

    # ---- conv1 (5x5, pad 2) + BN1 scale: single MXU matmul, bf16 operands ---
    out1 = jnp.dot(p1.astype(jnp.bfloat16), w1_ref[...],
                   preferred_element_type=jnp.float32)        # (NPIX, Cout)
    y1 = _elu(out1 + b1_ref[...])                    # BN1 shift + ELU, f32

    # ---- build conv2's zero-padded input (1-pixel halo), in-register --------
    y1s = y1.reshape(H, W, Cout)
    zc = jnp.zeros((H, 1, Cout), jnp.float32)
    zr = jnp.zeros((1, W + 2, Cout), jnp.float32)
    y1p = jnp.concatenate(
        [zr, jnp.concatenate([zc, y1s, zc], axis=1), zr], axis=0)  # (H+2,W+2,C)

    # ---- conv2 (3x3, pad 1): pack the 9 taps into the contraction dim -------
    cols = [y1p[dy:dy + H, dx:dx + W, :].reshape(NPIX, Cout)
            for dy in range(3) for dx in range(3)]
    if K2P > 9 * Cout:                               # lane-dense K for the MXU
        cols.append(jnp.zeros((NPIX, K2P - 9 * Cout), jnp.float32))
    p2 = jnp.concatenate(cols, axis=-1).astype(jnp.bfloat16)   # (NPIX, K2P)
    out2 = jnp.dot(p2, w2_ref[...], preferred_element_type=jnp.float32)

    # ---- BN2 shift + residual add + ELU -------------------------------------
    out_ref[0] = _elu(out2 + b2_ref[...] + res).astype(out_ref.dtype)


def residual_block(x_nchw, w1_oihw, bn1, w2_oihw, bn2, eps=1e-5):
    """Wrapper: NCHW/OIHW params -> tap-packed im2col Pallas kernel -> NCHW."""
    g1, be1, m1, v1 = bn1
    g2, be2, m2, v2 = bn2

    B, Cin, H, W = x_nchw.shape
    Cout = w1_oihw.shape[0]
    assert Cin == Cout, "identity residual requires in_channels == out_channels"
    assert w1_oihw.shape == (Cout, Cin, 5, 5)
    assert w2_oihw.shape == (Cout, Cout, 3, 3)

    NPIX = H * W
    K1 = 25 * Cin
    K1P = _round_up(K1, _LANE)           # 100 -> 128 for Cin=4 (lane-dense K)
    K2 = 9 * Cout
    K2P = _round_up(K2, _LANE)           # 36  -> 128

    # --- im2col for conv1 (pure layout plumbing, done once in the wrapper) ---
    x = jnp.transpose(x_nchw, (0, 2, 3, 1)).astype(jnp.float32)   # NHWC, dense
    xp = jnp.pad(x, ((0, 0), (2, 2), (2, 2), (0, 0)))             # (B,H+4,W+4,C)
    slabs = [xp[:, dy:dy + H, dx:dx + W, :]
             for dy in range(5) for dx in range(5)]
    p1 = jnp.stack(slabs, axis=3).reshape(B, NPIX, K1)            # tap-major K
    p1 = jnp.pad(p1, ((0, 0), (0, 0), (0, K1P - K1)))             # f32 patches

    # --- fold BN (eval mode): scale into weights, shift kept as bias ---------
    inv1 = (g1 / jnp.sqrt(v1 + eps)).astype(jnp.float32)
    inv2 = (g2 / jnp.sqrt(v2 + eps)).astype(jnp.float32)
    b1 = (be1.astype(jnp.float32) - m1.astype(jnp.float32) * inv1).reshape(1, Cout)
    b2 = (be2.astype(jnp.float32) - m2.astype(jnp.float32) * inv2).reshape(1, Cout)

    w1 = jnp.transpose(w1_oihw, (2, 3, 1, 0)).astype(jnp.float32)
    w1 = (w1.reshape(K1, Cout) * inv1[None, :])
    w1 = jnp.pad(w1, ((0, K1P - K1), (0, 0))).astype(jnp.bfloat16)

    w2 = jnp.transpose(w2_oihw, (2, 3, 1, 0)).astype(jnp.float32)
    w2 = (w2.reshape(K2, Cout) * inv2[None, :])
    w2 = jnp.pad(w2, ((0, K2P - K2), (0, 0))).astype(jnp.bfloat16)

    kernel = functools.partial(_residual_block_kernel, H, W, Cin)

    out = pl.pallas_call(
        kernel,
        out_shape=jax.ShapeDtypeStruct((B, NPIX, Cout), jnp.float32),
        grid=(B,),
        in_specs=[
            pl.BlockSpec((1, NPIX, K1P), lambda b: (b, 0, 0)),    # patches
            pl.BlockSpec((K1P, Cout), lambda b: (0, 0)),          # w1 (bf16, ~1 KB)
            pl.BlockSpec((1, Cout), lambda b: (0, 0)),            # b1
            pl.BlockSpec((K2P, Cout), lambda b: (0, 0)),          # w2 (bf16, ~1 KB)
            pl.BlockSpec((1, Cout), lambda b: (0, 0)),            # b2
        ],
        out_specs=pl.BlockSpec((1, NPIX, Cout), lambda b: (b, 0, 0)),
        compiler_params=pltpu.CompilerParams(
            dimension_semantics=("parallel",),      # v7x: batch over 2 TCs
            vmem_limit_bytes=32 * 1024 * 1024),
    )(p1, w1, b1, w2, b2)

    return jnp.transpose(out.reshape(B, H, W, Cout), (0, 3, 1, 2))   # NCHW


def _reference_forward(x, w1, bn1, w2, bn2, eps=1e-5):
    """Pure-JAX NCHW reference for validation."""
    def bn(y, p):
        g, b, m, v = p
        inv = g / jnp.sqrt(v + eps)
        return y * inv[None, :, None, None] + (b - m * inv)[None, :, None, None]

    dn = ('NCHW', 'OIHW', 'NCHW')
    out = jax.lax.conv_general_dilated(x, w1, (1, 1), [(2, 2), (2, 2)],
                                       dimension_numbers=dn)
    out = _elu(bn(out, bn1))
    out = jax.lax.conv_general_dilated(out, w2, (1, 1), [(1, 1), (1, 1)],
                                       dimension_numbers=dn)
    out = bn(out, bn2) + x
    return _elu(out)


if __name__ == "__main__":
    B, C, Hs, Ws = 2, 4, 16, 16          # in_channels == out_channels, stride=1

    key = jax.random.PRNGKey(0)
    k = jax.random.split(key, 11)

    x = jax.random.normal(k[0], (B, C, Hs, Ws), jnp.float32)

    w1 = 0.1 * jax.random.normal(k[1], (C, C, 5, 5), jnp.float32)   # conv5x5, OIHW
    w2 = 0.1 * jax.random.normal(k[2], (C, C, 3, 3), jnp.float32)   # conv3x3, OIHW

    bn1 = (1.0 + 0.1 * jax.random.normal(k[3], (C,), jnp.float32),  # gamma
           0.1 * jax.random.normal(k[4], (C,), jnp.float32),        # beta
           0.1 * jax.random.normal(k[5], (C,), jnp.float32),        # running_mean
           0.5 + jnp.abs(0.3 * jax.random.normal(k[6], (C,), jnp.float32)))
    bn2 = (1.0 + 0.1 * jax.random.normal(k[7], (C,), jnp.float32),
           0.1 * jax.random.normal(k[8], (C,), jnp.float32),
           0.1 * jax.random.normal(k[9], (C,), jnp.float32),
           0.5 + jnp.abs(0.3 * jax.random.normal(k[10], (C,), jnp.float32)))

    out = jax.block_until_ready(residual_block(x, w1, bn1, w2, bn2))
    ref = jax.block_until_ready(_reference_forward(x, w1, bn1, w2, bn2))

    assert out.shape == (B, C, Hs, Ws), out.shape
    max_err = float(jnp.max(jnp.abs(out - ref)))
    # bf16 MXU operands (per perf review) -> tolerance looser than pure f32.
    assert jnp.allclose(out, ref, atol=2e-2, rtol=2e-2), max_err

    print("KERNEL_OK")
</pallas_src>

<mosaic_0001>
module attributes {stable_mosaic.version = 11 : i64} {
  func.func @_residual_block_kernel(%arg0: i32, %arg1: memref<1x256x128xf32, #tpu.memory_space<vmem>>, %arg2: memref<128x4xbf16, #tpu.memory_space<vmem>>, %arg3: memref<1x4xf32, #tpu.memory_space<vmem>>, %arg4: memref<128x4xbf16, #tpu.memory_space<vmem>>, %arg5: memref<1x4xf32, #tpu.memory_space<vmem>>, %arg6: memref<1x256x4xf32, #tpu.memory_space<vmem>>) attributes {dimension_semantics = [#tpu.dimension_semantics<parallel>], iteration_bounds = array<i64: 2>, scalar_prefetch = 0 : i64, scratch_operands = 0 : i64, tpu.core_type = #tpu.core_type<tc>, window_params = [{transform_indices = @transform_0, window_bounds = array<i64: 1, 256, 128>}, {pipeline_mode = #tpu.pipeline_mode<synchronous>, transform_indices = @transform_1, window_bounds = array<i64: 128, 4>}, {pipeline_mode = #tpu.pipeline_mode<synchronous>, transform_indices = @transform_2, window_bounds = array<i64: 1, 4>}, {pipeline_mode = #tpu.pipeline_mode<synchronous>, transform_indices = @transform_3, window_bounds = array<i64: 128, 4>}, {pipeline_mode = #tpu.pipeline_mode<synchronous>, transform_indices = @transform_4, window_bounds = array<i64: 1, 4>}, {transform_indices = @transform_5, window_bounds = array<i64: 1, 256, 4>}]} {
    %c0 = arith.constant 0 : index
    %c0_0 = arith.constant 0 : index
    %c0_1 = arith.constant 0 : index
    %0 = vector.load %arg1[%c0, %c0_0, %c0_1] : memref<1x256x128xf32, #tpu.memory_space<vmem>>, vector<1x256x128xf32>
    %1 = vector.shape_cast %0 : vector<1x256x128xf32> to vector<256x128xf32>
    %2 = vector.extract_strided_slice %1 {offsets = [0, 48], sizes = [256, 4], strides = [1, 1]} : vector<256x128xf32> to vector<256x4xf32>
    %3 = arith.truncf %1 : vector<256x128xf32> to vector<256x128xbf16>
    %c0_2 = arith.constant 0 : index
    %c0_3 = arith.constant 0 : index
    %4 = vector.load %arg2[%c0_2, %c0_3] : memref<128x4xbf16, #tpu.memory_space<vmem>>, vector<128x4xbf16>
    %cst = arith.constant dense<0.000000e+00> : vector<256x4xf32>
    %5 = tpu.matmul %3, %4, %cst {dimension_numbers = #tpu.dot_dimension_numbers<[1], [0], [0], [1], [0, 0, 1, 1], [], []>} : vector<256x128xbf16>, vector<128x4xbf16>, vector<256x4xf32> -> vector<256x4xf32>
    %c0_4 = arith.constant 0 : index
    %c0_5 = arith.constant 0 : index
    %6 = vector.load %arg3[%c0_4, %c0_5] : memref<1x4xf32, #tpu.memory_space<vmem>>, vector<1x4xf32>
    %7 = vector.broadcast %6 : vector<1x4xf32> to vector<256x4xf32>
    %8 = arith.addf %5, %7 : vector<256x4xf32>
    %cst_6 = arith.constant 0.000000e+00 : f32
    %9 = vector.broadcast %cst_6 : f32 to vector<256x4xf32>
    %10 = arith.cmpf ogt, %8, %9 : vector<256x4xf32>
    %cst_7 = arith.constant 0.000000e+00 : f32
    %11 = vector.broadcast %cst_7 : f32 to vector<256x4xf32>
    %12 = arith.minimumf %8, %11 : vector<256x4xf32>
    %13 = math.exp %12 : vector<256x4xf32>
    %cst_8 = arith.constant 1.000000e+00 : f32
    %14 = vector.broadcast %cst_8 : f32 to vector<256x4xf32>
    %15 = arith.subf %13, %14 : vector<256x4xf32>
    %16 = arith.select %10, %8, %15 : vector<256x4xi1>, vector<256x4xf32>
    %17 = vector.shape_cast %16 : vector<256x4xf32> to vector<16x16x4xf32>
    %cst_9 = arith.constant 0.000000e+00 : f32
    %18 = vector.broadcast %cst_9 : f32 to vector<16x1x4xf32>
    %cst_10 = arith.constant 0.000000e+00 : f32
    %19 = vector.broadcast %cst_10 : f32 to vector<1x18x4xf32>
    %20 = tpu.concatenate %18, %17, %18 in 1 : vector<16x1x4xf32>, vector<16x16x4xf32>, vector<16x1x4xf32> -> vector<16x18x4xf32>
    %21 = tpu.concatenate %19, %20, %19 in 0 : vector<1x18x4xf32>, vector<16x18x4xf32>, vector<1x18x4xf32> -> vector<18x18x4xf32>
    %22 = vector.extract_strided_slice %21 {offsets = [0, 0, 0], sizes = [16, 16, 4], strides = [1, 1, 1]} : vector<18x18x4xf32> to vector<16x16x4xf32>
    %23 = vector.shape_cast %22 : vector<16x16x4xf32> to vector<256x4xf32>
    %24 = vector.extract_strided_slice %21 {offsets = [0, 1, 0], sizes = [16, 16, 4], strides = [1, 1, 1]} : vector<18x18x4xf32> to vector<16x16x4xf32>
    %25 = vector.shape_cast %24 : vector<16x16x4xf32> to vector<256x4xf32>
    %26 = vector.extract_strided_slice %21 {offsets = [0, 2, 0], sizes = [16, 16, 4], strides = [1, 1, 1]} : vector<18x18x4xf32> to vector<16x16x4xf32>
    %27 = vector.shape_cast %26 : vector<16x16x4xf32> to vector<256x4xf32>
    %28 = vector.extract_strided_slice %21 {offsets = [1, 0, 0], sizes = [16, 16, 4], strides = [1, 1, 1]} : vector<18x18x4xf32> to vector<16x16x4xf32>
    %29 = vector.shape_cast %28 : vector<16x16x4xf32> to vector<256x4xf32>
    %30 = vector.extract_strided_slice %21 {offsets = [1, 1, 0], sizes = [16, 16, 4], strides = [1, 1, 1]} : vector<18x18x4xf32> to vector<16x16x4xf32>
    %31 = vector.shape_cast %30 : vector<16x16x4xf32> to vector<256x4xf32>
    %32 = vector.extract_strided_slice %21 {offsets = [1, 2, 0], sizes = [16, 16, 4], strides = [1, 1, 1]} : vector<18x18x4xf32> to vector<16x16x4xf32>
    %33 = vector.shape_cast %32 : vector<16x16x4xf32> to vector<256x4xf32>
    %34 = vector.extract_strided_slice %21 {offsets = [2, 0, 0], sizes = [16, 16, 4], strides = [1, 1, 1]} : vector<18x18x4xf32> to vector<16x16x4xf32>
    %35 = vector.shape_cast %34 : vector<16x16x4xf32> to vector<256x4xf32>
    %36 = vector.extract_strided_slice %21 {offsets = [2, 1, 0], sizes = [16, 16, 4], strides = [1, 1, 1]} : vector<18x18x4xf32> to vector<16x16x4xf32>
    %37 = vector.shape_cast %36 : vector<16x16x4xf32> to vector<256x4xf32>
    %38 = vector.extract_strided_slice %21 {offsets = [2, 2, 0], sizes = [16, 16, 4], strides = [1, 1, 1]} : vector<18x18x4xf32> to vector<16x16x4xf32>
    %39 = vector.shape_cast %38 : vector<16x16x4xf32> to vector<256x4xf32>
    %cst_11 = arith.constant 0.000000e+00 : f32
    %40 = vector.broadcast %cst_11 : f32 to vector<256x92xf32>
    %41 = tpu.concatenate %23, %25, %27, %29, %31, %33, %35, %37, %39, %40 in 1 : vector<256x4xf32>, vector<256x4xf32>, vector<256x4xf32>, vector<256x4xf32>, vector<256x4xf32>, vector<256x4xf32>, vector<256x4xf32>, vector<256x4xf32>, vector<256x4xf32>, vector<256x92xf32> -> vector<256x128xf32>
    %42 = arith.truncf %41 : vector<256x128xf32> to vector<256x128xbf16>
    %c0_12 = arith.constant 0 : index
    %c0_13 = arith.constant 0 : index
    %43 = vector.load %arg4[%c0_12, %c0_13] : memref<128x4xbf16, #tpu.memory_space<vmem>>, vector<128x4xbf16>
    %cst_14 = arith.constant dense<0.000000e+00> : vector<256x4xf32>
    %44 = tpu.matmul %42, %43, %cst_14 {dimension_numbers = #tpu.dot_dimension_numbers<[1], [0], [0], [1], [0, 0, 1, 1], [], []>} : vector<256x128xbf16>, vector<128x4xbf16>, vector<256x4xf32> -> vector<256x4xf32>
    %c0_15 = arith.constant 0 : index
    %c0_16 = arith.constant 0 : index
    %45 = vector.load %arg5[%c0_15, %c0_16] : memref<1x4xf32, #tpu.memory_space<vmem>>, vector<1x4xf32>
    %46 = vector.broadcast %45 : vector<1x4xf32> to vector<256x4xf32>
    %47 = arith.addf %44, %46 : vector<256x4xf32>
    %48 = arith.addf %47, %2 : vector<256x4xf32>
    %cst_17 = arith.constant 0.000000e+00 : f32
    %49 = vector.broadcast %cst_17 : f32 to vector<256x4xf32>
    %50 = arith.cmpf ogt, %48, %49 : vector<256x4xf32>
    %cst_18 = arith.constant 0.000000e+00 : f32
    %51 = vector.broadcast %cst_18 : f32 to vector<256x4xf32>
    %52 = arith.minimumf %48, %51 : vector<256x4xf32>
    %53 = math.exp %52 : vector<256x4xf32>
    %cst_19 = arith.constant 1.000000e+00 : f32
    %54 = vector.broadcast %cst_19 : f32 to vector<256x4xf32>
    %55 = arith.subf %53, %54 : vector<256x4xf32>
    %56 = arith.select %50, %48, %55 : vector<256x4xi1>, vector<256x4xf32>
    %c0_20 = arith.constant 0 : index
    %c0_21 = arith.constant 0 : index
    %c0_22 = arith.constant 0 : index
    %57 = vector.load %arg6[%c0_20, %c0_21, %c0_22] : memref<1x256x4xf32, #tpu.memory_space<vmem>>, vector<1x256x4xf32>
    %58 = vector.shape_cast %57 : vector<1x256x4xf32> to vector<256x4xf32>
    %59 = vector.shape_cast %56 : vector<256x4xf32> to vector<1x256x4xf32>
    tpu.vector_store %arg6[%c0_20, %c0_21, %c0_22], %59 {strides = array<i32>} : memref<1x256x4xf32, #tpu.memory_space<vmem>>, vector<1x256x4xf32>,
    return
  }
  func.func @transform_0(%arg0: i32) -> (i32, i32, i32) {
    %c0_i32 = arith.constant 0 : i32
    %c0_i32_0 = arith.constant 0 : i32
    %c0_i32_1 = arith.constant 0 : i32
    return %arg0, %c0_i32, %c0_i32_0 : i32, i32, i32
  }
  func.func @transform_1(%arg0: i32) -> (i32, i32) {
    %c0_i32 = arith.constant 0 : i32
    %c0_i32_0 = arith.constant 0 : i32
    %c0_i32_1 = arith.constant 0 : i32
    return %c0_i32, %c0_i32_0 : i32, i32
  }
  func.func @transform_2(%arg0: i32) -> (i32, i32) {
    %c0_i32 = arith.constant 0 : i32
    %c0_i32_0 = arith.constant 0 : i32
    %c0_i32_1 = arith.constant 0 : i32
    return %c0_i32, %c0_i32_0 : i32, i32
  }
  func.func @transform_3(%arg0: i32) -> (i32, i32) {
    %c0_i32 = arith.constant 0 : i32
    %c0_i32_0 = arith.constant 0 : i32
    %c0_i32_1 = arith.constant 0 : i32
    return %c0_i32, %c0_i32_0 : i32, i32
  }
  func.func @transform_4(%arg0: i32) -> (i32, i32) {
    %c0_i32 = arith.constant 0 : i32
    %c0_i32_0 = arith.constant 0 : i32
    %c0_i32_1 = arith.constant 0 : i32
    return %c0_i32, %c0_i32_0 : i32, i32
  }
  func.func @transform_5(%arg0: i32) -> (i32, i32, i32) {
    %c0_i32 = arith.constant 0 : i32
    %c0_i32_0 = arith.constant 0 : i32
    %c0_i32_1 = arith.constant 0 : i32
    return %arg0, %c0_i32, %c0_i32_0 : i32, i32, i32
  }
}

</mosaic_0001>

<bundles_post_ra>
// kernel: tpu_custom_call.1
= control target key start
LH: loop header
LB: loop body
LE: loop exit
PB: predicated region body
PF: predicated region fallthrough
CT: control target
= control target key end

     0   :  { %10 = vsyncpa [#allocation3], 0  ;;  %s5811_s0 = inlined_call_operand.hbm [shape: f32[2,256,128], index: 0, kind: input, shape index: {}]   ;;  %s5812_s1 = inlined_call_operand.vmem [shape: bf16[128,4], index: 1, kind: input, shape index: {}]   ;;  %s5813_s2 = inlined_call_operand.vmem [shape: f32[1,4], index: 2, kind: input, shape index: {}]   ;;  %s5814_s3 = inlined_call_operand.vmem [shape: bf16[128,4], index: 3, kind: input, shape index: {}]   ;;  %s5815_s4 = inlined_call_operand.vmem [shape: f32[1,4], index: 4, kind: input, shape index: {}]   ;;  %s5816_s5 = inlined_call_operand.vmem [shape: f32[2,256,4], index: 5, kind: output, shape index: {}]  }
   0x1   :  { %12 = vsyncpa [#allocation3 + $0x1], 0  ;;  %s3834_s18 = smov 0   ;;  %s3836_s19 = smov 0  }
   0x2   :  { %s3838_s20 = smov 0   ;;  %s3840_s21 = smov 0  }
   0x3 LB: > { %s3853_s22 = sadd.s32 4294967295, %s3790_s21   ;;  %s3856_s23 = sadd.s32 1, %s3790_s21   ;;  %s3790_s21 = sphi %s3840_s21, %s5966_s21   ;;  %s3786_s20 = sphi %s3838_s20, %s5965_s20   ;;  %s3782_s19 = sphi %s3836_s19, %s5964_s19   ;;  %s3778_s18 = sphi %s3834_s18, %s5963_s18  }
   0x4   : > { %s22_s24 = ssub.s32 %s3790_s21, %s3856_s23  ;;  %s25_s25 = sadd.s32 1, %s3786_s20 }
   0x5   : > { %p23_p0 = scmp.eq.s32.totalorder %s22_s24, 0  ;;  %p32_p1 = scmp.ne.s32.totalorder %s3786_s20, %s3782_s19 }
   0x6   : > { %p33_p2 = scmp.eq.s32.totalorder %s3790_s21, 0  ;;  %p38_p3 = scmp.ne.s32.totalorder %s3782_s19, %s3778_s18 }
   0x7   : > { %s3866_s26 = scalar_select %p23_p0, %s3786_s20, %s25_s25  }
   0x8   : > { %p3868_p4 = por %p33_p2, %p32_p1  ;;  %p39_p5 = scmp.eq.s32.totalorder %s3853_s22, 0 }
   0x9   : > { %p2903_p6 = scmp.lt.s32.totalorder %s3790_s21, 2  ;;  %s184_s29 = sand.u32 1, %s3786_s20  }
   0xa   : > { %p3874_p7 = por %p39_p5, %p38_p3  ;;  %s2678_s30 = sshll.u32 %s184_s29, 8 }
   0xb   : > { %s2863_s6 = sshll.u32 %s3790_s21, 8  ;;  %s188_s10 = scalar_lea.vmem [#allocation2], %s2678_s30 }
   0xc   : > { %s193_s9 = scalar_lea.hbm %s5811_s0, %s2863_s6  ;;  %s196_s11 = sshll.u32 %s188_s10, 4  ;;  %s197_s11 = int_to_ptr.vmem [resolvable:$true] %s196_s11 }
   0xd   : > { %s194_s12 = sshll.u32 %s193_s9, 4  ;;  %p3885_p8 = pnand %p2903_p6, %p3868_p4  ;;  %s195_s12 = int_to_ptr.hbm [resolvable:$true] %s194_s12 }
   0xe   : > { %p2681_p9 = scmp.ge.s32.totalorder %s3790_s21, 1  ;;  %s185_s14 = scalar_lea.sflag [#allocation3], %s184_s29 }
   0xf   : > { %s3726_s15 = sshra.s32 %s195_s12, 4  ;;  %p3730_p11 = pneg %p3885_p8  ;;  %s3727_s15 = int_to_ptr.hbm [resolvable:$true] %s3726_s15 }
  0x10   : > { %s3728_s16 = scalar_lea.hbm %s3727_s15, 256  ;;  %s3733_s24 = scalar_lea.hbm %s5811_s0, 512 }
  0x11   : > { %p3729_p10 = scmp.ne.s32.totalorder %s3727_s15, %s3728_s16  ;;  %p3734_p0 = scmp.lt.s32.totalorder %s3727_s15, %s5811_s0 }
  0x12   : > { %p3735_p1 = scmp.lt.s32.totalorder %s3733_s24, %s3728_s16 }
  0x13   : > { %p3731_p12 = pnand %p3730_p11, %p3729_p10 }
  0x14   : > { %p3736_p2 = por %p3735_p1, %p3734_p0 }
  0x15   : > { %p3732_p13 = pneg %p3731_p12 }
  0x17   : > { %p3737_p3 = pnand %p3736_p2, %p3732_p13 }
  0x19   : > { %3740 = shalt.err (!%p3737_p3)
}
  0x1a   : > { %s3792_s29 = smov 128   ;;  %s3793_s30 = smov 8  }
  0x1b   : > { %2902 = dma.hbm_to_vmem [thread:$0]  (!%p3885_p8), %s195_s12, 4096, %s197_s11, %s185_s14, %s3792_s29, %s3792_s29, %s3793_s30  }
  0x1c   : > { %p204_p4 = scmp.lt.s32.totalorder %s3790_s21, 3 }
  0x1e   : > { %p205_p5 = pnand %p2681_p9, %p204_p4 }
  0x20   : > { %208 = sbr.rel (%p205_p5) target bundleno = 858 (0x35a), region = 40 }
  0x25   : > { %s210_s6 = sand.u32 1, %s3782_s19  }
  0x26   : > { %s2682_s7 = sshll.u32 %s210_s6, 8  ;;  %s211_s8 = scalar_lea.sflag [#allocation3], %s210_s6 }
  0x27   : > { %s3904_s9 = scalar_lea.vmem [#allocation2], %s2682_s7 }
  0x28   : > { %3773 = dma.done.wait (%p3874_p7), %s211_s8, 4096  }
  0x29   : > { %3775 = vsyncadd (%p3874_p7), %s211_s8, 4294963200  ;;  %v2872_v0 = vld [vmem:[%s5812_s1 + $0x38] sm:$0xff]  ;;  %v2871_v1 = vld [vmem:[%s5812_s1 + $0x30] sm:$0xff]  ;;  %vm676_vm2 = vcmask 1040384   ;;  %vm913_vm4 = vcmask 1045504   ;;  %vm835_vm5 = vcmask 1046528  }
  0x2a   : > { %363 = vmatpush.bf16.msra.mxu0 %v2872_v0  ;;  %2881 = vmatpush.bf16.msra.mxu2 %v2872_v0  ;;  %v2870_v2 = vld [vmem:[%s5812_s1 + $0x28] sm:$0xff]  ;;  %v2869_v3 = vld [vmem:[%s5812_s1 + $0x20] sm:$0xff]  ;;  %v2868_v4 = vld [vmem:[%s5812_s1 + $0x18] sm:$0xff]  ;;  %s3795_s8 = smov 12   ;;  %s3796_s10 = smov 8  }
  0x2b   : > { %v2867_v5 = vld [vmem:[%s5812_s1 + $0x10] sm:$0xff]  ;;  %v2866_v6 = vld [vmem:[%s5812_s1 + $0x8] sm:$0xff]  ;;  %v2865_v7 = vld [vmem:[%s5812_s1] sm:$0xff]  ;;  %s3797_s15 = smov 4   ;;  %s3798_s21 = smov 20  }
  0x2c   : > { %v247_v8 = vld [vmem:[%s3904_s9] sm:$0xff]  ;;  %v248_v9 = vld [vmem:[%s3904_s9 + $0x8] sm:$0xff]  ;;  %v249_v14 = vld [vmem:[%s3904_s9 + $0x10] sm:$0xff]  ;;  %s3799_s11 = smov 16   ;;  %s3800_s12 = smov 24  }
  0x2d   : > { %v263_v10 = vld [vmem:[%s3904_s9 + $0x80] sm:$0xff]  ;;  %v264_v11 = vld [vmem:[%s3904_s9 + $0x88] sm:$0xff]  ;;  %v279_v12 = vpack.c.bf16 %v248_v9, %v247_v8  ;;  %v250_v15 = vld [vmem:[%s3904_s9 + $0x18] sm:$0xff]  ;;  %s3801_s14 = smov 28   ;;  %s3802_s16 = smov 32  }
  0x2e   : > { %364 = vmatpush.bf16.msra.mxu0 %v2871_v1  ;;  %2882 = vmatpush.bf16.msra.mxu2 %v2871_v1  ;;  %v287_v13 = vpack.c.bf16 %v264_v11, %v263_v10  ;;  %v265_v16 = vld [vmem:[%s3904_s9 + $0x90] sm:$0xff]  ;;  %v266_v17 = vld [vmem:[%s3904_s9 + $0x98] sm:$0xff]  ;;  %v280_v18 = vpack.c.bf16 %v250_v15, %v249_v14  ;;  %v251_v20 = vld [vmem:[%s3904_s9 + $0x20] sm:$0xff]  ;;  %p242_p6 = scmp.lt.s32.totalorder %s3853_s22, 1 }
  0x2f   : > { %v288_v19 = vpack.c.bf16 %v266_v17, %v265_v16  ;;  %v252_v21 = vld [vmem:[%s3904_s9 + $0x28] sm:$0xff]  ;;  %v267_v22 = vld [vmem:[%s3904_s9 + $0xa0] sm:$0xff]  ;;  %v253_v26 = vld [vmem:[%s3904_s9 + $0x30] sm:$0xff] }
  0x30   : > { %v268_v23 = vld [vmem:[%s3904_s9 + $0xa8] sm:$0xff]  ;;  %v281_v24 = vpack.c.bf16 %v252_v21, %v251_v20  ;;  %v254_v27 = vld [vmem:[%s3904_s9 + $0x38] sm:$0xff]  ;;  %v269_v28 = vld [vmem:[%s3904_s9 + $0xb0] sm:$0xff]  ;;  %s5968_s22 = smov (!%p242_p6, %s3853_s22), 1 }
  0x31   : > { %v289_v25 = vpack.c.bf16 %v268_v23, %v267_v22  ;;  %v270_v29 = vld [vmem:[%s3904_s9 + $0xb8] sm:$0xff]  ;;  %v282_v30 = vpack.c.bf16 %v254_v27, %v253_v26  ;;  %v255_v32 = vld [vmem:[%s3904_s9 + $0x40] sm:$0xff]  ;;  %v256_v33 = vld [vmem:[%s3904_s9 + $0x48] sm:$0xff] }
  0x32   : > { %365 = vmatpush.bf16.msra.mxu0 %v2870_v2  ;;  %2883 = vmatpush.bf16.msra.mxu2 %v2870_v2  ;;  %v290_v31 = vpack.c.bf16 %v270_v29, %v269_v28  ;;  %v271_v34 = vld [vmem:[%s3904_s9 + $0xc0] sm:$0xff]  ;;  %v272_v35 = vld [vmem:[%s3904_s9 + $0xc8] sm:$0xff]  ;;  %v283_v36 = vpack.c.bf16 %v256_v33, %v255_v32  ;;  %v257_v38 = vld [vmem:[%s3904_s9 + $0x50] sm:$0xff]  ;;  %v5817_v28 = vmov 0.0  }
  0x33   : > { %v291_v37 = vpack.c.bf16 %v272_v35, %v271_v34  ;;  %v258_v39 = vld [vmem:[%s3904_s9 + $0x58] sm:$0xff]  ;;  %v273_v40 = vld [vmem:[%s3904_s9 + $0xd0] sm:$0xff]  ;;  %v259_v44 = vld [vmem:[%s3904_s9 + $0x60] sm:$0xff]  ;;  %v3990_v29 = vrot.slane %v5817_v28, 2 }
  0x34   : > { %v274_v41 = vld [vmem:[%s3904_s9 + $0xd8] sm:$0xff]  ;;  %v284_v42 = vpack.c.bf16 %v258_v39, %v257_v38  ;;  %v260_v45 = vld [vmem:[%s3904_s9 + $0x68] sm:$0xff]  ;;  %v261_v47 = vld [vmem:[%s3904_s9 + $0x70] sm:$0xff] }
  0x35   : > { %v292_v43 = vpack.c.bf16 %v274_v41, %v273_v40  ;;  %v285_v46 = vpack.c.bf16 %v260_v45, %v259_v44  ;;  %v262_v48 = vld [vmem:[%s3904_s9 + $0x78] sm:$0xff]  ;;  %v275_v49 = vld [vmem:[%s3904_s9 + $0xe0] sm:$0xff]  ;;  %v276_v50 = vld [vmem:[%s3904_s9 + $0xe8] sm:$0xff]  ;;  %5866 = vst [vmem:[#allocation5_spill] sm:$0xff] %v3990_v29 }
  0x36   : > { %366 = vmatpush.bf16.msra.mxu0 %v2869_v3  ;;  %2884 = vmatpush.bf16.msra.mxu2 %v2869_v3  ;;  %v286_v51 = vpack.c.bf16 %v262_v48, %v261_v47  ;;  %v293_v52 = vpack.c.bf16 %v276_v50, %v275_v49  ;;  %v3967_v53 = vld [vmem:[%s5813_s2] ss:$0 sm:$0xff]  ;;  %v4011_v49 = vrot.slane %v5817_v28, 1 }
  0x38   : > { %5868 = vst [vmem:[#allocation7_spill] sm:$0xff] %v4011_v49 }
  0x3a   : > { %367 = vmatpush.bf16.msra.mxu0 %v2868_v4  ;;  %2885 = vmatpush.bf16.msra.mxu2 %v2868_v4 }
  0x3e   : > { %368 = vmatpush.bf16.msra.mxu0 %v2867_v5  ;;  %2886 = vmatpush.bf16.msra.mxu2 %v2867_v5 }
  0x42   : > { %369 = vmatpush.bf16.msra.mxu0 %v2866_v6  ;;  %2887 = vmatpush.bf16.msra.mxu2 %v2866_v6 }
  0x46   : > { %370 = vmatpush.bf16.msra.mxu0 %v2865_v7  ;;  %2888 = vmatpush.bf16.msra.mxu2 %v2865_v7 }
  0x49   : > { %371 = vmatmul.bf16.vlgmr.msra.gmra.mxu0 %v279_v12  ;;  %411 = vmatmul.bf16.vlgmr.msra.gmra.mxu2 %v287_v13 }
  0x59   : > { %376 = vmatmul.bf16.gmra.mxu0 %v280_v18  ;;  %416 = vmatmul.bf16.gmra.mxu2 %v288_v19 }
  0x69   : > { %381 = vmatmul.bf16.gmra.mxu0 %v281_v24  ;;  %421 = vmatmul.bf16.gmra.mxu2 %v289_v25 }
  0x79   : > { %386 = vmatmul.bf16.gmra.mxu0 %v282_v30  ;;  %426 = vmatmul.bf16.gmra.mxu2 %v290_v31 }
  0x89   : > { %391 = vmatmul.bf16.gmra.mxu0 %v283_v36  ;;  %431 = vmatmul.bf16.gmra.mxu2 %v291_v37 }
  0x99   : > { %396 = vmatmul.bf16.gmra.mxu0 %v284_v42  ;;  %436 = vmatmul.bf16.gmra.mxu2 %v292_v43 }
  0xa9   : > { %401 = vmatmul.bf16.gmra.mxu0 %v285_v46  ;;  %441 = vmatmul.bf16.gmra.mxu2 %v293_v52 }
  0xb9   : > { %406 = vmatmul.bf16.gmra.mxu0 %v286_v51 }
  0xc6   : > { %v372_v54 = vpop.f32.mrf.mxu0 }
  0xc7   : > { %v373_v55 = vadd.f32 %v3967_v53, %v372_v54 }
  0xc9   : > { %v484_v56 = vmin.f32 %v373_v55, 0.0  ;;  %vm452_vm0 = vcmp.gt.f32.partialorder %v373_v55, 0.0 }
  0xcb   : > { %v516_v57 = vmul.f32 1.442695, %v484_v56 }
  0xcc   : > { %v412_v58 = vpop.f32.mrf.mxu2 }
  0xcd   : > { %3565 = vpow2.f32 %v516_v57  ;;  %v413_v59 = vadd.f32 %v3967_v53, %v412_v58 }
  0xce   : > { %v374_v60 = vpop.f32.mrf.mxu0 }
  0xcf   : > { %v500_v61 = vmin.f32 %v413_v59, 0.0  ;;  %v375_v62 = vadd.f32 %v3967_v53, %v374_v60  ;;  %vm468_vm1 = vcmp.gt.f32.partialorder %v413_v59, 0.0 }
  0xd1   : > { %v548_v63 = vmul.f32 1.442695, %v500_v61  ;;  %v485_v0 = vmin.f32 %v375_v62, 0.0  ;;  %vm453_vm3 = vcmp.gt.f32.partialorder %v375_v62, 0.0 }
  0xd3   : > { %v3566_v1 = vpop.eup %3565  ;;  %3567 = vpow2.f32 %v548_v63  ;;  %v518_v2 = vmul.f32 1.442695, %v485_v0 }
  0xd4   : > { %v2717_v3 = vadd.f32 -1.0, %v3566_v1  ;;  %v414_v4 = vpop.f32.mrf.mxu2 }
  0xd5   : > { %3569 = vpow2.f32 %v518_v2  ;;  %v415_v5 = vadd.f32 %v3967_v53, %v414_v4 }
  0xd6   : > { %v377_v6 = vpop.f32.mrf.mxu0  ;;  %v612_v9 = vsel %vm452_vm0, %v373_v55, %v2717_v3 }
  0xd7   : > { %v501_v7 = vmin.f32 %v415_v5, 0.0  ;;  %v3974_v8 = vadd.f32 %v3967_v53, %v377_v6  ;;  %v677_v14 = vrot.slane %v612_v9, 7  ;;  %vm469_vm6 = vcmp.gt.f32.partialorder %v415_v5, 0.0 }
  0xd9   : > { %v3568_v10 = vpop.eup %3567  ;;  %v550_v11 = vmul.f32 1.442695, %v501_v7  ;;  %v486_v12 = vmin.f32 %v3974_v8, 0.0  ;;  %v3978_v23 = vsel %vm676_vm2, 0.0, %v677_v14  ;;  %vm454_vm7 = vcmp.gt.f32.partialorder %v3974_v8, 0.0 }
  0xda   : > { %v2733_v15 = vadd.f32 -1.0, %v3568_v10  ;;  %v916_v32 = vrot.slane %v3978_v23, 2  ;;  %v838_v36 = vrot.slane %v3978_v23, 1 }
  0xdb   : > { %v3570_v13 = vpop.eup %3569  ;;  %3571 = vpow2.f32 %v550_v11  ;;  %v520_v18 = vmul.f32 1.442695, %v486_v12 }
  0xdc   : > { %v2718_v16 = vadd.f32 -1.0, %v3570_v13  ;;  %v417_v17 = vpop.f32.mrf.mxu2  ;;  %v628_v21 = vsel %vm468_vm1, %v413_v59, %v2733_v15 }
  0xdd   : > { %v3981_v24 = vadd.f32 %v3967_v53, %v417_v17  ;;  %3573 = vpow2.f32 %v520_v18  ;;  %v701_v30 = vrot.slane %v628_v21, 7 }
  0xde   : > { %v613_v19 = vsel %vm453_vm3, %v375_v62, %v2718_v16  ;;  %v379_v20 = vpop.f32.mrf.mxu0 }
  0xdf   : > { %v678_v22 = vrot.slane %v613_v19, 7  ;;  %v3984_v25 = vadd.f32 %v3967_v53, %v379_v20  ;;  %v502_v39 = vmin.f32 %v3981_v24, 0.0  ;;  %v4007_v46 = vsel %vm676_vm2, 0.0, %v701_v30 }
  0xe0   : > { %5867 = vst [vmem:[#allocation6_spill] sm:$0xff] %v4007_v46  ;;  %v878_v61 = vrot.slane %v4007_v46, 1  ;;  %vm470_vm9 = vcmp.gt.f32.partialorder %v3981_v24, 0.0 }
  0xe1   : > { %v3572_v26 = vpop.eup %3571  ;;  %v3987_v27 = vsel %vm676_vm2, %v677_v14, %v678_v22  ;;  %v487_v33 = vmin.f32 %v3984_v25, 0.0  ;;  %v788_v37 = vsel %vm676_vm2, %v678_v22, 0.0  ;;  %v552_v57 = vmul.f32 1.442695, %v502_v39 }
  0xe2   : > { %v2734_v31 = vadd.f32 -1.0, %v3572_v26  ;;  %v2948_v34 = vpack.i.bf16 %v3987_v27, %v3978_v23  ;;  %v917_v35 = vrot.slane %v3987_v27, 2  ;;  %v839_v41 = vrot.slane %v3987_v27, 1 }
  0xe3   : > { %v522_v43 = vmul.f32 1.442695, %v487_v33  ;;  %v3574_v50 = vpop.eup %3573  ;;  %v919_v51 = vrot.slane %v788_v37, 2  ;;  %v841_v62 = vrot.slane %v788_v37, 1  ;;  %vm455_vm8 = vcmp.gt.f32.partialorder %v3984_v25, 0.0 }
  0xe4   : > { %v629_v38 = vsel %vm469_vm6, %v415_v5, %v2734_v31  ;;  %v419_v40 = vpop.f32.mrf.mxu2  ;;  %2949 = vrot.lane.b32.xlu2 %v2948_v34, %s3795_s8  ;;  %v918_v45 = vsel %vm913_vm4, %v916_v32, %v917_v35  ;;  %v840_v54 = vsel %vm835_vm5, %v838_v36, %v839_v41  ;;  %v2719_v59 = vadd.f32 -1.0, %v3574_v50 }
  0xe5   : > { %v702_v42 = vrot.slane %v629_v38, 7  ;;  %v4002_v44 = vadd.f32 %v3967_v53, %v419_v40  ;;  %v2958_v48 = vpack.i.bf16 %v918_v45, %v3990_v29  ;;  %3575 = vpow2.f32 %v522_v43 }
  0xe6   : > { %v382_v47 = vpop.f32.mrf.mxu0  ;;  %v2953_v60 = vpack.i.bf16 %v840_v54, %v4011_v49  ;;  %v4027_v0 = vsel %vm913_vm4, %v917_v35, %v919_v51  ;;  %3577 = vpow2.f32 %v552_v57  ;;  %v614_v5 = vsel %vm454_vm7, %v3974_v8, %v2719_v59 }
  0xe7   : > { %v4014_v52 = vsel %vm676_vm2, %v702_v42, 0.0  ;;  %v4018_v55 = vsel %vm676_vm2, %v701_v30, %v702_v42  ;;  %v503_v56 = vmin.f32 %v4002_v44, 0.0  ;;  %2959 = vrot.lane.b32.xlu1 %v2958_v48, %s3796_s10  ;;  %v4032_v3 = vadd.f32 %v3967_v53, %v382_v47 }
  0xe8   : > { %v881_v58 = vrot.slane %v4014_v52, 1  ;;  %v879_v1 = vrot.slane %v4018_v55, 1  ;;  %2954 = vrot.lane.b32.xlu0 %v2953_v60, %s3797_s15  ;;  %v2968_v7 = vpack.i.bf16 %v4027_v0, %v918_v45  ;;  %v4046_v11 = vsel %vm835_vm5, %v839_v41, %v841_v62 }
  0xe9   : > { %v554_v63 = vmul.f32 1.442695, %v503_v56  ;;  %v680_v15 = vrot.slane %v614_v5, 7  ;;  %v488_v17 = vmin.f32 %v4032_v3, 0.0  ;;  %v2963_v18 = vpack.i.bf16 %v4046_v11, %v840_v54 }
  0xea   : > { %v4035_v4 = vsel %vm835_vm5, %v878_v61, %v879_v1  ;;  %v4042_v9 = vsel %vm835_vm5, %v879_v1, %v881_v58  ;;  %v2973_v33 = vpack.i.bf16 %v4018_v55, %v4007_v46  ;;  %vm471_vm10 = vcmp.gt.f32.partialorder %v4002_v44, 0.0 }
  0xeb   : > { %v3576_v2 = vpop.eup %3575  ;;  %5869 = vst [vmem:[#allocation8_spill] sm:$0xff] %v4042_v9  ;;  %3579 = vpow2.f32 %v554_v63  ;;  %v2983_v14 = vpack.i.bf16 %v4042_v9, %v4035_v4  ;;  %v4065_v26 = vsel %vm676_vm2, 0.0, %v680_v15  ;;  %v524_v30 = vmul.f32 1.442695, %v488_v17 }
  0xec   : > { %v2720_v6 = vadd.f32 -1.0, %v3576_v2  ;;  %v422_v13 = vpop.f32.mrf.mxu2  ;;  %v3578_v20 = vpop.eup %3577  ;;  %v843_v39 = vrot.slane %v4065_v26, 1  ;;  %v959_v40 = vrot.slane %v4014_v52, 2  ;;  %v921_v42 = vrot.slane %v4065_v26, 2 }
  0xed   : > { %2984 = vrot.lane.b32.xlu2 %v2983_v14, %s3799_s11  ;;  %v2735_v36 = vadd.f32 -1.0, %v3578_v20  ;;  %3581 = vpow2.f32 %v524_v30  ;;  %v957_v47 = vrot.slane %v4018_v55, 2  ;;  %v4095_v51 = vadd.f32 %v3967_v53, %v422_v13 }
  0xee   : > { %v384_v10 = vpop.f32.mrf.mxu0  ;;  %v615_v12 = vsel %vm455_vm8, %v3984_v25, %v2720_v6  ;;  %v956_v56 = vrot.slane %v4007_v46, 2  ;;  %vm456_vm11 = vcmp.gt.f32.partialorder %v4032_v3, 0.0 }
  0xef   : > { %v4052_v8 = vadd.f32 %v3967_v53, %v384_v10  ;;  %2969 = vrot.lane.b32.xlu1 %v2968_v7, %s3798_s21  ;;  %v681_v16 = vrot.slane %v615_v12, 7  ;;  %v630_v48 = vsel %vm470_vm9, %v3981_v24, %v2735_v36  ;;  %v960_v60 = vsel %vm913_vm4, %v957_v47, %v959_v40 }
  0xf0   : > { %2964 = vrot.lane.b32.xlu0 %v2963_v18, %s3799_s11  ;;  %v704_v24 = vrot.slane %v630_v48, 7  ;;  %v504_v62 = vmin.f32 %v4095_v51, 0.0  ;;  %vm472_vm13 = vcmp.gt.f32.partialorder %v4095_v51, 0.0 }
  0xf1   : > { %v489_v19 = vmin.f32 %v4052_v8, 0.0  ;;  %v4060_v21 = vsel %vm676_vm2, %v680_v15, %v681_v16  ;;  %v789_v22 = vsel %vm676_vm2, %v681_v16, 0.0  ;;  %v3580_v25 = vpop.eup %3579  ;;  %vm457_vm12 = vcmp.gt.f32.partialorder %v4052_v8, 0.0 }
  0xf2   : > { %v4069_v32 = vpack.i.bf16 %v4060_v21, %v4065_v26  ;;  %v846_v34 = vrot.slane %v789_v22, 1  ;;  %v844_v35 = vrot.slane %v4060_v21, 1  ;;  %v2736_v37 = vadd.f32 -1.0, %v3580_v25 }
  0xf3   : > { %v526_v31 = vmul.f32 1.442695, %v489_v19  ;;  %v922_v38 = vrot.slane %v4060_v21, 2  ;;  %v3582_v58 = vpop.eup %3581  ;;  %v924_v1 = vrot.slane %v789_v22, 2  ;;  %v4121_v6 = vsel %vm676_vm2, 0.0, %v704_v24 }
  0xf4   : > { %v424_v41 = vpop.f32.mrf.mxu2  ;;  %v4084_v43 = vsel %vm835_vm5, %v843_v39, %v844_v35  ;;  %v4087_v45 = vsel %vm835_vm5, %v844_v35, %v846_v34  ;;  %v631_v50 = vsel %vm471_vm10, %v4002_v44, %v2736_v37  ;;  %v4108_v44 = vsel %vm913_vm4, %v956_v56, %v957_v47 }
  0xf5   : > { %3583 = vpow2.f32 %v526_v31  ;;  %2999 = vrot.lane.b32.xlu2 %v4069_v32, %s3800_s12  ;;  %v4099_v52 = vadd.f32 %v3967_v53, %v424_v41  ;;  %v923_v54 = vsel %vm913_vm4, %v921_v42, %v922_v38  ;;  %v4105_v57 = vpack.i.bf16 %v4087_v45, %v4084_v43 }
  0xf6   : > { %v705_v59 = vrot.slane %v631_v50, 7  ;;  %v3008_v63 = vpack.i.bf16 %v923_v54, %v4027_v0  ;;  %v4118_v5 = vpack.i.bf16 %v960_v60, %v4108_v44  ;;  %v2721_v10 = vadd.f32 -1.0, %v3582_v58  ;;  %v387_v31 = vpop.f32.mrf.mxu0 }
  0xf7   : > { %2974 = vrot.lane.b32.xlu1 %v2973_v33, %s3795_s8  ;;  %5870 = vst [vmem:[#allocation9_spill] sm:$0xff] %v4105_v57  ;;  %v505_v2 = vmin.f32 %v4099_v52, 0.0  ;;  %v556_v0 = vmul.f32 1.442695, %v504_v62  ;;  %v4131_v14 = vsel %vm913_vm4, %v922_v38, %v924_v1  ;;  %v961_v18 = vrot.slane %v4121_v6, 2 }
  0xf8   : > { %2979 = vrot.lane.b32.xlu0 %v2973_v33, %s3800_s12  ;;  %5871 = vst [vmem:[#allocation10_spill] sm:$0xff] %v4118_v5  ;;  %v4124_v7 = vsel %vm676_vm2, %v704_v24, %v705_v59  ;;  %v616_v16 = vsel %vm456_vm11, %v4032_v3, %v2721_v10  ;;  %v4140_v22 = vpack.i.bf16 %v4131_v14, %v923_v54  ;;  %v883_v42 = vrot.slane %v4121_v6, 1 }
  0xf9   : > { %v558_v13 = vmul.f32 1.442695, %v505_v2  ;;  %v3028_v15 = vpack.i.bf16 %v4124_v7, %v4121_v6  ;;  %v962_v19 = vrot.slane %v4124_v7, 2  ;;  %3585 = vpow2.f32 %v556_v0 }
  0xfa   : > { %5872 = vst [vmem:[#allocation11_spill] sm:$0xff] %v4140_v22  ;;  %v683_v25 = vrot.slane %v616_v16, 7  ;;  %vm473_vm14 = vcmp.gt.f32.partialorder %v4099_v52, 0.0  ;;  %v3003_v54 = vpack.i.bf16 %v4084_v43, %v4046_v11  ;;  %v4169_v56 = vadd.f32 %v3967_v53, %v387_v31 }
  0xfb   : > { %v3584_v61 = vpop.eup %3583  ;;  %3587 = vpow2.f32 %v558_v13  ;;  %v963_v3 = vsel %vm913_vm4, %v961_v18, %v962_v19 }
  0xfc   : > { %v2722_v12 = vadd.f32 -1.0, %v3584_v61  ;;  %v427_v20 = vpop.f32.mrf.mxu2  ;;  %v4153_v35 = vsel %vm676_vm2, 0.0, %v683_v25  ;;  %v3038_v37 = vpack.i.bf16 %v963_v3, %v960_v60  ;;  %v490_v10 = vmin.f32 %v4169_v56, 0.0 }
  0xfd   : > { %3009 = vrot.lane.b32.xlu2 %v3008_v63, %s3796_s10  ;;  %v848_v41 = vrot.slane %v4153_v35, 1  ;;  %v4177_v61 = vadd.f32 %v3967_v53, %v427_v20  ;;  %vm458_vm1 = vcmp.gt.f32.partialorder %v4169_v56, 0.0 }
  0xfe   : > { %v617_v17 = vsel %vm457_vm12, %v4052_v8, %v2722_v12  ;;  %v797_v8 = vsel %vm676_vm2, %v705_v59, 0.0  ;;  %v884_v59 = vrot.slane %v4124_v7, 1  ;;  %v389_v60 = vpop.f32.mrf.mxu0  ;;  %v528_v18 = vmul.f32 1.442695, %v490_v10 }
  0xff   : > { %3014 = vrot.lane.b32.xlu1 %v4105_v57, %s3799_s11  ;;  %v684_v30 = vrot.slane %v617_v17, 7  ;;  %v3586_v34 = vpop.eup %3585  ;;  %v964_v39 = vrot.slane %v797_v8, 2  ;;  %v4195_v12 = vadd.f32 %v3967_v53, %v389_v60  ;;  %v506_v13 = vmin.f32 %v4177_v61, 0.0 }
 0x100   : > { %2989 = vrot.lane.b32.xlu0 %v4118_v5, %s3798_s21  ;;  %v2737_v47 = vadd.f32 -1.0, %v3586_v34  ;;  %v885_v0 = vsel %vm835_vm5, %v883_v42, %v884_v59  ;;  %v886_v17 = vrot.slane %v797_v8, 1  ;;  %3589 = vpow2.f32 %v528_v18  ;;  %v278_v5 = vld [vmem:[%s3904_s9 + $0xf8] sm:$0xff] }
 0x101   : > { %v4148_v33 = vsel %vm676_vm2, %v684_v30, 0.0  ;;  %v4156_v36 = vsel %vm676_vm2, %v683_v25, %v684_v30  ;;  %v3588_v38 = vpop.eup %3587  ;;  %v965_v24 = vsel %vm913_vm4, %v962_v19, %v964_v39  ;;  %v3033_v16 = vpack.i.bf16 %v885_v0, %v4042_v9 }
 0x102   : > { %v851_v40 = vrot.slane %v4148_v33, 1  ;;  %v2738_v48 = vadd.f32 -1.0, %v3588_v38  ;;  %v632_v43 = vsel %vm472_vm13, %v4095_v51, %v2737_v47  ;;  %v4191_v2 = vpack.i.bf16 %v965_v24, %v963_v3 }
 0x103   : > { %v707_v51 = vrot.slane %v632_v43, 7  ;;  %v491_v19 = vmin.f32 %v4195_v12, 0.0  ;;  %v560_v20 = vmul.f32 1.442695, %v506_v13  ;;  %v3053_v8 = vpack.i.bf16 %v4156_v36, %v4153_v35 }
 0x104   : > { %v429_v50 = vpop.f32.mrf.mxu2  ;;  %v633_v63 = vsel %vm473_vm14, %v4099_v52, %v2738_v48  ;;  %vm474_vm15 = vcmp.gt.f32.partialorder %v4177_v61, 0.0  ;;  %vm459_vm3 = vcmp.gt.f32.partialorder %v4195_v12, 0.0 }
 0x105   : > { %3019 = vrot.lane.b32.xlu2 %v4140_v22, %s3798_s21  ;;  %v4181_v62 = vadd.f32 %v3967_v53, %v429_v50  ;;  %v4208_v25 = vsel %vm676_vm2, 0.0, %v707_v51  ;;  %v530_v34 = vmul.f32 1.442695, %v491_v19  ;;  %3591 = vpow2.f32 %v560_v20 }
 0x106   : > { %v966_v38 = vrot.slane %v4208_v25, 2 }
 0x107   : > { %3029 = vrot.lane.b32.xlu1 %v3028_v15, %s3800_s12  ;;  %v507_v52 = vmin.f32 %v4181_v62, 0.0  ;;  %vm475_vm0 = vcmp.gt.f32.partialorder %v4181_v62, 0.0 }
 0x108   : > { %2994 = vrot.lane.b32.xlu0 %v4069_v32, %s3795_s8  ;;  %v849_v32 = vrot.slane %v4156_v36, 1 }
 0x109   : > { %v562_v31 = vmul.f32 1.442695, %v507_v52 }
 0x10a   : > { %v4172_v58 = vsel %vm835_vm5, %v849_v32, %v851_v40  ;;  %v850_v11 = vsel %vm835_vm5, %v848_v41, %v849_v32  ;;  %v392_v40 = vpop.f32.mrf.mxu0  ;;  %v3590_v32 = vpop.eup %3589 }
 0x10b   : > { %v4189_v1 = vpack.i.bf16 %v4172_v58, %v850_v11  ;;  %3593 = vpow2.f32 %v562_v31  ;;  %v3592_v47 = vpop.eup %3591  ;;  %v3063_v50 = vpack.i.bf16 %v850_v11, %v4087_v45  ;;  %v2723_v13 = vadd.f32 -1.0, %v3590_v32 }
 0x10c   : > { %3595 = vpow2.f32 %v530_v34  ;;  %v926_v11 = vrot.slane %v4153_v35, 2  ;;  %v4243_v52 = vadd.f32 %v3967_v53, %v392_v40 }
 0x10d   : > { %3024 = vrot.lane.b32.xlu2 %v3028_v15, %s3795_s8  ;;  %5873 = vst [vmem:[#allocation12_spill] sm:$0xff] %v4189_v1  ;;  %v708_v15 = vrot.slane %v633_v63, 7  ;;  %v618_v40 = vsel %vm458_vm1, %v4169_v56, %v2723_v13  ;;  %vm1788_vm1 = vcmask 64512  }
 0x10e   : > { %vm460_vm6 = vcmp.gt.f32.partialorder %v4243_v52, 0.0 }
 0x10f   : > { %3039 = vrot.lane.b32.xlu1 %v3038_v37, %s3796_s10  ;;  %v4211_v30 = vsel %vm676_vm2, %v707_v51, %v708_v15  ;;  %v887_v37 = vsel %vm835_vm5, %v884_v59, %v886_v17  ;;  %v798_v48 = vsel %vm676_vm2, %v708_v15, 0.0  ;;  %v888_v59 = vrot.slane %v4208_v25, 1 }
 0x110   : > { %3004 = vrot.lane.b32.xlu0 %v3003_v54, %s3797_s15  ;;  %v4215_v3 = vpack.i.bf16 %v4211_v30, %v4208_v25  ;;  %v967_v39 = vrot.slane %v4211_v30, 2  ;;  %v4225_v41 = vpack.i.bf16 %v887_v37, %v885_v0  ;;  %v889_v60 = vrot.slane %v4211_v30, 1 }
 0x111   : > { %v3594_v54 = vpop.eup %3593  ;;  %v969_v10 = vrot.slane %v798_v48, 2  ;;  %v2739_v0 = vadd.f32 -1.0, %v3592_v47  ;;  %v927_v15 = vrot.slane %v4156_v36, 2  ;;  %v891_v20 = vrot.slane %v798_v48, 1 }
 0x112   : > { %v968_v42 = vsel %vm913_vm4, %v966_v38, %v967_v39  ;;  %v3596_v63 = vpop.eup %3595  ;;  %v2740_v51 = vadd.f32 -1.0, %v3594_v54  ;;  %v890_v45 = vsel %vm835_vm5, %v888_v59, %v889_v60  ;;  %v929_v38 = vrot.slane %v4148_v33, 2 }
 0x113   : > { %v3098_v43 = vpack.i.bf16 %v968_v42, %v965_v24  ;;  %v2724_v24 = vadd.f32 -1.0, %v3596_v63  ;;  %v634_v17 = vsel %vm474_vm15, %v4177_v61, %v2739_v0  ;;  %v4252_v19 = vsel %vm913_vm4, %v967_v39, %v969_v10 }
 0x114   : > { %v635_v31 = vsel %vm475_vm0, %v4181_v62, %v2740_v51  ;;  %v3093_v34 = vpack.i.bf16 %v890_v45, %v887_v37  ;;  %v710_v47 = vrot.slane %v634_v17, 7  ;;  %v492_v61 = vmin.f32 %v4243_v52, 0.0  ;;  %v432_v37 = vpop.f32.mrf.mxu2 }
 0x115   : > { %3074 = vrot.lane.b32.xlu2 %v4189_v1, %s3799_s11  ;;  %v619_v32 = vsel %vm459_vm3, %v4195_v12, %v2724_v24  ;;  %v711_v39 = vrot.slane %v635_v31, 7  ;;  %v892_v56 = vsel %vm835_vm5, %v889_v60, %v891_v20  ;;  %v686_v12 = vrot.slane %v618_v40, 7 }
 0x116   : > { %v687_v48 = vrot.slane %v619_v32, 7  ;;  %v4270_v54 = vsel %vm913_vm4, %v927_v15, %v929_v38  ;;  %v532_v59 = vmul.f32 1.442695, %v492_v61  ;;  %v4279_v10 = vpack.i.bf16 %v892_v56, %v890_v45 }
 0x117   : > { %3049 = vrot.lane.b32.xlu1 %v4191_v2, %s3798_s21  ;;  %v4285_v60 = vsel %vm676_vm2, 0.0, %v686_v12  ;;  %vm1756_vm0 = vcmask 31744   ;;  %vm1820_vm3 = vcmask 97280  }
 0x118   : > { %3034 = vrot.lane.b32.xlu0 %v3033_v16, %s3797_s15  ;;  %v394_v16 = vpop.f32.mrf.mxu0  ;;  %5876 = vst [vmem:[#allocation15_spill] sm:$0xff] %v4279_v10  ;;  %v4288_v0 = vsel %vm676_vm2, %v686_v12, %v687_v48  ;;  %3597 = vpow2.f32 %v532_v59  ;;  %v853_v31 = vrot.slane %v4285_v60, 1  ;;  %v791_v40 = vsel %vm676_vm2, %v687_v48, 0.0 }
 0x119   : > { %v4249_v18 = vadd.f32 %v3967_v53, %v394_v16  ;;  %v3113_v13 = vpack.i.bf16 %v4288_v0, %v4285_v60  ;;  %v4304_v16 = vsel %vm676_vm2, %v711_v39, 0.0 }
 0x11a   : > { %v896_v32 = vrot.slane %v4304_v16, 1 }
 0x11b   : > { %v493_v62 = vmin.f32 %v4249_v18, 0.0  ;;  %vm461_vm7 = vcmp.gt.f32.partialorder %v4249_v18, 0.0 }
 0x11d   : > { %3089 = vrot.lane.b32.xlu2 %v4215_v3, %s3800_s12  ;;  %v534_v63 = vmul.f32 1.442695, %v493_v62 }
 0x11e   : > { %v3598_v20 = vpop.eup %3597 }
 0x11f   : > { %3054 = vrot.lane.b32.xlu1 %v3053_v8, %s3795_s8  ;;  %3599 = vpow2.f32 %v534_v63 }
 0x120   : > { %3044 = vrot.lane.b32.xlu0 %v4225_v41, %s3799_s11 }
 0x125   : > { %3099 = vrot.lane.b32.xlu2 %v3098_v43, %s3796_s10  ;;  %v4277_v43 = vsel %vm676_vm2, %v710_v47, %v711_v39  ;;  %v3600_v38 = vpop.eup %3599  ;;  %v2725_v39 = vadd.f32 -1.0, %v3598_v20 }
 0x126   : > { %5875 = vst [vmem:[#allocation14_spill] sm:$0xff] %v4277_v43  ;;  %v894_v45 = vrot.slane %v4277_v43, 1  ;;  %v2726_v12 = vadd.f32 -1.0, %v3600_v38  ;;  %v932_v38 = vrot.slane %v4288_v0, 2 }
 0x127   : > { %3064 = vrot.lane.b32.xlu1 %v3063_v50, %s3797_s15  ;;  %v4261_v50 = vpack.i.bf16 %v4252_v19, %v968_v42  ;;  %v4273_v42 = vsel %vm676_vm2, 0.0, %v710_v47  ;;  %v397_v47 = vpop.f32.mrf.mxu0  ;;  %v620_v63 = vsel %vm460_vm6, %v4243_v52, %v2725_v39 }
 0x128   : > { %3059 = vrot.lane.b32.xlu0 %v3053_v8, %s3800_s12  ;;  %v928_v8 = vsel %vm913_vm4, %v926_v11, %v927_v15  ;;  %v893_v51 = vrot.slane %v4273_v42, 1  ;;  %v434_v11 = vpop.f32.mrf.mxu2  ;;  %v4300_v15 = vadd.f32 %v3967_v53, %v432_v37  ;;  %v4325_v59 = vsel %vm835_vm5, %v894_v45, %v896_v32 }
 0x129   : > { %5874 = vst [vmem:[#allocation13_spill] sm:$0xff] %v4261_v50  ;;  %v3068_v33 = vpack.i.bf16 %v928_v8, %v4131_v14  ;;  %v4282_v14 = vpack.i.bf16 %v4270_v54, %v928_v8  ;;  %v4307_v17 = vadd.f32 %v3967_v53, %v434_v11  ;;  %v4330_v11 = vsel %vm461_vm7, %v4249_v18, %v2726_v12 }
 0x12a   : > { %v895_v24 = vsel %vm835_vm5, %v893_v51, %v894_v45  ;;  %v508_v61 = vmin.f32 %v4300_v15, 0.0  ;;  %v689_v52 = vrot.slane %v620_v63, 7  ;;  %v690_v45 = vrot.slane %v4330_v11, 7 }
 0x12b   : > { %5877 = vst [vmem:[#allocation16_spill] sm:$0xff] %v4282_v14  ;;  %v3148_v8 = vpack.i.bf16 %v895_v24, %v892_v56  ;;  %v509_v62 = vmin.f32 %v4307_v17, 0.0  ;;  %v972_v32 = vrot.slane %v4277_v43, 2  ;;  %vm476_vm8 = vcmp.gt.f32.partialorder %v4300_v15, 0.0 }
 0x12c   : > { %v564_v48 = vmul.f32 1.442695, %v508_v61  ;;  %vm477_vm9 = vcmp.gt.f32.partialorder %v4307_v17, 0.0 }
 0x12d   : > { %3109 = vrot.lane.b32.xlu2 %v4261_v50, %s3798_s21 }
 0x12e   : > { %3601 = vpow2.f32 %v564_v48  ;;  %v934_v48 = vrot.slane %v791_v40, 2 }
 0x12f   : > { %3094 = vrot.lane.b32.xlu1 %v3093_v34, %s3797_s15  ;;  %v854_v34 = vrot.slane %v4288_v0, 1 }
 0x130   : > { %3069 = vrot.lane.b32.xlu0 %v3068_v33, %s3796_s10  ;;  %v856_v33 = vrot.slane %v791_v40, 1  ;;  %v974_v40 = vrot.slane %v4304_v16, 2  ;;  %v935_v28 = vsel %vm913_vm4, %v932_v38, %v934_v48 }
 0x131   : > { %v855_v56 = vsel %vm835_vm5, %v853_v31, %v854_v34  ;;  %v931_v31 = vrot.slane %v4285_v60, 2 }
 0x132   : > { %v3123_v51 = vpack.i.bf16 %v855_v56, %v4172_v58  ;;  %v4333_v20 = vsel %vm835_vm5, %v854_v34, %v856_v33  ;;  %v4343_v58 = vadd.f32 %v3967_v53, %v397_v47  ;;  %v399_v34 = vpop.f32.mrf.mxu0  ;;  %v4361_v47 = vsel %vm676_vm2, 0.0, %v689_v52  ;;  %v437_v33 = vpop.f32.mrf.mxu2 }
 0x133   : > { %v4348_v18 = vpack.i.bf16 %v4333_v20, %v855_v56  ;;  %v4354_v61 = vadd.f32 %v3967_v53, %v399_v34 }
 0x134   : > { %v3602_v56 = vpop.eup %3601  ;;  %v494_v63 = vmin.f32 %v4343_v58, 0.0  ;;  %vm462_vm10 = vcmp.gt.f32.partialorder %v4343_v58, 0.0 }
 0x135   : > { %3114 = vrot.lane.b32.xlu2 %v3113_v13, %s3795_s8  ;;  %5880 = vst [vmem:[#allocation19_spill] sm:$0xff] %v4348_v18  ;;  %vm463_vm11 = vcmp.gt.f32.partialorder %v4354_v61, 0.0 }
 0x137   : > { %3104 = vrot.lane.b32.xlu1 %v4279_v10, %s3799_s11 }
 0x138   : > { %3079 = vrot.lane.b32.xlu0 %v4282_v14, %s3798_s21 }
 0x13d   : > { %3149 = vrot.lane.b32.xlu2 %v3148_v8, %s3797_s15  ;;  %v971_v8 = vrot.slane %v4273_v42, 2 }
 0x13e   : > { %v4317_v37 = vpop.permute.xlu2 %2949 }
 0x13f   : > { %3119 = vrot.lane.b32.xlu1 %v3113_v13, %s3800_s12  ;;  %5878 = vst [vmem:[#allocation17_spill] sm:$0xff] %v4317_v37  ;;  %v566_v13 = vmul.f32 1.442695, %v509_v62  ;;  %v4364_v62 = vsel %vm676_vm2, %v689_v52, %v690_v45  ;;  %v858_v52 = vrot.slane %v4361_v47, 1  ;;  %v2741_v37 = vadd.f32 -1.0, %v3602_v56 }
 0x140   : > { %3084 = vrot.lane.b32.xlu0 %v4215_v3, %s3795_s8  ;;  %v4338_v3 = vpack.i.bf16 %v4325_v59, %v895_v24  ;;  %v933_v24 = vsel %vm913_vm4, %v931_v31, %v932_v38  ;;  %5882 = vst [vmem:[#allocation21_spill] sm:$0xff] %v4364_v62  ;;  %v4372_v11 = vpack.i.bf16 %v4364_v62, %v4361_v47 }
 0x141   : > { %3603 = vpow2.f32 %v566_v13  ;;  %v3128_v12 = vpack.i.bf16 %v933_v24, %v4270_v54  ;;  %v973_v13 = vsel %vm913_vm4, %v971_v8, %v972_v32  ;;  %v859_v54 = vrot.slane %v4364_v62, 1 }
 0x142   : > { %5879 = vst [vmem:[#allocation18_spill] sm:$0xff] %v4338_v3  ;;  %v3153_v34 = vpack.i.bf16 %v973_v13, %v4252_v19  ;;  %v536_v8 = vmul.f32 1.442695, %v494_v63  ;;  %v4390_v29 = vpack.i.bf16 %v935_v28, %v933_v24  ;;  %v4393_v19 = vsel %vm913_vm4, %v972_v32, %v974_v40  ;;  %v439_v63 = vpop.f32.mrf.mxu2 }
 0x143   : > { %v860_v16 = vsel %vm835_vm5, %v858_v52, %v859_v54  ;;  %v636_v56 = vsel %vm476_vm8, %v4300_v15, %v2741_v37  ;;  %v936_v24 = vrot.slane %v4361_v47, 2  ;;  %v4403_v32 = vpack.i.bf16 %v4393_v19, %v973_v13 }
 0x144   : > { %5884 = vst [vmem:[#allocation23_spill] sm:$0xff] %v4390_v29  ;;  %3605 = vpow2.f32 %v536_v8  ;;  %v4412_v15 = vadd.f32 %v3967_v53, %v439_v63  ;;  %v713_v37 = vrot.slane %v636_v56, 7  ;;  %v4425_v8 = vpack.i.bf16 %v4277_v43, %v4273_v42 }
 0x145   : > { %3159 = vrot.lane.b32.xlu2 %v4338_v3, %s3799_s11  ;;  %5885 = vst [vmem:[#allocation24_spill] sm:$0xff] %v4403_v32  ;;  %vm1853_vm8 = vcmask 130048  }
 0x146   : > { %5888 = vst [vmem:[#allocation27_spill] sm:$0xff] %v4425_v8  ;;  %vm479_vm13 = vcmp.gt.f32.partialorder %v4412_v15, 0.0 }
 0x147   : > { %3124 = vrot.lane.b32.xlu1 %v3123_v51, %s3797_s15  ;;  %v4356_v39 = vpop.permute.xlu2 %2984  ;;  %v495_v51 = vmin.f32 %v4354_v61, 0.0  ;;  %v3604_v31 = vpop.eup %3603 }
 0x148   : > { %5881 = vst [vmem:[#allocation20_spill] sm:$0xff] %v4356_v39  ;;  %3134 = vrot.lane.b32.xlu0 %v4348_v18, %s3799_s11  ;;  %v277_v39 = vld [vmem:[%s3904_s9 + $0xf0] sm:$0xff] }
 0x149   : > { %v538_v46 = vmul.f32 1.442695, %v495_v51  ;;  %v294_v38 = vpack.c.bf16 %v278_v5, %v277_v39  ;;  %v3178_v51 = vpack.i.bf16 %v860_v16, %v4333_v20  ;;  %v4406_v5 = vadd.f32 %v3967_v53, %v437_v33 }
 0x14a   : > { %v3606_v13 = vpop.eup %3605 }
 0x14b   : > { %3607 = vpow2.f32 %v538_v46  ;;  %446 = vmatmul.bf16.gmra.mxu2 %v294_v38  ;;  %v510_v40 = vmin.f32 %v4406_v5, 0.0  ;;  %v4429_v38 = vsel %vm676_vm2, 0.0, %v713_v37  ;;  %vm478_vm12 = vcmp.gt.f32.partialorder %v4406_v5, 0.0 }
 0x14c   : > { %5889 = vst [vmem:[#allocation28_spill] sm:$0xff] %v4429_v38 }
 0x14d   : > { %3174 = vrot.lane.b32.xlu2 %v4372_v11, %s3800_s12  ;;  %v568_v49 = vmul.f32 1.442695, %v510_v40 }
 0x14f   : > { %3129 = vrot.lane.b32.xlu1 %v3128_v12, %s3796_s10  ;;  %v2742_v12 = vadd.f32 -1.0, %v3604_v31  ;;  %v4382_v9 = vpop.permute.xlu2 %2999  ;;  %v937_v31 = vrot.slane %v4364_v62, 2  ;;  %3609 = vpow2.f32 %v568_v49 }
 0x150   : > { %5883 = vst [vmem:[#allocation22_spill] sm:$0xff] %v4382_v9  ;;  %3154 = vrot.lane.b32.xlu0 %v3153_v34, %s3796_s10 }
 0x151   : > { %v637_v48 = vsel %vm477_vm9, %v4307_v17, %v2742_v12  ;;  %v792_v17 = vsel %vm676_vm2, %v690_v45, 0.0  ;;  %v938_v33 = vsel %vm913_vm4, %v936_v24, %v937_v31  ;;  %v3608_v52 = vpop.eup %3607  ;;  %v511_v12 = vmin.f32 %v4412_v15, 0.0 }
 0x152   : > { %v714_v20 = vrot.slane %v637_v48, 7  ;;  %v861_v45 = vrot.slane %v792_v17, 1  ;;  %v402_v48 = vpop.f32.mrf.mxu0  ;;  %v3183_v63 = vpack.i.bf16 %v938_v33, %v935_v28  ;;  %v2727_v24 = vadd.f32 -1.0, %v3606_v13 }
 0x153   : > { %v2728_v9 = vadd.f32 -1.0, %v3608_v52  ;;  %v898_v28 = vrot.slane %v4429_v38, 1  ;;  %vm1886_vm9 = vcmask 162816  }
 0x154   : > { %v4432_v56 = vsel %vm676_vm2, %v713_v37, %v714_v20  ;;  %v4442_v37 = vsel %vm835_vm5, %v859_v54, %v861_v45  ;;  %v622_v13 = vsel %vm462_vm10, %v4343_v58, %v2727_v24  ;;  %v442_v54 = vpop.f32.mrf.mxu2 }
 0x155   : > { %3179 = vrot.lane.b32.xlu2 %v3178_v51, %s3797_s15  ;;  %5890 = vst [vmem:[#allocation29_spill] sm:$0xff] %v4432_v56  ;;  %v939_v51 = vrot.slane %v792_v17, 2  ;;  %v899_v3 = vrot.slane %v4432_v56, 1  ;;  %v623_v40 = vsel %vm463_vm11, %v4354_v61, %v2728_v9  ;;  %v977_v58 = vrot.slane %v4432_v56, 2 }
 0x156   : > { %v692_v49 = vrot.slane %v622_v13, 7  ;;  %v693_v61 = vrot.slane %v623_v40, 7  ;;  %vm1919_vm11 = vcmask 195584  }
 0x157   : > { %3139 = vrot.lane.b32.xlu1 %v4390_v29, %s3798_s21  ;;  %v4415_v39 = vpop.permute.xlu2 %3009  ;;  %v570_v29 = vmul.f32 1.442695, %v511_v12  ;;  %v4452_v52 = vsel %vm913_vm4, %v937_v31, %v939_v51  ;;  %v800_v12 = vsel %vm676_vm2, %v714_v20, 0.0  ;;  %v4465_v31 = vadd.f32 %v3967_v53, %v402_v48 }
 0x158   : > { %3164 = vrot.lane.b32.xlu0 %v4403_v32, %s3798_s21  ;;  %v4468_v9 = vpack.i.bf16 %v4452_v52, %v938_v33  ;;  %v979_v20 = vrot.slane %v800_v12, 2 }
 0x159   : > { %v4409_v46 = vpop.permute.xlu1 %2959  ;;  %3611 = vpow2.f32 %v570_v29  ;;  %vm464_vm14 = vcmp.gt.f32.partialorder %v4465_v31, 0.0 }
 0x15a   : > { %5886 = vst [vmem:[#allocation25_spill] sm:$0xff] %v4409_v46  ;;  %v4421_v34 = vpop.permute.xlu0 %2954  ;;  %v404_v29 = vpop.f32.mrf.mxu0 }
 0x15b   : > { %5887 = vst [vmem:[#allocation26_spill] sm:$0xff] %v4421_v34  ;;  %v4478_v48 = vadd.f32 %v3967_v53, %v404_v29  ;;  %v4498_v29 = vsel %vm913_vm4, %v977_v58, %v979_v20 }
 0x15c   : > { %5894 = vst [vmem:[#allocation33_spill] sm:$0xff] %v4468_v9  ;;  %v444_v43 = vpop.f32.mrf.mxu2 }
 0x15d   : > { %3184 = vrot.lane.b32.xlu2 %v3183_v63, %s3796_s10  ;;  %v4459_v63 = vpack.i.bf16 %v4442_v37, %v860_v16  ;;  %v901_v16 = vrot.slane %v800_v12, 1  ;;  %v4486_v12 = vsel %vm676_vm2, 0.0, %v692_v49  ;;  %vm465_vm15 = vcmp.gt.f32.partialorder %v4478_v48, 0.0 }
 0x15e   : > { %5897 = vst [vmem:[#allocation36_spill] sm:$0xff] %v4486_v12 }
 0x15f   : > { %3144 = vrot.lane.b32.xlu1 %v4425_v8, %s3795_s8  ;;  %v4446_v17 = vpop.permute.xlu2 %3019  ;;  %5893 = vst [vmem:[#allocation32_spill] sm:$0xff] %v4459_v63 }
 0x160   : > { %3169 = vrot.lane.b32.xlu0 %v4372_v11, %s3795_s8  ;;  %v976_v11 = vrot.slane %v4429_v38, 2 }
 0x161   : > { %v4439_v62 = vpop.permute.xlu1 %2969 }
 0x162   : > { %5891 = vst [vmem:[#allocation30_spill] sm:$0xff] %v4439_v62  ;;  %v4456_v45 = vpop.permute.xlu0 %2964  ;;  %v900_v62 = vsel %vm835_vm5, %v898_v28, %v899_v3  ;;  %v978_v33 = vsel %vm913_vm4, %v976_v11, %v977_v58  ;;  %v3610_v28 = vpop.eup %3609  ;;  %v4495_v11 = vsel %vm835_vm5, %v899_v3, %v901_v16 }
 0x163   : > { %5892 = vst [vmem:[#allocation31_spill] sm:$0xff] %v4456_v45  ;;  %v3203_v51 = vpack.i.bf16 %v900_v62, %v4325_v59  ;;  %v496_v45 = vmin.f32 %v4465_v31, 0.0  ;;  %v3612_v40 = vpop.eup %3611  ;;  %v4489_v59 = vsel %vm676_vm2, %v692_v49, %v693_v61  ;;  %v3208_v53 = vpack.i.bf16 %v978_v33, %v4393_v19 }
 0x164   : > { %5898 = vst [vmem:[#allocation37_spill] sm:$0xff] %v4489_v59  ;;  %v2744_v50 = vadd.f32 -1.0, %v3612_v40  ;;  %v4503_v49 = vpack.i.bf16 %v4432_v56, %v4429_v38  ;;  %v863_v19 = vrot.slane %v4486_v12, 1  ;;  %v864_v3 = vrot.slane %v4489_v59, 1 }
 0x165   : > { %3194 = vrot.lane.b32.xlu2 %v4468_v9, %s3798_s21  ;;  %v497_v9 = vmin.f32 %v4478_v48, 0.0  ;;  %v4509_v16 = vpack.i.bf16 %v4495_v11, %v900_v62  ;;  %v4512_v58 = vpack.i.bf16 %v4498_v29, %v978_v33  ;;  %v793_v56 = vsel %vm676_vm2, %v693_v61, 0.0 }
 0x166   : > { %5900 = vst [vmem:[#allocation39_spill] sm:$0xff] %v4503_v49 }
 0x167   : > { %3189 = vrot.lane.b32.xlu1 %v4459_v63, %s3799_s11  ;;  %v4482_v13 = vpop.permute.xlu2 %3024  ;;  %v2743_v63 = vadd.f32 -1.0, %v3610_v28  ;;  %5901 = vst [vmem:[#allocation40_spill] sm:$0xff] %v4509_v16  ;;  %v542_v28 = vmul.f32 1.442695, %v497_v9 }
 0x168   : > { %5896 = vst [vmem:[#allocation35_spill] sm:$0xff] %v4482_v13  ;;  %3204 = vrot.lane.b32.xlu0 %v3203_v51, %s3797_s15  ;;  %v540_v51 = vmul.f32 1.442695, %v496_v45  ;;  %v4519_v45 = vld [vmem:[%s5813_s2] ss:$0 sm:$0xff] }
 0x169   : > { %v4475_v24 = vpop.permute.xlu1 %2974  ;;  %5902 = vst [vmem:[#allocation41_spill] sm:$0xff] %v4512_v58  ;;  %v4522_v20 = vadd.f32 %v4519_v45, %v442_v54  ;;  %v4529_v33 = vadd.f32 %v4519_v45, %v444_v43  ;;  %v639_v54 = vsel %vm479_vm13, %v4412_v15, %v2744_v50  ;;  %v3228_v15 = vpack.i.bf16 %v4489_v59, %v4486_v12 }
 0x16a   : > { %5895 = vst [vmem:[#allocation34_spill] sm:$0xff] %v4475_v24  ;;  %v4491_v24 = vpop.permute.xlu0 %2979  ;;  %3613 = vpow2.f32 %v540_v51  ;;  %v717_v18 = vrot.slane %v639_v54, 7  ;;  %v944_v54 = vrot.slane %v793_v56, 2 }
 0x16b   : > { %5899 = vst [vmem:[#allocation38_spill] sm:$0xff] %v4491_v24  ;;  %v865_v24 = vsel %vm835_vm5, %v863_v19, %v864_v3  ;;  %3615 = vpow2.f32 %v542_v28  ;;  %v513_v43 = vmin.f32 %v4529_v33, 0.0  ;;  %v941_v19 = vrot.slane %v4486_v12, 2 }
 0x16c   : > { %v942_v28 = vrot.slane %v4489_v59, 2  ;;  %vm480_vm6 = vcmp.gt.f32.partialorder %v4522_v20, 0.0  ;;  %vm481_vm7 = vcmp.gt.f32.partialorder %v4529_v33, 0.0 }
 0x16d   : > { %3199 = vrot.lane.b32.xlu2 %v4503_v49, %s3795_s8  ;;  %v512_v49 = vmin.f32 %v4522_v20, 0.0  ;;  %v574_v51 = vmul.f32 1.442695, %v513_v43 }
 0x16f   : > { %3209 = vrot.lane.b32.xlu1 %v3208_v53, %s3796_s10  ;;  %v4531_v40 = vpop.permute.xlu2 %3074  ;;  %v638_v53 = vsel %vm478_vm12, %v4406_v5, %v2743_v63  ;;  %v866_v5 = vrot.slane %v793_v56, 1  ;;  %v572_v50 = vmul.f32 1.442695, %v512_v49 }
 0x170   : > { %3214 = vrot.lane.b32.xlu0 %v4509_v16, %s3799_s11  ;;  %v716_v38 = vrot.slane %v638_v53, 7  ;;  %v3233_v16 = vpack.i.bf16 %v865_v24, %v4442_v37  ;;  %v3614_v61 = vpop.eup %3613 }
 0x171   : > { %v4526_v62 = vpop.permute.xlu1 %3014  ;;  %v2729_v43 = vadd.f32 -1.0, %v3614_v61  ;;  %3617 = vpow2.f32 %v572_v50  ;;  %v4582_v61 = vsel %vm913_vm4, %v942_v28, %v944_v54 }
 0x172   : > { %v4540_v9 = vpop.permute.xlu0 %2989  ;;  %v4554_v37 = vsel %vm676_vm2, 0.0, %v716_v38  ;;  %v4557_v53 = vsel %vm676_vm2, %v716_v38, %v717_v18  ;;  %3619 = vpow2.f32 %v574_v51  ;;  %v943_v38 = vsel %vm913_vm4, %v941_v19, %v942_v28 }
 0x173   : > { %5903 = vst [vmem:[#allocation42_spill] sm:$0xff] %v4540_v9  ;;  %v407_v9 = vpop.f32.mrf.mxu0  ;;  %v904_v12 = vrot.slane %v4557_v53, 1  ;;  %v982_v50 = vrot.slane %v4557_v53, 2  ;;  %v624_v51 = vsel %vm464_vm14, %v4465_v31, %v2729_v43  ;;  %v801_v28 = vsel %vm676_vm2, %v717_v18, 0.0 }
 0x174   : > { %5905 = vst [vmem:[#allocation44_spill] sm:$0xff] %v4557_v53  ;;  %v4601_v31 = vpack.i.bf16 %v4582_v61, %v943_v38  ;;  %v984_v14 = vrot.slane %v801_v28, 2  ;;  %v3017_v18 = vunpack.i.h.bf16 %v4526_v62 }
 0x175   : > { %3234 = vrot.lane.b32.xlu2 %v3233_v16, %s3797_s15  ;;  %v3616_v16 = vpop.eup %3615 }
 0x176   : > { %v2730_v56 = vadd.f32 -1.0, %v3616_v16 }
 0x177   : > { %3219 = vrot.lane.b32.xlu1 %v4512_v58, %s3798_s21  ;;  %v4559_v49 = vpop.permute.xlu2 %3089  ;;  %v903_v58 = vrot.slane %v4554_v37, 1  ;;  %v3618_v19 = vpop.eup %3617 }
 0x178   : > { %3229 = vrot.lane.b32.xlu0 %v3228_v15, %s3800_s12  ;;  %v4594_v16 = vsel %vm465_vm15, %v4478_v48, %v2730_v56  ;;  %v3620_v43 = vpop.eup %3619  ;;  %v906_v56 = vrot.slane %v801_v28, 1  ;;  %v2745_v8 = vadd.f32 -1.0, %v3618_v19 }
 0x179   : > { %v4549_v63 = vpop.permute.xlu1 %3029 }
 0x17a   : > { %5904 = vst [vmem:[#allocation43_spill] sm:$0xff] %v4549_v63  ;;  %v4563_v63 = vsel %vm835_vm5, %v864_v3, %v866_v5  ;;  %v4566_v59 = vpop.permute.xlu0 %2994  ;;  %v4577_v3 = vadd.f32 %v4519_v45, %v407_v9  ;;  %v981_v5 = vrot.slane %v4554_v37, 2  ;;  %v905_v9 = vsel %vm835_vm5, %v903_v58, %v904_v12 }
 0x17b   : > { %v4573_v32 = vpack.i.bf16 %v4563_v63, %v865_v24  ;;  %v3238_v24 = vpack.i.bf16 %v943_v38, %v4452_v52  ;;  %v3258_v58 = vpack.i.bf16 %v905_v9, %v4495_v11  ;;  %v3011_v38 = vunpack.i.l.bf16 %v4415_v39 }
 0x17c   : > { %v498_v52 = vmin.f32 %v4577_v3, 0.0  ;;  %v983_v57 = vsel %vm913_vm4, %v981_v5, %v982_v50  ;;  %v2997_v11 = vunpack.i.h.bf16 %v4566_v59  ;;  %v4626_v22 = vsel %vm835_vm5, %v904_v12, %v906_v56 }
 0x17d   : > { %5906 = vst [vmem:[#allocation45_spill] sm:$0xff] %v4573_v32  ;;  %3244 = vrot.lane.b32.xlu2 %v4573_v32, %s3799_s11  ;;  %v695_v32 = vrot.slane %v624_v51, 7  ;;  %v2746_v51 = vadd.f32 -1.0, %v3620_v43  ;;  %v3263_v10 = vpack.i.bf16 %v983_v57, %v4498_v29  ;;  %v3022_v43 = vunpack.i.h.bf16 %v4446_v17 }
 0x17e   : > { %v4641_v12 = vsel %vm913_vm4, %v982_v50, %v984_v14  ;;  %v544_v56 = vmul.f32 1.442695, %v498_v52  ;;  %vm466_vm10 = vcmp.gt.f32.partialorder %v4577_v3, 0.0 }
 0x17f   : > { %3224 = vrot.lane.b32.xlu1 %v3228_v15, %s3795_s8  ;;  %v4597_v54 = vpop.permute.xlu2 %3099 }
 0x180   : > { %3239 = vrot.lane.b32.xlu0 %v3238_v24, %s3796_s10  ;;  %v409_v24 = vpop.f32.mrf.mxu0  ;;  %3621 = vpow2.f32 %v544_v56 }
 0x181   : > { %v4590_v15 = vpop.permute.xlu1 %3039  ;;  %v4616_v28 = vadd.f32 %v4519_v45, %v409_v24 }
 0x182   : > { %v3005_v48 = vpop.permute.xlu0 %3004 }
 0x183   : > { %v3006_v1 = vunpack.i.l.bf16 %v3005_v48  ;;  %vm467_vm12 = vcmp.gt.f32.partialorder %v4616_v28, 0.0 }
 0x185   : > { %v1759_v5 = vsel %vm1756_vm0, %v3987_v27, %v3006_v1  ;;  %3264 = vrot.lane.b32.xlu2 %v3263_v10, %s3796_s10  ;;  %v640_v27 = vsel %vm480_vm6, %v4522_v20, %v2745_v8  ;;  %v4630_v1 = vsel %vm481_vm7, %v4529_v33, %v2746_v51  ;;  %v5909_v20 = vrot.slane %v4594_v16, 7 }
 0x186   : > { %v1791_v19 = vsel %vm1788_vm1, %v1759_v5, %v3011_v38  ;;  %v4638_v38 = vsel %vm676_vm2, 0.0, %v695_v32  ;;  %v499_v51 = vmin.f32 %v4616_v28, 0.0 }
 0x187   : > { %3259 = vrot.lane.b32.xlu1 %v3258_v58, %s3797_s15  ;;  %v1824_v58 = vsel %vm1820_vm3, %v1791_v19, %v2997_v11  ;;  %v4632_v24 = vpop.permute.xlu2 %3109  ;;  %5908 = vst [vmem:[#allocation47_spill] sm:$0xff] %v4638_v38  ;;  %v3007_v11 = vunpack.i.h.bf16 %v3005_v48  ;;  %v4649_v33 = vsel %vm676_vm2, %v695_v32, %v5909_v20  ;;  %v719_v19 = vrot.slane %v640_v27, 7 }
 0x188   : > { %3249 = vrot.lane.b32.xlu0 %v4601_v31, %s3798_s21  ;;  %v1857_v10 = vsel %vm1853_vm8, %v1824_v58, %v3017_v18  ;;  %5910 = vst [vmem:[#allocation48_spill] sm:$0xff] %v4649_v33  ;;  %v4653_v18 = vpack.i.bf16 %v4626_v22, %v905_v9  ;;  %v720_v48 = vrot.slane %v4630_v1, 7  ;;  %v3042_v58 = vunpack.i.h.bf16 %v4590_v15 }
 0x189   : > { %v4621_v29 = vpop.permute.xlu1 %3049  ;;  %v4644_v8 = vsel %vm1886_vm9, %v1857_v10, %v3022_v43  ;;  %v3012_v43 = vunpack.i.h.bf16 %v4415_v39  ;;  %v3041_v10 = vunpack.i.l.bf16 %v4590_v15  ;;  %v4660_v32 = vpack.i.bf16 %v4641_v12, %v983_v57 }
 0x18a   : > { %5907 = vst [vmem:[#allocation46_spill] sm:$0xff] %v4621_v29  ;;  %v3035_v5 = vpop.permute.xlu0 %3034  ;;  %v3027_v9 = vunpack.i.h.bf16 %v4482_v13  ;;  %v1760_v52 = vsel %vm1756_vm0, %v4065_v26, %v3007_v11  ;;  %v2957_v1 = vunpack.i.h.bf16 %v4421_v34  ;;  %v4677_v57 = vpack.i.bf16 %v4557_v53, %v4554_v37 }
 0x18b   : > { %v3037_v14 = vunpack.i.h.bf16 %v3035_v5  ;;  %v3036_v50 = vunpack.i.l.bf16 %v3035_v5  ;;  %v868_v11 = vrot.slane %v4638_v38, 1  ;;  %v869_v5 = vrot.slane %v4649_v33, 1 }
 0x18c   : > { %v946_v34 = vrot.slane %v4638_v38, 2 }
 0x18d   : > { %v1776_v27 = vsel %vm1756_vm0, %v4121_v6, %v3037_v14  ;;  %v1775_v39 = vsel %vm1756_vm0, %v4018_v55, %v3036_v50  ;;  %3274 = vrot.lane.b32.xlu2 %v4660_v32, %s3798_s21  ;;  %v546_v14 = vmul.f32 1.442695, %v499_v51  ;;  %v3076_v50 = vunpack.i.l.bf16 %v4531_v40 }
 0x18e   : > { %v1807_v15 = vsel %vm1788_vm1, %v1775_v39, %v3041_v10  ;;  %v4682_v26 = vsel %vm1788_vm1, %v1776_v27, %v3042_v58  ;;  %v1792_v58 = vsel %vm1788_vm1, %v1760_v52, %v3012_v43  ;;  %v2962_v27 = vunpack.i.h.bf16 %v4409_v46 }
 0x18f   : > { %3269 = vrot.lane.b32.xlu1 %v4653_v18, %s3799_s11  ;;  %v1840_v55 = vsel %vm1820_vm3, %v1807_v15, %v3027_v9  ;;  %v4689_v10 = vpop.permute.xlu2 %3114  ;;  %v4696_v39 = vsel %vm676_vm2, 0.0, %v719_v19  ;;  %v4699_v9 = vsel %vm676_vm2, %v719_v19, %v720_v48  ;;  %v1758_v51 = vsel %vm1756_vm0, %v3978_v23, %v2957_v1 }
 0x190   : > { %3254 = vrot.lane.b32.xlu0 %v4677_v57, %s3795_s8  ;;  %v2996_v15 = vunpack.i.l.bf16 %v4566_v59  ;;  %v3283_v43 = vpack.i.bf16 %v4649_v33, %v4638_v38  ;;  %v870_v19 = vsel %vm835_vm5, %v868_v11, %v869_v5  ;;  %v5912_v23 = vrot.slane %v4594_v16, 7 }
 0x191   : > { %v4679_v20 = vpop.permute.xlu1 %3054  ;;  %3623 = vpow2.f32 %v546_v14  ;;  %v3052_v1 = vunpack.i.h.bf16 %v4621_v29  ;;  %v909_v11 = vrot.slane %v4699_v9, 1  ;;  %v3288_v14 = vpack.i.bf16 %v870_v19, %v4563_v63 }
 0x192   : > { %v3056_v6 = vunpack.i.l.bf16 %v4679_v20  ;;  %v4705_v13 = vpop.permute.xlu0 %3044  ;;  %v794_v59 = vsel %vm676_vm2, %v5912_v23, 0.0  ;;  %v3021_v63 = vunpack.i.l.bf16 %v4446_v17 }
 0x193   : > { %5911 = vst [vmem:[#allocation49_spill] sm:$0xff] %v4705_v13  ;;  %v3047_v46 = vunpack.i.h.bf16 %v4705_v13  ;;  %v3622_v13 = vpop.eup %3621  ;;  %v871_v29 = vrot.slane %v794_v59, 1 }
 0x194   : > { %v1825_v56 = vsel %vm1820_vm3, %v1792_v58, %v3056_v6  ;;  %v947_v6 = vrot.slane %v4649_v33, 2 }
 0x195   : > { %v4710_v52 = vsel %vm1853_vm8, %v1825_v56, %v3076_v50  ;;  %v1790_v50 = vsel %vm1788_vm1, %v1758_v51, %v2962_v27  ;;  %v1873_v58 = vsel %vm1853_vm8, %v1840_v55, %v3047_v46  ;;  %v908_v56 = vrot.slane %v4696_v39, 1  ;;  %3279 = vrot.lane.b32.xlu2 %v3283_v43, %s3795_s8 }
 0x196   : > { %v1823_v33 = vsel %vm1820_vm3, %v1790_v50, %v2996_v15  ;;  %v4727_v16 = vsel %vm1886_vm9, %v1873_v58, %v3052_v1  ;;  %v3016_v27 = vunpack.i.l.bf16 %v4526_v62  ;;  %v948_v46 = vsel %vm913_vm4, %v946_v34, %v947_v6 }
 0x197   : > { %3284 = vrot.lane.b32.xlu1 %v3283_v43, %s3800_s12  ;;  %v4733_v55 = vpop.permute.xlu2 %3149  ;;  %v4737_v51 = vsel %vm676_vm2, %v720_v48, 0.0  ;;  %v910_v1 = vsel %vm835_vm5, %v908_v56, %v909_v11  ;;  %v3624_v43 = vpop.eup %3623  ;;  %v949_v50 = vrot.slane %v794_v59, 2  ;;  %v3293_v34 = vpack.i.bf16 %v948_v46, %v4582_v61 }
 0x198   : > { %3289 = vrot.lane.b32.xlu0 %v3288_v14, %s3797_s15  ;;  %v1856_v15 = vsel %vm1853_vm8, %v1823_v33, %v3016_v27  ;;  %v2731_v58 = vadd.f32 -1.0, %v3622_v13  ;;  %v4745_v14 = vsel %vm835_vm5, %v869_v5, %v871_v29  ;;  %v911_v48 = vrot.slane %v4737_v51, 1 }
 0x199   : > { %v3065_v23 = vpop.permute.xlu1 %3064  ;;  %v1889_v33 = vsel %vm1886_vm9, %v1856_v15, %v3021_v63  ;;  %v3313_v59 = vpack.i.bf16 %v910_v1, %v4626_v22  ;;  %v2732_v61 = vadd.f32 -1.0, %v3624_v43  ;;  %v4760_v29 = vpack.i.bf16 %v4745_v14, %v870_v19 }
 0x19a   : > { %v3060_v62 = vpop.permute.xlu0 %3059  ;;  %v626_v22 = vsel %vm466_vm10, %v4577_v3, %v2731_v58  ;;  %v4770_v56 = vsel %vm913_vm4, %v947_v6, %v949_v50  ;;  %v3066_v27 = vunpack.i.l.bf16 %v3065_v23  ;;  %v912_v19 = vsel %vm835_vm5, %v909_v11, %v911_v48 }
 0x19b   : > { %v3062_v53 = vunpack.i.h.bf16 %v3060_v62  ;;  %v3061_v38 = vunpack.i.l.bf16 %v3060_v62  ;;  %v627_v43 = vsel %vm467_vm12, %v4616_v28, %v2732_v61  ;;  %v4782_v6 = vpack.i.bf16 %v4770_v56, %v948_v46 }
 0x19c   : > { %v4787_v58 = vpack.i.bf16 %v912_v19, %v910_v1  ;;  %v3057_v11 = vunpack.i.h.bf16 %v4679_v20  ;;  %v1761_v28 = vsel %vm1756_vm0, %v4060_v21, %v3066_v27  ;;  %v699_v46 = vrot.slane %v627_v43, 7 }
 0x19d   : > { %v4752_v17 = vsel %vm1919_vm11, %v1889_v33, %v3061_v38  ;;  %v4756_v13 = vsel %vm1919_vm11, %v4644_v8, %v3062_v53  ;;  %3314 = vrot.lane.b32.xlu2 %v3313_v59, %s3797_s15  ;;  %v3101_v53 = vunpack.i.l.bf16 %v4597_v54  ;;  %v3067_v8 = vunpack.i.h.bf16 %v3065_v23 }
 0x19e   : > { %v698_v23 = vrot.slane %v626_v22, 7  ;;  %v3116_v33 = vunpack.i.l.bf16 %v4689_v10  ;;  %v3077_v48 = vunpack.i.h.bf16 %v4531_v40  ;;  %v986_v22 = vrot.slane %v4696_v39, 2 }
 0x19f   : > { %3294 = vrot.lane.b32.xlu1 %v3293_v34, %s3796_s10  ;;  %v4773_v15 = vpop.permute.xlu2 %3159 }
 0x1a0   : > { %3299 = vrot.lane.b32.xlu0 %v4760_v29, %s3799_s11  ;;  %v4823_v43 = vsel %vm676_vm2, 0.0, %v698_v23 }
 0x1a1   : > { %v4762_v5 = vpop.permute.xlu1 %3094 }
 0x1a2   : > { %v3096_v38 = vunpack.i.l.bf16 %v4762_v5  ;;  %v3070_v63 = vpop.permute.xlu0 %3069 }
 0x1a3   : > { %v3072_v62 = vunpack.i.h.bf16 %v3070_v63  ;;  %v3071_v34 = vunpack.i.l.bf16 %v3070_v63 }
 0x1a4   : > { %v1777_v3 = vsel %vm1756_vm0, %v4124_v7, %v3096_v38  ;;  %v1762_v7 = vsel %vm1756_vm0, %v4153_v35, %v3067_v8  ;;  %v987_v38 = vrot.slane %v4699_v9, 2  ;;  %v4816_v8 = vsel %vm676_vm2, %v699_v46, 0.0 }
 0x1a5   : > { %v4785_v50 = vsel %vm1788_vm1, %v1777_v3, %v3101_v53  ;;  %v1794_v59 = vsel %vm1788_vm1, %v1762_v7, %v3072_v62  ;;  %v1793_v1 = vsel %vm1788_vm1, %v1761_v28, %v3071_v34  ;;  %3324 = vrot.lane.b32.xlu2 %v4787_v58, %s3799_s11  ;;  %v4813_v53 = vsel %vm676_vm2, %v698_v23, %v699_v46 }
 0x1a6   : > { %v1826_v61 = vsel %vm1820_vm3, %v1793_v1, %v3057_v11  ;;  %v4804_v35 = vsel %vm1820_vm3, %v1794_v59, %v3116_v33  ;;  %v4820_v3 = vpack.i.bf16 %v4699_v9, %v4696_v39  ;;  %v988_v34 = vsel %vm913_vm4, %v986_v22, %v987_v38 }
 0x1a7   : > { %3304 = vrot.lane.b32.xlu1 %v4782_v6, %s3798_s21  ;;  %v1859_v21 = vsel %vm1853_vm8, %v1826_v61, %v3077_v48  ;;  %v4809_v40 = vpop.permute.xlu2 %3174  ;;  %v4829_v33 = vpack.i.bf16 %v4813_v53, %v4823_v43  ;;  %v874_v11 = vrot.slane %v4813_v53, 1  ;;  %v3097_v7 = vunpack.i.h.bf16 %v4762_v5 }
 0x1a8   : > { %1063 = vrot.lane.b32.xlu0 %v912_v19, %s3797_s15  ;;  %v876_v19 = vrot.slane %v4816_v8, 1  ;;  %v3318_v46 = vpack.i.bf16 %v988_v34, %v4641_v12  ;;  %v989_v59 = vrot.slane %v4737_v51, 2  ;;  %v3092_v12 = vunpack.i.h.bf16 %v4559_v49 }
 0x1a9   : > { %v3105_v20 = vpop.permute.xlu1 %3104  ;;  %v3102_v51 = vunpack.i.h.bf16 %v4597_v54 }
 0x1aa   : > { %v3080_v27 = vpop.permute.xlu0 %3079  ;;  %v4844_v5 = vsel %vm835_vm5, %v874_v11, %v876_v19  ;;  %v4866_v54 = vsel %vm1919_vm11, %v4727_v16, %v3092_v12 }
 0x1ab   : > { %v3082_v63 = vunpack.i.h.bf16 %v3080_v27  ;;  %v3081_v62 = vunpack.i.l.bf16 %v3080_v27  ;;  %v3348_v19 = vpack.i.bf16 %v4035_v4, %v4844_v5 }
 0x1ad   : > { %v1891_v23 = vsel %vm1886_vm9, %v4710_v52, %v3081_v62  ;;  %v1892_v28 = vsel %vm1886_vm9, %v1859_v21, %v3082_v63  ;;  %3339 = vrot.lane.b32.xlu2 %v4829_v33, %s3800_s12  ;;  %v1778_v52 = vsel %vm1756_vm0, %v4208_v25, %v3097_v7  ;;  %v990_v62 = vsel %vm913_vm4, %v987_v38, %v989_v59 }
 0x1ae   : > { %v873_v25 = vrot.slane %v4823_v43, 1  ;;  %v3107_v7 = vunpack.i.h.bf16 %v3105_v20 }
 0x1af   : > { %3309 = vrot.lane.b32.xlu1 %v4820_v3, %s3795_s8  ;;  %v3180_v22 = vpop.permute.xlu2 %3179 }
 0x1b0   : > { %3319 = vrot.lane.b32.xlu0 %v3318_v46, %s3796_s10  ;;  %v4884_v12 = vsel %vm835_vm5, %v873_v25, %v874_v11 }
 0x1b1   : > { %v3120_v48 = vpop.permute.xlu1 %3119  ;;  %v3343_v11 = vpack.i.bf16 %v4884_v12, %v4745_v14  ;;  %v954_v14 = vrot.slane %v4816_v8, 2 }
 0x1b2   : > { %v3122_v1 = vunpack.i.h.bf16 %v3120_v48  ;;  %v3121_v61 = vunpack.i.l.bf16 %v3120_v48  ;;  %v3085_v63 = vpop.permute.xlu0 %3084 }
 0x1b3   : > { %v3087_v46 = vunpack.i.h.bf16 %v3085_v63  ;;  %v3086_v48 = vunpack.i.l.bf16 %v3085_v63  ;;  %v3181_v63 = vunpack.i.l.bf16 %v3180_v22 }
 0x1b4   : > { %v4849_v21 = vsel %vm1919_vm11, %v1891_v23, %v3121_v61  ;;  %v4852_v27 = vsel %vm1919_vm11, %v1892_v28, %v3122_v1  ;;  %v3106_v23 = vunpack.i.l.bf16 %v3105_v20  ;;  %v4862_v28 = vsel %vm1788_vm1, %v1778_v52, %v3102_v51 }
 0x1b5   : > { %5913 = vst [vmem:[#allocation50_spill] sm:$0xff] %v4852_v27  ;;  %v1842_v38 = vsel %vm1820_vm3, %v4785_v50, %v3087_v46  ;;  %v1841_v59 = vsel %vm1820_vm3, %v4682_v26, %v3086_v48  ;;  %v4872_v1 = vpack.i.bf16 %v990_v62, %v988_v34  ;;  %v951_v61 = vrot.slane %v4823_v43, 2  ;;  %3349 = vrot.lane.b32.xlu2 %v3348_v19, %s3797_s15 }
 0x1b6   : > { %v3182_v20 = vunpack.i.h.bf16 %v3180_v22  ;;  %v4876_v27 = vsel %vm1853_vm8, %v1842_v38, %v3107_v7  ;;  %v4879_v52 = vsel %vm1853_vm8, %v1841_v59, %v3106_v23  ;;  %v952_v50 = vrot.slane %v4813_v53, 2 }
 0x1b7   : > { %1156 = vrot.lane.b32.xlu1 %v990_v62, %s3796_s10  ;;  %v3185_v26 = vpop.permute.xlu2 %3184  ;;  %v1765_v46 = vsel %vm1756_vm0, %v4288_v0, %v3181_v63 }
 0x1b8   : > { %3329 = vrot.lane.b32.xlu0 %v4872_v1, %s3798_s21  ;;  %v3187_v34 = vunpack.i.h.bf16 %v3185_v26  ;;  %v3186_v22 = vunpack.i.l.bf16 %v3185_v26  ;;  %v4889_v51 = vsel %vm913_vm4, %v951_v61, %v952_v50  ;;  %v1766_v62 = vsel %vm1756_vm0, %v4361_v47, %v3182_v20 }
 0x1b9   : > { %v3125_v16 = vpop.permute.xlu1 %3124  ;;  %v3353_v59 = vpack.i.bf16 %v4889_v51, %v4770_v56  ;;  %v3117_v61 = vunpack.i.h.bf16 %v4689_v10  ;;  %v3152_v26 = vunpack.i.h.bf16 %v4733_v55 }
 0x1ba   : > { %v3135_v48 = vpop.permute.xlu0 %3134  ;;  %v4898_v19 = vsel %vm1788_vm1, %v1765_v46, %v3186_v22  ;;  %v4901_v25 = vsel %vm1788_vm1, %v1766_v62, %v3187_v34  ;;  %v3127_v23 = vunpack.i.h.bf16 %v3125_v16  ;;  %v3126_v38 = vunpack.i.l.bf16 %v3125_v16 }
 0x1bb   : > { %v3136_v7 = vunpack.i.l.bf16 %v3135_v48  ;;  %v3151_v16 = vunpack.i.l.bf16 %v4733_v55  ;;  %v3137_v8 = vunpack.i.h.bf16 %v3135_v48 }
 0x1bc   : > { %v1764_v56 = vsel %vm1756_vm0, %v4285_v60, %v3127_v23  ;;  %v1763_v34 = vsel %vm1756_vm0, %v4156_v36, %v3126_v38  ;;  %v4925_v60 = vsel %vm913_vm4, %v952_v50, %v954_v14 }
 0x1bd   : > { %v1860_v0 = vsel %vm1853_vm8, %v4804_v35, %v3136_v7  ;;  %3354 = vrot.lane.b32.xlu2 %v3353_v59, %s3796_s10  ;;  %v1780_v7 = vsel %vm1756_vm0, %v4273_v42, %v3152_v26  ;;  %v3358_v50 = vpack.i.bf16 %v4108_v44, %v4925_v60  ;;  %v5915_v44 = vld [vmem:[#allocation15_spill] sm:$0xff] }
 0x1bf   : > { %3344 = vrot.lane.b32.xlu1 %v3343_v11, %s3797_s15  ;;  %v4917_v35 = vpop.permute.xlu2 %3194 }
 0x1c0   : > { %3334 = vrot.lane.b32.xlu0 %v4829_v33, %s3795_s8  ;;  %v1779_v33 = vsel %vm1756_vm0, %v4211_v30, %v3151_v16 }
 0x1c1   : > { %v3130_v47 = vpop.permute.xlu1 %3129 }
 0x1c2   : > { %v3132_v20 = vunpack.i.h.bf16 %v3130_v47  ;;  %v3131_v63 = vunpack.i.l.bf16 %v3130_v47  ;;  %v3155_v46 = vpop.permute.xlu0 %3154 }
 0x1c3   : > { %v3157_v55 = vunpack.i.h.bf16 %v3155_v46  ;;  %v3156_v11 = vunpack.i.l.bf16 %v3155_v46 }
 0x1c4   : > { %v1795_v10 = vsel %vm1788_vm1, %v1763_v34, %v3131_v63  ;;  %v1796_v22 = vsel %vm1788_vm1, %v1764_v56, %v3132_v20  ;;  %v5914_v20 = vld [vmem:[#allocation11_spill] sm:$0xff]  ;;  %v3162_v56 = vunpack.i.h.bf16 %v4773_v15 }
 0x1c5   : > { %v1828_v62 = vsel %vm1820_vm3, %v1795_v10, %v3117_v61  ;;  %v1812_v48 = vsel %vm1788_vm1, %v1780_v7, %v3157_v55  ;;  %v1811_v23 = vsel %vm1788_vm1, %v1779_v33, %v3156_v11  ;;  %3374 = vrot.lane.b32.xlu2 %v4191_v2, %s3802_s16 }
 0x1c6   : > { %v1861_v36 = vsel %vm1853_vm8, %v1828_v62, %v3137_v8  ;;  %v5916_v8 = vld [vmem:[#allocation27_spill] sm:$0xff] }
 0x1c7   : > { %3369 = vrot.lane.b32.xlu1 %v4225_v41, %s3801_s14  ;;  %v3200_v47 = vpop.permute.xlu2 %3199 }
 0x1c8   : > { %3359 = vrot.lane.b32.xlu0 %v3358_v50, %s3796_s10  ;;  %v3201_v30 = vunpack.i.l.bf16 %v3200_v47 }
 0x1c9   : > { %v3140_v38 = vpop.permute.xlu1 %3139 }
 0x1ca   : > { %v3142_v42 = vunpack.i.h.bf16 %v3140_v38  ;;  %v3141_v59 = vunpack.i.l.bf16 %v3140_v38  ;;  %v4947_v61 = vpop.permute.xlu0 %3164  ;;  %v1845_v2 = vsel %vm1820_vm3, %v1812_v48, %v3201_v30 }
 0x1cc   : > { %v4942_v41 = vsel %vm1886_vm9, %v1860_v0, %v3141_v59  ;;  %v4945_v14 = vsel %vm1886_vm9, %v1861_v36, %v3142_v42  ;;  %v3161_v0 = vunpack.i.l.bf16 %v4773_v15  ;;  %v5917_v15 = vld [vmem:[#allocation12_spill] sm:$0xff]  ;;  %v3197_v42 = vunpack.i.h.bf16 %v4917_v35 }
 0x1cd   : > { %3389 = vrot.lane.b32.xlu2 %v5915_v44, %s3801_s14  ;;  %v3196_v59 = vunpack.i.l.bf16 %v4917_v35  ;;  %v3112_v35 = vunpack.i.h.bf16 %v4632_v24 }
 0x1cf   : > { %3384 = vrot.lane.b32.xlu1 %v5914_v20, %s3802_s16  ;;  %v4956_v34 = vpop.permute.xlu2 %3234  ;;  %v5919_v20 = vld [vmem:[#allocation9_spill] sm:$0xff] }
 0x1d0   : > { %3364 = vrot.lane.b32.xlu0 %v5916_v8, %s3800_s12  ;;  %v3111_v8 = vunpack.i.l.bf16 %v4632_v24 }
 0x1d1   : > { %v3145_v63 = vpop.permute.xlu1 %3144 }
 0x1d2   : > { %v3147_v26 = vunpack.i.h.bf16 %v3145_v63  ;;  %v3146_v16 = vunpack.i.l.bf16 %v3145_v63  ;;  %v3170_v11 = vpop.permute.xlu0 %3169 }
 0x1d3   : > { %v3172_v36 = vunpack.i.h.bf16 %v3170_v11  ;;  %v3171_v7 = vunpack.i.l.bf16 %v3170_v11 }
 0x1d4   : > { %v1843_v10 = vsel %vm1820_vm3, %v4862_v28, %v3146_v16  ;;  %v1844_v62 = vsel %vm1820_vm3, %v1811_v23, %v3147_v26  ;;  %v5918_v28 = vld [vmem:[#allocation16_spill] sm:$0xff] }
 0x1d5   : > { %v4964_v46 = vsel %vm1853_vm8, %v1843_v10, %v3161_v0  ;;  %v4967_v55 = vsel %vm1853_vm8, %v1844_v62, %v3162_v56  ;;  %v1830_v33 = vsel %vm1820_vm3, %v4898_v19, %v3172_v36  ;;  %v1829_v48 = vsel %vm1820_vm3, %v1796_v22, %v3171_v7  ;;  %3404 = vrot.lane.b32.xlu2 %v5918_v28, %s3802_s16  ;;  %v5920_v0 = vld [vmem:[#allocation24_spill] sm:$0xff]  ;;  %v5921_v10 = vld [vmem:[#allocation19_spill] sm:$0xff] }
 0x1d6   : > { %v4994_v7 = vsel %vm1886_vm9, %v4879_v52, %v3111_v8 }
 0x1d7   : > { %3399 = vrot.lane.b32.xlu1 %v5917_v15, %s3801_s14  ;;  %v4978_v30 = vpop.permute.xlu2 %3244  ;;  %v4998_v15 = vsel %vm1886_vm9, %v4876_v27, %v3112_v35 }
 0x1d8   : > { %3379 = vrot.lane.b32.xlu0 %v5919_v20, %s3801_s14 }
 0x1d9   : > { %v3190_v23 = vpop.permute.xlu1 %3189 }
 0x1da   : > { %v3192_v50 = vunpack.i.h.bf16 %v3190_v23  ;;  %v3191_v38 = vunpack.i.l.bf16 %v3190_v23  ;;  %v3205_v22 = vpop.permute.xlu0 %3204  ;;  %v5923_v23 = vld [vmem:[#allocation14_spill] sm:$0xff] }
 0x1db   : > { %v3207_v16 = vunpack.i.h.bf16 %v3205_v22  ;;  %v3206_v56 = vunpack.i.l.bf16 %v3205_v22 }
 0x1dc   : > { %v1862_v44 = vsel %vm1853_vm8, %v1829_v48, %v3191_v38  ;;  %v1863_v19 = vsel %vm1853_vm8, %v1830_v33, %v3192_v50  ;;  %v3202_v33 = vunpack.i.h.bf16 %v3200_v47  ;;  %v5922_v48 = vld [vmem:[#allocation28_spill] sm:$0xff]  ;;  %v5924_v38 = vld [vmem:[#allocation13_spill] sm:$0xff]  ;;  %v447_v47 = vpop.f32.mrf.mxu2 }
 0x1dd   : > { %v1895_v63 = vsel %vm1886_vm9, %v1862_v44, %v3196_v59  ;;  %v1896_v26 = vsel %vm1886_vm9, %v1863_v19, %v3197_v42  ;;  %3419 = vrot.lane.b32.xlu2 %v5921_v10, %s3801_s14  ;;  %v1782_v28 = vsel %vm1756_vm0, %v5922_v48, %v3207_v16  ;;  %v1781_v24 = vsel %vm1756_vm0, %v5923_v23, %v3206_v56  ;;  %v5925_v19 = vld [vmem:[#allocation39_spill] sm:$0xff]  ;;  %v5926_v56 = vld [vmem:[#allocation40_spill] sm:$0xff] }
 0x1df   : > { %3414 = vrot.lane.b32.xlu1 %v5920_v0, %s3802_s16  ;;  %v5004_v50 = vpop.permute.xlu2 %3264 }
 0x1e0   : > { %3394 = vrot.lane.b32.xlu0 %v5924_v38, %s3802_s16 }
 0x1e1   : > { %v3210_v62 = vpop.permute.xlu1 %3209 }
 0x1e2   : > { %v3212_v11 = vunpack.i.h.bf16 %v3210_v62  ;;  %v3211_v36 = vunpack.i.l.bf16 %v3210_v62  ;;  %v3215_v59 = vpop.permute.xlu0 %3214  ;;  %v5927_v62 = vld [vmem:[#allocation18_spill] sm:$0xff] }
 0x1e3   : > { %v3217_v20 = vunpack.i.h.bf16 %v3215_v59  ;;  %v3216_v44 = vunpack.i.l.bf16 %v3215_v59 }
 0x1e4   : > { %v1813_v42 = vsel %vm1788_vm1, %v1781_v24, %v3211_v36  ;;  %v5010_v52 = vsel %vm1788_vm1, %v1782_v28, %v3212_v11  ;;  %v5928_v28 = vld [vmem:[#allocation32_spill] sm:$0xff]  ;;  %v449_v23 = vpop.f32.mrf.mxu2 }
 0x1e5   : > { %v1846_v27 = vsel %vm1820_vm3, %v1813_v42, %v3202_v33  ;;  %v1878_v22 = vsel %vm1853_vm8, %v1845_v2, %v3216_v44  ;;  %3434 = vrot.lane.b32.xlu2 %v5926_v56, %s3801_s14  ;;  %v5929_v42 = vld [vmem:[#allocation33_spill] sm:$0xff]  ;;  %v5043_v44 = vadd.f32 %v4519_v45, %v449_v23 }
 0x1e6   : > { %v1879_v16 = vsel %vm1853_vm8, %v1846_v27, %v3217_v20  ;;  %v5040_v27 = vadd.f32 %v4519_v45, %v447_v47 }
 0x1e7   : > { %3429 = vrot.lane.b32.xlu1 %v5925_v19, %s3800_s12  ;;  %v5019_v10 = vpop.permute.xlu2 %3274  ;;  %v3237_v19 = vunpack.i.h.bf16 %v4956_v34  ;;  %vm483_vm14 = vcmp.gt.f32.partialorder %v5043_v44, 0.0 }
 0x1e8   : > { %3409 = vrot.lane.b32.xlu0 %v5927_v62, %s3801_s14  ;;  %vm482_vm13 = vcmp.gt.f32.partialorder %v5040_v27, 0.0 }
 0x1e9   : > { %v3220_v0 = vpop.permute.xlu1 %3219 }
 0x1ea   : > { %v3222_v35 = vunpack.i.h.bf16 %v3220_v0  ;;  %v3221_v8 = vunpack.i.l.bf16 %v3220_v0  ;;  %v3230_v2 = vpop.permute.xlu0 %3229 }
 0x1eb   : > { %v3232_v33 = vunpack.i.h.bf16 %v3230_v2  ;;  %v3231_v48 = vunpack.i.l.bf16 %v3230_v2  ;;  %v3176_v2 = vunpack.i.l.bf16 %v4809_v40 }
 0x1ec   : > { %v5024_v11 = vsel %vm1886_vm9, %v1878_v22, %v3221_v8  ;;  %v5027_v36 = vsel %vm1886_vm9, %v1879_v16, %v3222_v35  ;;  %v3236_v22 = vunpack.i.l.bf16 %v4956_v34  ;;  %v514_v35 = vmin.f32 %v5040_v27, 0.0 }
 0x1ed   : > { %v5032_v24 = vsel %vm1919_vm11, %v1895_v63, %v3231_v48  ;;  %v5035_v38 = vsel %vm1919_vm11, %v1896_v26, %v3232_v33  ;;  %3449 = vrot.lane.b32.xlu2 %v5929_v42, %s3802_s16  ;;  %v3246_v63 = vunpack.i.l.bf16 %v4978_v30  ;;  %v5930_v26 = vld [vmem:[#allocation23_spill] sm:$0xff]  ;;  %v515_v34 = vmin.f32 %v5043_v44, 0.0  ;;  %v5931_v33 = vld [vmem:[#allocation36_spill] sm:$0xff] }
 0x1ee   : > { %v1768_v48 = vsel %vm1756_vm0, %v5931_v33, %v3237_v19  ;;  %v3177_v42 = vunpack.i.h.bf16 %v4809_v40 }
 0x1ef   : > { %3444 = vrot.lane.b32.xlu1 %v5928_v28, %s3801_s14  ;;  %v5048_v16 = vpop.permute.xlu2 %3279  ;;  %v5932_v28 = vld [vmem:[#allocation21_spill] sm:$0xff] }
 0x1f0   : > { %3424 = vrot.lane.b32.xlu0 %v5930_v26, %s3802_s16  ;;  %v1767_v23 = vsel %vm1756_vm0, %v5932_v28, %v3236_v22 }
 0x1f1   : > { %v3225_v59 = vpop.permute.xlu1 %3224 }
 0x1f2   : > { %v3226_v20 = vunpack.i.l.bf16 %v3225_v59  ;;  %v3227_v47 = vunpack.i.h.bf16 %v3225_v59  ;;  %v3240_v0 = vpop.permute.xlu0 %3239  ;;  %v3247_v59 = vunpack.i.h.bf16 %v4978_v30 }
 0x1f3   : > { %v3242_v8 = vunpack.i.h.bf16 %v3240_v0  ;;  %v3241_v62 = vunpack.i.l.bf16 %v3240_v0  ;;  %v578_v0 = vmul.f32 1.442695, %v515_v34 }
 0x1f4   : > { %v1831_v56 = vsel %vm1820_vm3, %v4901_v25, %v3226_v20  ;;  %v3281_v25 = vunpack.i.l.bf16 %v5048_v16 }
 0x1f5   : > { %v1864_v45 = vsel %vm1853_vm8, %v1831_v56, %v3246_v63  ;;  %v1800_v20 = vsel %vm1788_vm1, %v1768_v48, %v3242_v8  ;;  %v1799_v63 = vsel %vm1788_vm1, %v1767_v23, %v3241_v62  ;;  %v576_v56 = vmul.f32 1.442695, %v514_v35  ;;  %3464 = vrot.lane.b32.xlu2 %v4660_v32, %s3802_s16  ;;  %v5933_v32 = vld [vmem:[#allocation41_spill] sm:$0xff] }
 0x1f6   : > { %v1832_v26 = vsel %vm1820_vm3, %v1799_v63, %v3227_v47  ;;  %v5073_v22 = vsel %vm1820_vm3, %v1800_v20, %v3281_v25  ;;  %v5082_v8 = vsel %vm1919_vm11, %v4945_v14, %v3177_v42  ;;  %v3266_v47 = vunpack.i.l.bf16 %v5004_v50  ;;  %v5934_v62 = vld [vmem:[#allocation29_spill] sm:$0xff] }
 0x1f7   : > { %3459 = vrot.lane.b32.xlu1 %v4653_v18, %s3801_s14  ;;  %v5077_v18 = vsel %vm1919_vm11, %v4942_v41, %v3176_v2  ;;  %v1865_v30 = vsel %vm1853_vm8, %v1832_v26, %v3247_v59  ;;  %v5085_v35 = vpop.permute.xlu2 %3314  ;;  %3625 = vpow2.f32 %v576_v56  ;;  %v3166_v14 = vunpack.i.l.bf16 %v4947_v61 }
 0x1f8   : > { %3439 = vrot.lane.b32.xlu0 %v5933_v32, %s3802_s16  ;;  %3627 = vpow2.f32 %v578_v0  ;;  %v3167_v42 = vunpack.i.h.bf16 %v4947_v61  ;;  %v3267_v26 = vunpack.i.h.bf16 %v5004_v50 }
 0x1f9   : > { %v3260_v19 = vpop.permute.xlu1 %3259  ;;  %v5104_v63 = vsel %vm1886_vm9, %v4964_v46, %v3166_v14 }
 0x1fa   : > { %v3261_v40 = vunpack.i.l.bf16 %v3260_v19  ;;  %v3250_v41 = vpop.permute.xlu0 %3249  ;;  %v3262_v48 = vunpack.i.h.bf16 %v3260_v19  ;;  %v5113_v61 = vsel %vm1886_vm9, %v4967_v55, %v3167_v42 }
 0x1fb   : > { %v3252_v34 = vunpack.i.h.bf16 %v3250_v41  ;;  %v3251_v28 = vunpack.i.l.bf16 %v3250_v41 }
 0x1fc   : > { %v1783_v33 = vsel %vm1756_vm0, %v5934_v62, %v3261_v40  ;;  %v1784_v20 = vsel %vm1756_vm0, %v4554_v37, %v3262_v48 }
 0x1fd   : > { %v1815_v2 = vsel %vm1788_vm1, %v1783_v33, %v3266_v47  ;;  %v1897_v23 = vsel %vm1886_vm9, %v1864_v45, %v3251_v28  ;;  %v1898_v25 = vsel %vm1886_vm9, %v1865_v30, %v3252_v34  ;;  %3479 = vrot.lane.b32.xlu2 %v4820_v3, %s3800_s12  ;;  %v5116_v40 = vsel %vm1788_vm1, %v1784_v20, %v3267_v26  ;;  %v5935_v34 = vld [vmem:[#allocation45_spill] sm:$0xff] }
 0x1ff   : > { %3474 = vrot.lane.b32.xlu1 %v4601_v31, %s3802_s16  ;;  %v3626_v31 = vpop.eup %3625  ;;  %v5107_v56 = vpop.permute.xlu2 %3324 }
 0x200   : > { %3454 = vrot.lane.b32.xlu0 %v4677_v57, %s3800_s12  ;;  %v3628_v3 = vpop.eup %3627  ;;  %v2747_v46 = vadd.f32 -1.0, %v3626_v31  ;;  %v5154_v31 = vpack.i.bf16 %v4925_v60, %v4889_v51  ;;  %v2878_v60 = vld [vmem:[%s5814_s3 + $0x28] sm:$0xff] }
 0x201   : > { %v3270_v59 = vpop.permute.xlu1 %3269  ;;  %v2748_v50 = vadd.f32 -1.0, %v3628_v3 }
 0x202   : > { %v3272_v45 = vunpack.i.h.bf16 %v3270_v59  ;;  %v3271_v19 = vunpack.i.l.bf16 %v3270_v59  ;;  %v3255_v37 = vpop.permute.xlu0 %3254  ;;  %v642_v33 = vsel %vm482_vm13, %v5040_v27, %v2747_v46  ;;  %v5150_v27 = vpack.i.bf16 %v4844_v5, %v4884_v12  ;;  %v5937_v46 = vld [vmem:[#allocation37_spill] sm:$0xff] }
 0x203   : > { %v3257_v30 = vunpack.i.h.bf16 %v3255_v37  ;;  %v3256_v0 = vunpack.i.l.bf16 %v3255_v37  ;;  %v722_v14 = vrot.slane %v642_v33, 7 }
 0x205   : > { %v1848_v57 = vsel %vm1820_vm3, %v1815_v2, %v3257_v30  ;;  %v1847_v55 = vsel %vm1820_vm3, %v5010_v52, %v3256_v0  ;;  %3494 = vrot.lane.b32.xlu2 %v4760_v29, %s3801_s14  ;;  %v643_v52 = vsel %vm483_vm14, %v5043_v44, %v2748_v50 }
 0x206   : > { %v5126_v47 = vsel %vm1853_vm8, %v1848_v57, %v3272_v45  ;;  %v5129_v32 = vsel %vm1853_vm8, %v1847_v55, %v3271_v19  ;;  %v723_v44 = vrot.slane %v643_v52, 7  ;;  %v3282_v45 = vunpack.i.h.bf16 %v5048_v16  ;;  %v5936_v19 = vld [vmem:[#allocation47_spill] sm:$0xff] }
 0x207   : > { %3489 = vrot.lane.b32.xlu1 %v4872_v1, %s3802_s16  ;;  %v2880_v1 = vld [vmem:[%s5814_s3 + $0x38] sm:$0xff]  ;;  %v5138_v48 = vpop.permute.xlu2 %3339 }
 0x208   : > { %3469 = vrot.lane.b32.xlu0 %v5935_v34, %s3801_s14  ;;  %2889 = vmatpush.bf16.msra.mxu3 %v2880_v1  ;;  %v803_v12 = vsel %vm676_vm2, %v723_v44, 0.0  ;;  %v724_v51 = vsel %vm676_vm2, %v722_v14, %v723_v44 }
 0x209   : > { %v3285_v62 = vpop.permute.xlu1 %3284  ;;  %2135 = vmatpush.bf16.msra.mxu1 %v2880_v1  ;;  %v1001_v55 = vrot.slane %v803_v12, 2  ;;  %v999_v52 = vrot.slane %v724_v51, 2  ;;  %v996_v34 = vrot.slane %v803_v12, 1  ;;  %v994_v44 = vrot.slane %v724_v51, 1 }
 0x20a   : > { %v3287_v41 = vunpack.i.h.bf16 %v3285_v62  ;;  %v3286_v2 = vunpack.i.l.bf16 %v3285_v62  ;;  %v3290_v42 = vpop.permute.xlu0 %3289 }
 0x20b   : > { %v3292_v59 = vunpack.i.h.bf16 %v3290_v42  ;;  %v3291_v20 = vunpack.i.l.bf16 %v3290_v42 }
 0x20c   : > { %v5143_v28 = vsel %vm1919_vm11, %v1897_v23, %v3286_v2  ;;  %v5146_v29 = vsel %vm1919_vm11, %v1898_v25, %v3287_v41  ;;  %v2879_v23 = vld [vmem:[%s5814_s3 + $0x30] sm:$0xff]  ;;  %v787_v25 = vsel %vm676_vm2, 0.0, %v722_v14  ;;  %vm1952_vm2 = vcmask 228352  }
 0x20d   : > { %3509 = vrot.lane.b32.xlu2 %v5154_v31, %s3798_s21  ;;  %2890 = vmatpush.bf16.msra.mxu3 %v2879_v23  ;;  %v1770_v37 = vsel %vm1756_vm0, %v5936_v19, %v3292_v59  ;;  %v1769_v30 = vsel %vm1756_vm0, %v5937_v46, %v3291_v20  ;;  %v3518_v1 = vpack.i.bf16 %v724_v51, %v787_v25  ;;  %v998_v2 = vrot.slane %v787_v25, 2  ;;  %v2877_v59 = vld [vmem:[%s5814_s3 + $0x20] sm:$0xff] }
 0x20e   : > { %2136 = vmatpush.bf16.msra.mxu1 %v2879_v23  ;;  %v993_v42 = vrot.slane %v787_v25, 1 }
 0x20f   : > { %3504 = vrot.lane.b32.xlu1 %v5150_v27, %s3799_s11  ;;  %v5174_v0 = vpop.permute.xlu2 %3349  ;;  %v1000_v12 = vsel %vm913_vm4, %v998_v2, %v999_v52 }
 0x210   : > { %3484 = vrot.lane.b32.xlu0 %v4787_v58, %s3801_s14 }
 0x211   : > { %v3295_v5 = vpop.permute.xlu1 %3294  ;;  %2891 = vmatpush.bf16.msra.mxu3 %v2878_v60 }
 0x212   : > { %v3297_v26 = vunpack.i.h.bf16 %v3295_v5  ;;  %v3296_v3 = vunpack.i.l.bf16 %v3295_v5  ;;  %v3300_v62 = vpop.permute.xlu0 %3299  ;;  %2137 = vmatpush.bf16.msra.mxu1 %v2878_v60  ;;  %v995_v60 = vsel %vm835_vm5, %v993_v42, %v994_v44  ;;  %v5938_v42 = vld [vmem:[#allocation44_spill] sm:$0xff] }
 0x213   : > { %v3302_v33 = vunpack.i.h.bf16 %v3300_v62  ;;  %v3301_v41 = vunpack.i.l.bf16 %v3300_v62  ;;  %v3316_v62 = vunpack.i.l.bf16 %v5085_v35 }
 0x214   : > { %v1801_v50 = vsel %vm1788_vm1, %v1769_v30, %v3296_v3  ;;  %v5180_v57 = vsel %vm1788_vm1, %v1770_v37, %v3297_v26  ;;  %v1002_v26 = vsel %vm913_vm4, %v999_v52, %v1001_v55  ;;  %v3317_v55 = vunpack.i.h.bf16 %v5085_v35 }
 0x215   : > { %v1834_v16 = vsel %vm1820_vm3, %v1801_v50, %v3282_v45  ;;  %v1866_v58 = vsel %vm1853_vm8, %v5073_v22, %v3301_v41  ;;  %3514 = vrot.lane.b32.xlu2 %v3518_v1, %s3795_s8  ;;  %2892 = vmatpush.bf16.msra.mxu3 %v2877_v59  ;;  %v2876_v22 = vld [vmem:[%s5814_s3 + $0x18] sm:$0xff]  ;;  %v997_v45 = vsel %vm835_vm5, %v994_v44, %v996_v34  ;;  %v2875_v50 = vld [vmem:[%s5814_s3 + $0x10] sm:$0xff]  ;;  %v2874_v41 = vld [vmem:[%s5814_s3 + $0x8] sm:$0xff]  ;;  %vm1985_vm4 = vcmask 261120  }
 0x216   : > { %v1867_v14 = vsel %vm1853_vm8, %v1834_v16, %v3302_v33  ;;  %2138 = vmatpush.bf16.msra.mxu1 %v2877_v59  ;;  %v3528_v37 = vpack.i.bf16 %v1002_v26, %v1000_v12  ;;  %v3533_v46 = vpack.i.bf16 %v997_v45, %v995_v60  ;;  %v3326_v16 = vunpack.i.l.bf16 %v5107_v56  ;;  %v5939_v60 = vld [vmem:[#allocation7_spill] sm:$0xff] }
 0x217   : > { %3519 = vrot.lane.b32.xlu1 %v3518_v1, %s3800_s12  ;;  %v5196_v25 = vpop.permute.xlu2 %3354  ;;  %v1785_v44 = vsel %vm1756_vm0, %v5938_v42, %v3316_v62  ;;  %vm2018_vm5 = vcmask 293888  }
 0x218   : > { %3499 = vrot.lane.b32.xlu0 %v4782_v6, %s3802_s16  ;;  %vm5361_vm15 = vmpackc.low %vm2018_vm5, %vm2018_vm5 }
 0x219   : > { %v3305_v20 = vpop.permute.xlu1 %3304  ;;  %2893 = vmatpush.bf16.msra.mxu3 %v2876_v22 }
 0x21a   : > { %v3307_v23 = vunpack.i.h.bf16 %v3305_v20  ;;  %v3306_v5 = vunpack.i.l.bf16 %v3305_v20  ;;  %v1064_v19 = vpop.permute.xlu0 %1063  ;;  %2139 = vmatpush.bf16.msra.mxu1 %v2876_v22 }
 0x21c   : > { %v5201_v3 = vsel %vm1886_vm9, %v1866_v58, %v3306_v5  ;;  %v5204_v51 = vsel %vm1886_vm9, %v1867_v14, %v3307_v23  ;;  %v1786_v14 = vsel %vm1756_vm0, %v4696_v39, %v3317_v55  ;;  %v2873_v23 = vld [vmem:[%s5814_s3] sm:$0xff]  ;;  %v1787_v39 = vsel %vm1756_vm0, %v4699_v9, %v1064_v19 }
 0x21d   : > { %3534 = vrot.lane.b32.xlu2 %v3533_v46, %s3801_s14  ;;  %2894 = vmatpush.bf16.msra.mxu3 %v2875_v50  ;;  %v3553_v9 = vpack.i.bf16 %v4035_v4, %v5939_v60 }
 0x21e   : > { %2140 = vmatpush.bf16.msra.mxu1 %v2875_v50  ;;  %v5940_v50 = vld [vmem:[#allocation5_spill] sm:$0xff] }
 0x21f   : > { %3529 = vrot.lane.b32.xlu1 %v3528_v37, %s3798_s21  ;;  %v5216_v1 = vpop.permute.xlu2 %3374 }
 0x220   : > { %3524 = vrot.lane.b32.xlu0 %v3533_v46, %s3799_s11  ;;  %v3276_v46 = vunpack.i.l.bf16 %v5019_v10 }
 0x221   : > { %v3310_v6 = vpop.permute.xlu1 %3309  ;;  %2895 = vmatpush.bf16.msra.mxu3 %v2874_v41 }
 0x222   : > { %v3311_v30 = vunpack.i.l.bf16 %v3310_v6  ;;  %v3312_v2 = vunpack.i.h.bf16 %v3310_v6  ;;  %v3320_v52 = vpop.permute.xlu0 %3319  ;;  %2141 = vmatpush.bf16.msra.mxu1 %v2874_v41  ;;  %v5266_v62 = vsel %vm1886_vm9, %v5129_v32, %v3276_v46  ;;  %v5941_v41 = vmov 0.0  }
 0x223   : > { %v3322_v35 = vunpack.i.h.bf16 %v3320_v52  ;;  %v3321_v58 = vunpack.i.l.bf16 %v3320_v52  ;;  %v3352_v46 = vunpack.i.h.bf16 %v5174_v0 }
 0x224   : > { %v1849_v33 = vsel %vm1820_vm3, %v5116_v40, %v3311_v30  ;;  %v3327_v40 = vunpack.i.h.bf16 %v5107_v56 }
 0x225   : > { %v1882_v34 = vsel %vm1853_vm8, %v1849_v33, %v3326_v16  ;;  %v5233_v59 = vsel %vm1788_vm1, %v1786_v14, %v3322_v35  ;;  %v1817_v20 = vsel %vm1788_vm1, %v1785_v44, %v3321_v58  ;;  %3549 = vrot.lane.b32.xlu2 %v5154_v31, %s3802_s16  ;;  %2896 = vmatpush.bf16.msra.mxu3 %v2873_v23  ;;  %v3277_v31 = vunpack.i.h.bf16 %v5019_v10  ;;  %v5943_v35 = vld [vmem:[#allocation26_spill] sm:$0xff] }
 0x226   : > { %v1850_v5 = vsel %vm1820_vm3, %v1817_v20, %v3312_v2  ;;  %2142 = vmatpush.bf16.msra.mxu1 %v2873_v23  ;;  %v3356_v10 = vunpack.i.l.bf16 %v5196_v25  ;;  %v3357_v2 = vunpack.i.h.bf16 %v5196_v25  ;;  %v2956_v58 = vunpack.i.l.bf16 %v5943_v35  ;;  %v5944_v20 = vld [vmem:[#allocation34_spill] sm:$0xff] }
 0x227   : > { %3544 = vrot.lane.b32.xlu1 %v5150_v27, %s3801_s14  ;;  %v1883_v12 = vsel %vm1853_vm8, %v1850_v5, %v3327_v40  ;;  %v5248_v26 = vpop.permute.xlu2 %3389  ;;  %v5270_v16 = vsel %vm1886_vm9, %v5126_v47, %v3277_v31  ;;  %v2976_v23 = vunpack.i.l.bf16 %v5944_v20  ;;  %v5945_v25 = vld [vmem:[#allocation10_spill] sm:$0xff] }
 0x228   : > { %3539 = vrot.lane.b32.xlu0 %v3528_v37, %s3802_s16 }
 0x229   : > { %v1157_v56 = vpop.permute.xlu1 %1156 }
 0x22a   : > { %v5245_v27 = vsel %vm1788_vm1, %v1787_v39, %v1157_v56  ;;  %v3330_v22 = vpop.permute.xlu0 %3329  ;;  %v5946_v39 = vld [vmem:[#allocation25_spill] sm:$0xff] }
 0x22b   : > { %v3332_v45 = vunpack.i.h.bf16 %v3330_v22  ;;  %v3331_v19 = vunpack.i.l.bf16 %v3330_v22 }
 0x22d   : > { %v5257_v6 = vsel %vm1886_vm9, %v1882_v34, %v3331_v19  ;;  %v5260_v30 = vsel %vm1886_vm9, %v1883_v12, %v3332_v45  ;;  %1723 = vrot.lane.b32.xlu2 %v5940_v50, %s3802_s16  ;;  %v5942_v34 = vld [vmem:[#allocation48_spill] sm:$0xff]  ;;  %v1757_v12 = vsel %vm1756_vm0, 0.0, %v2956_v58  ;;  %v5952_v58 = vld [vmem:[#allocation43_spill] sm:$0xff] }
 0x22e   : > { %v5947_v45 = vld [vmem:[#allocation20_spill] sm:$0xff] }
 0x22f   : > { %3554 = vrot.lane.b32.xlu1 %v3553_v9, %s3801_s14  ;;  %v5273_v33 = vpop.permute.xlu2 %3404  ;;  %v3694_v9 = vld [vmem:[%s3904_s9] sm:$0xff]  ;;  %v2986_v19 = vunpack.i.l.bf16 %v5947_v45  ;;  %v2987_v31 = vunpack.i.h.bf16 %v5947_v45 }
 0x230   : > { %1537 = vrot.lane.b32.xlu0 %v5941_v41, %s3800_s12  ;;  %s3803_s12 = smov 80   ;;  %v2977_v41 = vunpack.i.h.bf16 %v5944_v20 }
 0x231   : > { %v3345_v37 = vpop.permute.xlu1 %3344 }
 0x232   : > { %v3347_v55 = vunpack.i.h.bf16 %v3345_v37  ;;  %v3346_v4 = vunpack.i.l.bf16 %v3345_v37  ;;  %v3335_v14 = vpop.permute.xlu0 %3334  ;;  %v3351_v37 = vunpack.i.l.bf16 %v5174_v0 }
 0x233   : > { %v3337_v44 = vunpack.i.h.bf16 %v3335_v14  ;;  %v3336_v40 = vunpack.i.l.bf16 %v3335_v14 }
 0x234   : > { %v1772_v52 = vsel %vm1756_vm0, %v4823_v43, %v3347_v55  ;;  %v1771_v32 = vsel %vm1756_vm0, %v5942_v34, %v3346_v4  ;;  %v2961_v43 = vunpack.i.l.bf16 %v5946_v39  ;;  %v5949_v4 = vld [vmem:[#allocation31_spill] sm:$0xff]  ;;  %v1773_v39 = vsel %vm1756_vm0, %v4813_v53, %v3351_v37 }
 0x235   : > { %v1803_v47 = vsel %vm1788_vm1, %v1771_v32, %v3356_v10  ;;  %v1804_v42 = vsel %vm1788_vm1, %v1772_v52, %v3357_v2  ;;  %v5294_v56 = vsel %vm1820_vm3, %v5180_v57, %v3336_v40  ;;  %2256 = vrot.lane.b32.xlu2 %v3694_v9, %s3803_s12  ;;  %v5948_v57 = vld [vmem:[#allocation8_spill] sm:$0xff]  ;;  %v2966_v10 = vunpack.i.l.bf16 %v5949_v4  ;;  %v5950_v52 = vld [vmem:[#allocation35_spill] sm:$0xff]  ;;  %v5951_v32 = vld [vmem:[#allocation42_spill] sm:$0xff] }
 0x236   : > { %v5290_v5 = vsel %vm1820_vm3, %v1803_v47, %v3337_v44  ;;  %v1837_v22 = vsel %vm1820_vm3, %v1804_v42, %v2976_v23  ;;  %v1789_v55 = vsel %vm1788_vm1, %v1757_v12, %v2961_v43  ;;  %v3026_v34 = vunpack.i.l.bf16 %v5950_v52  ;;  %v5954_v9 = vld [vmem:[#allocation46_spill] sm:$0xff] }
 0x237   : > { %3559 = vrot.lane.b32.xlu1 %v5945_v25, %s3802_s16  ;;  %v5304_v50 = vpop.permute.xlu2 %3419  ;;  %v1870_v2 = vsel %vm1853_vm8, %v1837_v22, %v2986_v19  ;;  %v2992_v35 = vunpack.i.h.bf16 %v5951_v32  ;;  %v2991_v0 = vunpack.i.l.bf16 %v5951_v32  ;;  %v3032_v47 = vunpack.i.h.bf16 %v5952_v58  ;;  %v5953_v25 = vld [vmem:[#allocation6_spill] sm:$0xff]  ;;  %v3695_v22 = vld [vmem:[%s3904_s9 + $0x10] sm:$0xff]  ;;  %s2864_s16 = sshll.u32 %s5968_s22, 8 }
 0x238   : > { %1600 = vrot.lane.b32.xlu0 %v5948_v57, %s3801_s14  ;;  %v3091_v42 = vunpack.i.l.bf16 %v4559_v49  ;;  %v3031_v44 = vunpack.i.l.bf16 %v5952_v58  ;;  %v1774_v20 = vsel %vm1756_vm0, %v5953_v25, %v3352_v46  ;;  %v3051_v45 = vunpack.i.l.bf16 %v5954_v9  ;;  %v5955_v49 = vld [vmem:[#allocation49_spill] sm:$0xff]  ;;  %s5692_s24 = scalar_lea.vmem %s5816_s5, %s2864_s16 }
 0x239   : > { %v3370_v60 = vpop.permute.xlu1 %3369  ;;  %v1903_v12 = vsel %vm1886_vm9, %v1870_v2, %v2991_v0  ;;  %v3046_v19 = vunpack.i.l.bf16 %v5955_v49  ;;  %v3696_v2 = vld [vmem:[%s3904_s9 + $0x18] sm:$0xff]  ;;  %v3341_v49 = vunpack.i.l.bf16 %v5138_v48 }
 0x23a   : > { %v3360_v14 = vpop.permute.xlu0 %3359  ;;  %v3371_v43 = vunpack.i.l.bf16 %v3370_v60  ;;  %v1936_v32 = vsel %vm1919_vm11, %v1903_v12, %v3031_v44  ;;  %v2967_v12 = vunpack.i.h.bf16 %v5949_v4  ;;  %v3342_v4 = vunpack.i.h.bf16 %v5138_v48  ;;  %v3699_v48 = vld [vmem:[%s3904_s9 + $0x30] sm:$0xff] }
 0x23b   : > { %v3362_v40 = vunpack.i.h.bf16 %v3360_v14  ;;  %v3361_v23 = vunpack.i.l.bf16 %v3360_v14  ;;  %v3372_v14 = vunpack.i.h.bf16 %v3370_v60 }
 0x23d   : > { %v1806_v57 = vsel %vm1788_vm1, %v1774_v20, %v3362_v40  ;;  %v1805_v52 = vsel %vm1788_vm1, %v1773_v39, %v3361_v23  ;;  %2262 = vrot.lane.b32.xlu2 %v3696_v2, %s3803_s12  ;;  %v1969_v40 = vsel %vm1952_vm2, %v1936_v32, %v3371_v43  ;;  %v3377_v20 = vunpack.i.h.bf16 %v5216_v1  ;;  %v5956_v39 = vld [vmem:[#allocation17_spill] sm:$0xff] }
 0x23e   : > { %v1839_v46 = vsel %vm1820_vm3, %v1806_v57, %v3026_v34  ;;  %v1838_v53 = vsel %vm1820_vm3, %v1805_v52, %v2977_v41  ;;  %v3697_v34 = vld [vmem:[%s3904_s9 + $0x8] sm:$0xff]  ;;  %v2951_v43 = vunpack.i.l.bf16 %v5956_v39  ;;  %v2952_v9 = vunpack.i.h.bf16 %v5956_v39 }
 0x23f   : > { %2260 = vrot.lane.b32.xlu1 %v3695_v22, %s3803_s12  ;;  %v1871_v0 = vsel %vm1853_vm8, %v1838_v53, %v2987_v31  ;;  %v1872_v58 = vsel %vm1853_vm8, %v1839_v46, %v3046_v19  ;;  %v5339_v23 = vpop.permute.xlu2 %3434  ;;  %v3376_v31 = vunpack.i.l.bf16 %v5216_v1  ;;  %v3698_v57 = vld [vmem:[%s3904_s9 + $0x28] sm:$0xff] }
 0x240   : > { %2258 = vrot.lane.b32.xlu0 %v3697_v34, %s3803_s12  ;;  %v1904_v41 = vsel %vm1886_vm9, %v1871_v0, %v2992_v35  ;;  %v1905_v25 = vsel %vm1886_vm9, %v1872_v58, %v3051_v45  ;;  %v1822_v52 = vsel %vm1820_vm3, %v1789_v55, %v2952_v9  ;;  %v5959_v46 = vld [vmem:[#allocation30_spill] sm:$0xff] }
 0x241   : > { %v5331_v37 = vpop.permute.xlu1 %3384  ;;  %v1937_v44 = vsel %vm1919_vm11, %v1904_v41, %v3032_v47  ;;  %v5349_v60 = vsel %vm1919_vm11, %v1905_v25, %v3091_v42  ;;  %v2002_v45 = vsel %vm1985_vm4, %v1969_v40, %v3376_v31  ;;  %v1821_v42 = vsel %vm1820_vm3, %v1789_v55, %v2951_v43  ;;  %v5960_v39 = vld [vmem:[#allocation22_spill] sm:$0xff] }
 0x242   : > { %v5353_v22 = vpop.permute.xlu0 %3364  ;;  %v1970_v35 = vsel %vm1952_vm2, %v1937_v44, %v3372_v14  ;;  %v2972_v53 = vunpack.i.h.bf16 %v5959_v46  ;;  %v2971_v2 = vunpack.i.l.bf16 %v5959_v46  ;;  %v1854_v32 = vsel %vm1853_vm8, %v1821_v42, %v2966_v10 }
 0x243   : > { %v2003_v1 = vsel %vm1985_vm4, %v1970_v35, %v3377_v20  ;;  %v1855_v0 = vsel %vm1853_vm8, %v1822_v52, %v2967_v12  ;;  %v5381_v14 = vsel %vm1919_vm11, %v5201_v3, %v3341_v49  ;;  %v5385_v55 = vsel %vm1919_vm11, %v5204_v51, %v3342_v4  ;;  %v3700_v20 = vld [vmem:[%s3904_s9 + $0x20] sm:$0xff] }
 0x244   : > { %v2806_v19 = vpack.c.bf16 %v2003_v1, %v2002_v45  ;;  %v3407_v10 = vunpack.i.h.bf16 %v5273_v33  ;;  %v3406_v41 = vunpack.i.l.bf16 %v5273_v33  ;;  %v1887_v31 = vsel %vm1886_vm9, %v1854_v32, %v2971_v2  ;;  %v3702_v32 = vld [vmem:[%s3904_s9 + $0x48] sm:$0xff] }
 0x245   : > { %2268 = vrot.lane.b32.xlu2 %v3699_v48, %s3803_s12  ;;  %v1888_v3 = vsel %vm1886_vm9, %v1855_v0, %v2972_v53  ;;  %v3002_v43 = vunpack.i.h.bf16 %v5960_v39  ;;  %v3001_v33 = vunpack.i.l.bf16 %v5960_v39  ;;  %v3386_v42 = vunpack.i.l.bf16 %v5331_v37 }
 0x246   : > { %2807 = vmatmul.msk.bf16.vlgmr.msra.gmra.mxu3 %vm5361_vm15, %v2806_v19  ;;  %v3701_v19 = vld [vmem:[%s3904_s9 + $0x40] sm:$0xff]  ;;  %v3392_v0 = vunpack.i.h.bf16 %v5248_v26 }
 0x247   : > { %2266 = vrot.lane.b32.xlu1 %v3698_v57, %s3803_s12  ;;  %v5389_v25 = vpop.permute.xlu2 %3449  ;;  %v1920_v4 = vsel %vm1919_vm11, %v1887_v31, %v3001_v33  ;;  %v1921_v49 = vsel %vm1919_vm11, %v1888_v3, %v3002_v43  ;;  %v3704_v31 = vld [vmem:[%s3904_s9 + $0x58] sm:$0xff]  ;;  %v3367_v33 = vunpack.i.h.bf16 %v5353_v22 }
 0x248   : > { %2264 = vrot.lane.b32.xlu0 %v3700_v20, %s3803_s12  ;;  %v1972_v20 = vsel %vm1952_vm2, %v4866_v54, %v3392_v0  ;;  %v3366_v54 = vunpack.i.l.bf16 %v5353_v22 }
 0x249   : > { %v3400_v58 = vpop.permute.xlu1 %3399 }
 0x24a   : > { %v3402_v40 = vunpack.i.h.bf16 %v3400_v58  ;;  %v3401_v34 = vunpack.i.l.bf16 %v3400_v58  ;;  %v3380_v12 = vpop.permute.xlu0 %3379  ;;  %v3703_v58 = vld [vmem:[%s3904_s9 + $0x38] sm:$0xff] }
 0x24b   : > { %v3382_v45 = vunpack.i.h.bf16 %v3380_v12  ;;  %v3381_v1 = vunpack.i.l.bf16 %v3380_v12  ;;  %v3706_v12 = vld [vmem:[%s3904_s9 + $0x50] sm:$0xff] }
 0x24c   : > { %v1955_v51 = vsel %vm1952_vm2, %v4752_v17, %v3401_v34  ;;  %v1956_v44 = vsel %vm1952_vm2, %v4756_v13, %v3402_v40  ;;  %v3387_v13 = vunpack.i.h.bf16 %v5331_v37  ;;  %v3391_v40 = vunpack.i.l.bf16 %v5248_v26  ;;  %v3705_v26 = vld [vmem:[%s3904_s9 + $0x60] sm:$0xff] }
 0x24d   : > { %v5402_v35 = vsel %vm1985_vm4, %v1955_v51, %v3406_v41  ;;  %v5405_v9 = vsel %vm1985_vm4, %v1956_v44, %v3407_v10  ;;  %v1953_v57 = vsel %vm1952_vm2, %v1920_v4, %v3381_v1  ;;  %v1954_v52 = vsel %vm1952_vm2, %v1921_v49, %v3382_v45  ;;  %2274 = vrot.lane.b32.xlu2 %v3702_v32, %s3803_s12 }
 0x24e   : > { %v2785_v17 = vpack.c.bf16 %v5405_v9, %v5402_v35  ;;  %v1986_v46 = vsel %vm1985_vm4, %v1953_v57, %v3386_v42  ;;  %v1987_v53 = vsel %vm1985_vm4, %v1954_v52, %v3387_v13  ;;  %v1971_v3 = vsel %vm1952_vm2, %v5349_v60, %v3391_v40 }
 0x24f   : > { %2272 = vrot.lane.b32.xlu1 %v3701_v19, %s3803_s12  ;;  %v2782_v37 = vpack.c.bf16 %v1987_v53, %v1986_v46  ;;  %v5424_v48 = vpop.permute.xlu2 %3464  ;;  %v1940_v42 = vsel %vm1919_vm11, %v4994_v7, %v3366_v54  ;;  %v1941_v4 = vsel %vm1919_vm11, %v4998_v15, %v3367_v33  ;;  %v3707_v19 = vld [vmem:[%s3904_s9 + $0x70] sm:$0xff]  ;;  %v3452_v40 = vunpack.i.h.bf16 %v5389_v25 }
 0x250   : > { %2270 = vrot.lane.b32.xlu0 %v3703_v58, %s3803_s12  ;;  %v3421_v58 = vunpack.i.l.bf16 %v5304_v50 }
 0x251   : > { %v3415_v2 = vpop.permute.xlu1 %3414  ;;  %2783 = vmatmul.msk.bf16.vlgmr.msra.gmra.mxu1 %vm5361_vm15, %v2782_v37  ;;  %v3708_v37 = vld [vmem:[%s3904_s9 + $0x78] sm:$0xff] }
 0x252   : > { %v3395_v34 = vpop.permute.xlu0 %3394  ;;  %v3417_v49 = vunpack.i.h.bf16 %v3415_v2  ;;  %v3416_v22 = vunpack.i.l.bf16 %v3415_v2  ;;  %v3422_v2 = vunpack.i.h.bf16 %v5304_v50  ;;  %v1957_v9 = vsel %vm1952_vm2, %v4849_v21, %v3421_v58 }
 0x253   : > { %v3397_v10 = vunpack.i.h.bf16 %v3395_v34  ;;  %v3396_v41 = vunpack.i.l.bf16 %v3395_v34  ;;  %v3451_v34 = vunpack.i.l.bf16 %v5389_v25 }
 0x255   : > { %v2004_v51 = vsel %vm1985_vm4, %v1971_v3, %v3396_v41  ;;  %v2005_v44 = vsel %vm1985_vm4, %v1972_v20, %v3397_v10  ;;  %2280 = vrot.lane.b32.xlu2 %v3705_v26, %s3803_s12  ;;  %v3709_v10 = vld [vmem:[%s3904_s9 + $0x68] sm:$0xff] }
 0x256   : > { %v2809_v39 = vpack.c.bf16 %v2005_v44, %v2004_v51  ;;  %v3710_v51 = vld [vmem:[%s3904_s9 + $0x88] sm:$0xff] }
 0x257   : > { %2278 = vrot.lane.b32.xlu1 %v3704_v31, %s3803_s12  ;;  %v5445_v45 = vpop.permute.xlu2 %3479 }
 0x258   : > { %2276 = vrot.lane.b32.xlu0 %v3706_v12, %s3803_s12  ;;  %2810 = vmatmul.msk.bf16.gmra.mxu3 %vm5361_vm15, %v2809_v39 }
 0x259   : > { %v3430_v43 = vpop.permute.xlu1 %3429 }
 0x25a   : > { %v3410_v60 = vpop.permute.xlu0 %3409  ;;  %v3432_v44 = vunpack.i.h.bf16 %v3430_v43  ;;  %v3431_v39 = vunpack.i.l.bf16 %v3430_v43 }
 0x25b   : > { %v3412_v1 = vunpack.i.h.bf16 %v3410_v60  ;;  %v3411_v13 = vunpack.i.l.bf16 %v3410_v60  ;;  %v3711_v60 = vld [vmem:[%s3904_s9 + $0x90] sm:$0xff] }
 0x25c   : > { %v1942_v43 = vsel %vm1919_vm11, %v5104_v63, %v3431_v39 }
 0x25d   : > { %v1973_v57 = vsel %vm1952_vm2, %v1940_v42, %v3411_v13  ;;  %v1974_v52 = vsel %vm1952_vm2, %v1941_v4, %v3412_v1  ;;  %2286 = vrot.lane.b32.xlu2 %v3708_v37, %s3803_s12  ;;  %v3712_v1 = vld [vmem:[%s3904_s9 + $0x80] sm:$0xff]  ;;  %v1943_v13 = vsel %vm1919_vm11, %v5113_v61, %v3432_v44  ;;  %v3437_v42 = vunpack.i.h.bf16 %v5339_v23  ;;  %v3714_v37 = vld [vmem:[%s3904_s9 + $0xa8] sm:$0xff] }
 0x25e   : > { %v2006_v53 = vsel %vm1985_vm4, %v1973_v57, %v3416_v22  ;;  %v2007_v32 = vsel %vm1985_vm4, %v1974_v52, %v3417_v49  ;;  %v3436_v4 = vunpack.i.l.bf16 %v5339_v23 }
 0x25f   : > { %2284 = vrot.lane.b32.xlu1 %v3707_v19, %s3803_s12  ;;  %v2812_v0 = vpack.c.bf16 %v2007_v32, %v2006_v53  ;;  %v5488_v26 = vpop.permute.xlu2 %3494  ;;  %v1976_v52 = vsel %vm1952_vm2, %v1943_v13, %v3437_v42 }
 0x260   : > { %2282 = vrot.lane.b32.xlu0 %v3709_v10, %s3803_s12  ;;  %v1975_v57 = vsel %vm1952_vm2, %v1942_v43, %v3436_v4  ;;  %v3467_v10 = vunpack.i.h.bf16 %v5424_v48  ;;  %v3720_v4 = vld [vmem:[%s3904_s9 + $0xd8] sm:$0xff] }
 0x261   : > { %v3445_v46 = vpop.permute.xlu1 %3444  ;;  %2786 = vmatmul.msk.bf16.gmra.mxu1 %vm5361_vm15, %v2785_v17  ;;  %v5961_v17 = vld [vmem:[#allocation50_spill] sm:$0xff] }
 0x262   : > { %v3447_v7 = vunpack.i.h.bf16 %v3445_v46  ;;  %v3446_v15 = vunpack.i.l.bf16 %v3445_v46  ;;  %v3425_v50 = vpop.permute.xlu0 %3424  ;;  %v3713_v46 = vld [vmem:[%s3904_s9 + $0xa0] sm:$0xff] }
 0x263   : > { %v3427_v3 = vunpack.i.h.bf16 %v3425_v50  ;;  %v3426_v35 = vunpack.i.l.bf16 %v3425_v50 }
 0x264   : > { %v1959_v41 = vsel %vm1952_vm2, %v5077_v18, %v3446_v15  ;;  %v1960_v20 = vsel %vm1952_vm2, %v5082_v8, %v3447_v7  ;;  %v1958_v18 = vsel %vm1952_vm2, %v5961_v17, %v3422_v2  ;;  %v3715_v7 = vld [vmem:[%s3904_s9 + $0x98] sm:$0xff]  ;;  %v3717_v17 = vld [vmem:[%s3904_s9 + $0xc0] sm:$0xff] }
 0x265   : > { %v5475_v31 = vsel %vm1985_vm4, %v1959_v41, %v3451_v34  ;;  %v5478_v25 = vsel %vm1985_vm4, %v1960_v20, %v3452_v40  ;;  %v1990_v33 = vsel %vm1985_vm4, %v1957_v9, %v3426_v35  ;;  %v1991_v54 = vsel %vm1985_vm4, %v1958_v18, %v3427_v3  ;;  %2292 = vrot.lane.b32.xlu2 %v3711_v60, %s3803_s12  ;;  %v3716_v34 = vld [vmem:[%s3904_s9 + $0xb8] sm:$0xff] }
 0x266   : > { %v2791_v8 = vpack.c.bf16 %v5478_v25, %v5475_v31  ;;  %v2788_v21 = vpack.c.bf16 %v1991_v54, %v1990_v33  ;;  %v3466_v41 = vunpack.i.l.bf16 %v5424_v48  ;;  %v3718_v48 = vld [vmem:[%s3904_s9 + $0xb0] sm:$0xff] }
 0x267   : > { %2290 = vrot.lane.b32.xlu1 %v3710_v51, %s3803_s12  ;;  %v5512_v23 = vpop.permute.xlu2 %3509 }
 0x268   : > { %2288 = vrot.lane.b32.xlu0 %v3712_v1, %s3803_s12  ;;  %2813 = vmatmul.msk.bf16.gmra.mxu3 %vm5361_vm15, %v2812_v0 }
 0x269   : > { %v3460_v12 = vpop.permute.xlu1 %3459 }
 0x26a   : > { %v3440_v49 = vpop.permute.xlu0 %3439  ;;  %v3462_v58 = vunpack.i.h.bf16 %v3460_v12  ;;  %v3461_v40 = vunpack.i.l.bf16 %v3460_v12 }
 0x26b   : > { %v3442_v22 = vunpack.i.h.bf16 %v3440_v49  ;;  %v3441_v19 = vunpack.i.l.bf16 %v3440_v49 }
 0x26d   : > { %v2008_v63 = vsel %vm1985_vm4, %v1975_v57, %v3441_v19  ;;  %v2009_v61 = vsel %vm1985_vm4, %v1976_v52, %v3442_v22  ;;  %2298 = vrot.lane.b32.xlu2 %v3714_v37, %s3803_s12  ;;  %v3482_v22 = vunpack.i.h.bf16 %v5445_v45  ;;  %v3481_v19 = vunpack.i.l.bf16 %v5445_v45  ;;  %v3721_v57 = vld [vmem:[%s3904_s9 + $0xc8] sm:$0xff] }
 0x26e   : > { %v2815_v32 = vpack.c.bf16 %v2009_v61, %v2008_v63 }
 0x26f   : > { %2296 = vrot.lane.b32.xlu1 %v3713_v46, %s3803_s12  ;;  %v1946_v63 = vsel %vm1919_vm11, %v5266_v62, %v3481_v19  ;;  %v1947_v45 = vsel %vm1919_vm11, %v5270_v16, %v3482_v22  ;;  %v3497_v16 = vunpack.i.h.bf16 %v5488_v26 }
 0x270   : > { %2294 = vrot.lane.b32.xlu0 %v3715_v7, %s3803_s12 }
 0x271   : > { %v3475_v53 = vpop.permute.xlu1 %3474  ;;  %2789 = vmatmul.msk.bf16.gmra.mxu1 %vm5361_vm15, %v2788_v21  ;;  %v3719_v21 = vld [vmem:[%s3904_s9 + $0xd0] sm:$0xff] }
 0x272   : > { %v3455_v15 = vpop.permute.xlu0 %3454  ;;  %v3477_v54 = vunpack.i.h.bf16 %v3475_v53  ;;  %v3476_v12 = vunpack.i.l.bf16 %v3475_v53 }
 0x273   : > { %v3457_v0 = vunpack.i.h.bf16 %v3455_v15  ;;  %v3456_v2 = vunpack.i.l.bf16 %v3455_v15  ;;  %v3723_v15 = vld [vmem:[%s3904_s9 + $0xf0] sm:$0xff] }
 0x275   : > { %v1944_v20 = vsel %vm1919_vm11, %v5024_v11, %v3456_v2  ;;  %v1945_v50 = vsel %vm1919_vm11, %v5027_v36, %v3457_v0  ;;  %2304 = vrot.lane.b32.xlu2 %v3717_v17, %s3803_s12  ;;  %v5536_v36 = vpop.permute.xlu2 %3514  ;;  %v3496_v0 = vunpack.i.l.bf16 %v5488_v26  ;;  %v3724_v2 = vld [vmem:[%s3904_s9 + $0xe0] sm:$0xff] }
 0x276   : > { %v1977_v35 = vsel %vm1952_vm2, %v1944_v20, %v3461_v40  ;;  %v1978_v9 = vsel %vm1952_vm2, %v1945_v50, %v3462_v58 }
 0x277   : > { %2302 = vrot.lane.b32.xlu1 %v3716_v34, %s3803_s12  ;;  %v2010_v18 = vsel %vm1985_vm4, %v1977_v35, %v3466_v41  ;;  %v2011_v51 = vsel %vm1985_vm4, %v1978_v9, %v3467_v10  ;;  %v1963_v10 = vsel %vm1952_vm2, %v5143_v28, %v3496_v0  ;;  %v1964_v41 = vsel %vm1952_vm2, %v5146_v29, %v3497_v16  ;;  %v3725_v9 = vld [vmem:[%s3904_s9 + $0xf8] sm:$0xff] }
 0x278   : > { %2816 = vmatmul.msk.bf16.gmra.mxu3 %vm5361_vm15, %v2815_v32  ;;  %v2818_v11 = vpack.c.bf16 %v2011_v51, %v2010_v18  ;;  %2300 = vrot.lane.b32.xlu0 %v3718_v48, %s3803_s12  ;;  %v3722_v32 = vld [vmem:[%s3904_s9 + $0xe8] sm:$0xff]  ;;  %v3517_v29 = vunpack.i.h.bf16 %v5536_v36  ;;  %v3511_v16 = vunpack.i.l.bf16 %v5512_v23 }
 0x279   : > { %v3490_v3 = vpop.permute.xlu1 %3489 }
 0x27a   : > { %v3470_v44 = vpop.permute.xlu0 %3469  ;;  %v3492_v61 = vunpack.i.h.bf16 %v3490_v3  ;;  %v3491_v53 = vunpack.i.l.bf16 %v3490_v3 }
 0x27b   : > { %v3472_v39 = vunpack.i.h.bf16 %v3470_v44  ;;  %v3471_v33 = vunpack.i.l.bf16 %v3470_v44 }
 0x27d   : > { %v1961_v60 = vsel %vm1952_vm2, %v5032_v24, %v3471_v33  ;;  %v1962_v1 = vsel %vm1952_vm2, %v5035_v38, %v3472_v39  ;;  %2310 = vrot.lane.b32.xlu2 %v3720_v4, %s3803_s12  ;;  %v5559_v38 = vpop.permute.xlu2 %3534  ;;  %v3516_v39 = vunpack.i.l.bf16 %v5536_v36 }
 0x27e   : > { %v1994_v13 = vsel %vm1985_vm4, %v1961_v60, %v3476_v12  ;;  %v1995_v42 = vsel %vm1985_vm4, %v1962_v1, %v3477_v54  ;;  %v3537_v33 = vunpack.i.h.bf16 %v5559_v38  ;;  %v3536_v36 = vunpack.i.l.bf16 %v5559_v38 }
 0x27f   : > { %2308 = vrot.lane.b32.xlu1 %v3719_v21, %s3803_s12  ;;  %v2794_v49 = vpack.c.bf16 %v1995_v42, %v1994_v13 }
 0x280   : > { %2306 = vrot.lane.b32.xlu0 %v3721_v57, %s3803_s12 }
 0x281   : > { %v5544_v43 = vpop.permute.xlu1 %3504  ;;  %2792 = vmatmul.msk.bf16.gmra.mxu1 %vm5361_vm15, %v2791_v8 }
 0x282   : > { %v3485_v24 = vpop.permute.xlu0 %3484 }
 0x283   : > { %v3487_v52 = vunpack.i.h.bf16 %v3485_v24  ;;  %v3486_v46 = vunpack.i.l.bf16 %v3485_v24 }
 0x285   : > { %v1979_v31 = vsel %vm1952_vm2, %v1946_v63, %v3486_v46  ;;  %v1980_v25 = vsel %vm1952_vm2, %v1947_v45, %v3487_v52  ;;  %2316 = vrot.lane.b32.xlu2 %v3723_v15, %s3803_s12  ;;  %v3550_v20 = vpop.permute.xlu2 %3549  ;;  %v3506_v63 = vunpack.i.l.bf16 %v5544_v43 }
 0x286   : > { %v2012_v37 = vsel %vm1985_vm4, %v1979_v31, %v3491_v53  ;;  %v2013_v7 = vsel %vm1985_vm4, %v1980_v25, %v3492_v61  ;;  %v3552_v54 = vunpack.i.h.bf16 %v3550_v20  ;;  %v3551_v12 = vunpack.i.l.bf16 %v3550_v20 }
 0x287   : > { %2314 = vrot.lane.b32.xlu1 %v3722_v32, %s3803_s12  ;;  %v2821_v62 = vpack.c.bf16 %v2013_v7, %v2012_v37 }
 0x288   : > { %2819 = vmatmul.msk.bf16.gmra.mxu3 %vm5361_vm15, %v2818_v11  ;;  %2312 = vrot.lane.b32.xlu0 %v3724_v2, %s3803_s12 }
 0x289   : > { %v3520_v8 = vpop.permute.xlu1 %3519 }
 0x28a   : > { %v3500_v58 = vpop.permute.xlu0 %3499  ;;  %v3522_v18 = vunpack.i.h.bf16 %v3520_v8  ;;  %v3521_v51 = vunpack.i.l.bf16 %v3520_v8 }
 0x28b   : > { %v3502_v40 = vunpack.i.h.bf16 %v3500_v58  ;;  %v3501_v34 = vunpack.i.l.bf16 %v3500_v58 }
 0x28c   : > { %v1948_v21 = vsel %vm1919_vm11, %v5257_v6, %v3521_v51  ;;  %v1949_v60 = vsel %vm1919_vm11, %v5260_v30, %v3522_v18 }
 0x28d   : > { %v1996_v50 = vsel %vm1985_vm4, %v1963_v10, %v3501_v34  ;;  %v1997_v26 = vsel %vm1985_vm4, %v1964_v41, %v3502_v40  ;;  %v1724_v28 = vpop.permute.xlu2 %1723  ;;  %v1981_v30 = vsel %vm1952_vm2, %v1948_v21, %v3536_v36  ;;  %v1982_v52 = vsel %vm1952_vm2, %v1949_v60, %v3537_v33 }
 0x28e   : > { %v2797_v35 = vpack.c.bf16 %v1997_v26, %v1996_v50  ;;  %v5962_v50 = vld [vmem:[#allocation38_spill] sm:$0xff] }
 0x28f   : > { %v2981_v26 = vunpack.i.l.bf16 %v5962_v50 }
 0x290   : > { %2318 = vrot.lane.b32.xlu0 %v3725_v9, %s3803_s12 }
 0x291   : > { %v3530_v3 = vpop.permute.xlu1 %3529  ;;  %2795 = vmatmul.msk.bf16.gmra.mxu1 %vm5361_vm15, %v2794_v49 }
 0x292   : > { %v3525_v17 = vpop.permute.xlu0 %3524  ;;  %v3532_v45 = vunpack.i.h.bf16 %v3530_v3  ;;  %v3531_v61 = vunpack.i.l.bf16 %v3530_v3 }
 0x293   : > { %v3527_v42 = vunpack.i.h.bf16 %v3525_v17  ;;  %v3526_v19 = vunpack.i.l.bf16 %v3525_v17 }
 0x295   : > { %v2257_v8 = vpop.permute.xlu2 %2256 }
 0x298   : > { %2822 = vmatmul.msk.bf16.gmra.mxu3 %vm5361_vm15, %v2821_v62 }
 0x299   : > { %v3545_v11 = vpop.permute.xlu1 %3544 }
 0x29a   : > { %v3547_v48 = vunpack.i.h.bf16 %v3545_v11  ;;  %v3546_v44 = vunpack.i.l.bf16 %v3545_v11  ;;  %v3540_v4 = vpop.permute.xlu0 %3539 }
 0x29b   : > { %v3542_v57 = vunpack.i.h.bf16 %v3540_v4  ;;  %v3541_v6 = vunpack.i.l.bf16 %v3540_v4 }
 0x29c   : > { %v1965_v1 = vsel %vm1952_vm2, %v5381_v14, %v3546_v44  ;;  %v1966_v13 = vsel %vm1952_vm2, %v5385_v55, %v3547_v48  ;;  %v1851_v14 = vsel %vm1820_vm3, %v5233_v59, %v3516_v39  ;;  %v1852_v55 = vsel %vm1820_vm3, %v5245_v27, %v3517_v29 }
 0x29d   : > { %v1998_v49 = vsel %vm1985_vm4, %v1965_v1, %v3551_v12  ;;  %v1999_v22 = vsel %vm1985_vm4, %v1966_v13, %v3552_v54  ;;  %v2014_v38 = vsel %vm1985_vm4, %v1981_v30, %v3541_v6  ;;  %v2015_v46 = vsel %vm1985_vm4, %v1982_v52, %v3542_v57  ;;  %v5641_v11 = vpop.permute.xlu2 %2262  ;;  %v5674_v57 = vld [vmem:[%s5815_s4] ss:$0 sm:$0xff] }
 0x29e   : > { %v2800_v24 = vpack.c.bf16 %v1999_v22, %v1998_v49  ;;  %v2824_v32 = vpack.c.bf16 %v2015_v46, %v2014_v38  ;;  %v1884_v31 = vsel %vm1853_vm8, %v1851_v14, %v3526_v19  ;;  %v1885_v25 = vsel %vm1853_vm8, %v1852_v55, %v3527_v42 }
 0x29f   : > { %v3507_v59 = vunpack.i.h.bf16 %v5544_v43  ;;  %v1868_v27 = vsel %vm1853_vm8, %v5294_v56, %v3506_v63  ;;  %v1917_v15 = vsel %vm1886_vm9, %v1884_v31, %v3531_v61  ;;  %v1918_v62 = vsel %vm1886_vm9, %v1885_v25, %v3532_v45 }
 0x2a0   : > { %v3512_v43 = vunpack.i.h.bf16 %v5512_v23  ;;  %v1901_v34 = vsel %vm1886_vm9, %v1868_v27, %v3511_v16 }
 0x2a1   : > { %v3555_v53 = vpop.permute.xlu1 %3554  ;;  %2798 = vmatmul.msk.bf16.gmra.mxu1 %vm5361_vm15, %v2797_v35  ;;  %v1869_v58 = vsel %vm1853_vm8, %v5290_v5, %v3507_v59  ;;  %v2982_v5 = vunpack.i.h.bf16 %v5962_v50  ;;  %v1934_v17 = vsel %vm1919_vm11, %v1901_v34, %v2981_v26 }
 0x2a2   : > { %v3556_v37 = vunpack.i.l.bf16 %v3555_v53  ;;  %v1538_v7 = vpop.permute.xlu0 %1537  ;;  %v3557_v10 = vunpack.i.h.bf16 %v3555_v53  ;;  %v1902_v23 = vsel %vm1886_vm9, %v1869_v58, %v3512_v43 }
 0x2a3   : > { %v1950_v0 = vsel %vm1919_vm11, %v1917_v15, %v1538_v7  ;;  %v1951_v2 = vsel %vm1919_vm11, %v1918_v62, %v1538_v7  ;;  %v1935_v29 = vsel %vm1919_vm11, %v1902_v23, %v2982_v5 }
 0x2a4   : > { %v1983_v40 = vsel %vm1952_vm2, %v1950_v0, %v3556_v37  ;;  %v1984_v56 = vsel %vm1952_vm2, %v1951_v2, %v3556_v37  ;;  %v1967_v51 = vsel %vm1952_vm2, %v1934_v17, %v3557_v10 }
 0x2a5   : > { %v2016_v41 = vsel %vm1985_vm4, %v1983_v40, %v1724_v28  ;;  %v2017_v20 = vsel %vm1985_vm4, %v1984_v56, %v1724_v28  ;;  %v5649_v21 = vpop.permute.xlu2 %2268 }
 0x2a6   : > { %v2827_v3 = vpack.c.bf16 %v2017_v20, %v2016_v41 }
 0x2a8   : > { %2825 = vmatmul.msk.bf16.gmra.mxu3 %vm5361_vm15, %v2824_v32 }
 0x2a9   : > { %v3560_v35 = vpop.permute.xlu1 %3559 }
 0x2aa   : > { %v3561_v9 = vunpack.i.l.bf16 %v3560_v35  ;;  %v3562_v18 = vunpack.i.h.bf16 %v3560_v35  ;;  %v1601_v28 = vpop.permute.xlu0 %1600 }
 0x2ab   : > { %v1968_v44 = vsel %vm1952_vm2, %v1935_v29, %v1601_v28 }
 0x2ac   : > { %v2000_v48 = vsel %vm1985_vm4, %v1967_v51, %v3561_v9  ;;  %v2001_v39 = vsel %vm1985_vm4, %v1968_v44, %v3562_v18 }
 0x2ad   : > { %v2803_v33 = vpack.c.bf16 %v2001_v39, %v2000_v48  ;;  %v5657_v13 = vpop.permute.xlu2 %2274 }
 0x2b1   : > { %v2261_v54 = vpop.permute.xlu1 %2260  ;;  %2801 = vmatmul.msk.bf16.gmra.mxu1 %vm5361_vm15, %v2800_v24 }
 0x2b2   : > { %v2259_v12 = vpop.permute.xlu0 %2258 }
 0x2b5   : > { %v5667_v49 = vpop.permute.xlu2 %2280 }
 0x2b8   : > { %2828 = vmatmul.msk.bf16.gmra.mxu3 %vm5361_vm15, %v2827_v3 }
 0x2b9   : > { %v5651_v60 = vpop.permute.xlu1 %2266 }
 0x2ba   : > { %v5655_v1 = vpop.permute.xlu0 %2264 }
 0x2bd   : > { %v5679_v52 = vpop.permute.xlu2 %2286 }
 0x2c1   : > { %v5659_v36 = vpop.permute.xlu1 %2272  ;;  %2804 = vmatmul.msk.bf16.gmra.mxu1 %vm5361_vm15, %v2803_v33 }
 0x2c2   : > { %v5663_v42 = vpop.permute.xlu0 %2270 }
 0x2c5   : > { %v2293_v62 = vpop.permute.xlu2 %2292 }
 0x2c9   : > { %v5665_v4 = vpop.permute.xlu1 %2278  ;;  %v2184_v22 = vpop.f32.mrf.mxu3 }
 0x2ca   : > { %v5669_v19 = vpop.permute.xlu0 %2276  ;;  %v2185_v31 = vadd.f32 %v5674_v57, %v2184_v22 }
 0x2ce   : > { %v2144_v6 = vpop.f32.mrf.mxu1 }
 0x2cf   : > { %v2145_v47 = vadd.f32 %v5674_v57, %v2144_v6 }
 0x2d1   : > { %v5676_v24 = vpop.permute.xlu1 %2284  ;;  %v2352_v30 = vadd.f32 %v2257_v8, %v2145_v47  ;;  %v2186_v14 = vpop.f32.mrf.mxu3 }
 0x2d2   : > { %v5681_v55 = vpop.permute.xlu0 %2282  ;;  %v2187_v63 = vadd.f32 %v5674_v57, %v2186_v14 }
 0x2d3   : > { %v2416_v38 = vmin.f32 %v2352_v30, 0.0  ;;  %vm2384_vm1 = vcmp.gt.f32.partialorder %v2352_v30, 0.0 }
 0x2d5   : > { %v2448_v46 = vmul.f32 1.442695, %v2416_v38 }
 0x2d6   : > { %v2146_v45 = vpop.f32.mrf.mxu1 }
 0x2d7   : > { %3629 = vpow2.f32 %v2448_v46  ;;  %v2147_v53 = vadd.f32 %v5674_v57, %v2146_v45 }
 0x2d9   : > { %v2291_v61 = vpop.permute.xlu1 %2290  ;;  %v2353_v25 = vadd.f32 %v2259_v12, %v2147_v53 }
 0x2da   : > { %v2369_v32 = vadd.f32 %v2291_v61, %v2187_v63  ;;  %v2289_v59 = vpop.permute.xlu0 %2288 }
 0x2db   : > { %v2417_v37 = vmin.f32 %v2353_v25, 0.0  ;;  %v2368_v7 = vadd.f32 %v2289_v59, %v2185_v31  ;;  %v2189_v15 = vpop.f32.mrf.mxu3  ;;  %vm2385_vm6 = vcmp.gt.f32.partialorder %v2353_v25, 0.0 }
 0x2dc   : > { %v2433_v8 = vmin.f32 %v2369_v32, 0.0  ;;  %v2190_v16 = vadd.f32 %v5674_v57, %v2189_v15  ;;  %vm2401_vm3 = vcmp.gt.f32.partialorder %v2369_v32, 0.0 }
 0x2dd   : > { %v3630_v0 = vpop.eup %3629  ;;  %v2450_v2 = vmul.f32 1.442695, %v2417_v37  ;;  %v2432_v43 = vmin.f32 %v2368_v7, 0.0  ;;  %vm2400_vm7 = vcmp.gt.f32.partialorder %v2368_v7, 0.0 }
 0x2de   : > { %v2482_v27 = vmul.f32 1.442695, %v2433_v8  ;;  %v2829_v58 = vadd.f32 -1.0, %v3630_v0  ;;  %v2370_v40 = vadd.f32 %v2293_v62, %v2190_v16  ;;  %v2149_v56 = vpop.f32.mrf.mxu1 }
 0x2df   : > { %v2480_v34 = vmul.f32 1.442695, %v2432_v43  ;;  %v2150_v10 = vadd.f32 %v5674_v57, %v2149_v56  ;;  %v2299_v43 = vpop.permute.xlu2 %2298 }
 0x2e0   : > { %3631 = vpow2.f32 %v2482_v27  ;;  %v2544_v41 = vsel %vm2384_vm1, %v2352_v30, %v2829_v58  ;;  %v2434_v20 = vmin.f32 %v2370_v40, 0.0  ;;  %vm2402_vm8 = vcmp.gt.f32.partialorder %v2370_v40, 0.0 }
 0x2e1   : > { %3633 = vpow2.f32 %v2450_v2  ;;  %2576 = vst.msk [vmem:[%s5692_s24] sm:$0xff] %vm1756_vm0, %v2544_v41  ;;  %v2354_v50 = vadd.f32 %v2261_v54, %v2150_v10  ;;  %v2297_v45 = vpop.permute.xlu1 %2296 }
 0x2e2   : > { %3635 = vpow2.f32 %v2480_v34  ;;  %v2484_v26 = vmul.f32 1.442695, %v2434_v20  ;;  %v2295_v23 = vpop.permute.xlu0 %2294 }
 0x2e3   : > { %v2418_v35 = vmin.f32 %v2354_v50, 0.0  ;;  %v2191_v9 = vpop.f32.mrf.mxu3  ;;  %vm2386_vm9 = vcmp.gt.f32.partialorder %v2354_v50, 0.0 }
 0x2e4   : > { %3637 = vpow2.f32 %v2484_v26  ;;  %v2192_v17 = vadd.f32 %v5674_v57, %v2191_v9 }
 0x2e5   : > { %v2452_v51 = vmul.f32 1.442695, %v2418_v35 }
 0x2e6   : > { %v3632_v3 = vpop.eup %3631  ;;  %v2371_v48 = vadd.f32 %v2295_v23, %v2192_v17  ;;  %v2151_v44 = vpop.f32.mrf.mxu1 }
 0x2e7   : > { %v2846_v5 = vadd.f32 -1.0, %v3632_v3  ;;  %v3634_v18 = vpop.eup %3633  ;;  %3639 = vpow2.f32 %v2452_v51  ;;  %v2152_v33 = vadd.f32 %v5674_v57, %v2151_v44 }
 0x2e8   : > { %v2830_v28 = vadd.f32 -1.0, %v3634_v18  ;;  %v3636_v39 = vpop.eup %3635  ;;  %v2435_v22 = vmin.f32 %v2371_v48, 0.0  ;;  %vm2403_vm10 = vcmp.gt.f32.partialorder %v2371_v48, 0.0 }
 0x2e9   : > { %v2561_v29 = vsel %vm2401_vm3, %v2369_v32, %v2846_v5  ;;  %v2845_v12 = vadd.f32 -1.0, %v3636_v39  ;;  %v2355_v6 = vadd.f32 %v5641_v11, %v2152_v33 }
 0x2ea   : > { %2593 = vst.msk [vmem:[%s5692_s24 + $0x88] sm:$0xff] %vm1756_vm0, %v2561_v29  ;;  %v2545_v54 = vsel %vm2385_vm6, %v2353_v25, %v2830_v28  ;;  %v3638_v47 = vpop.eup %3637  ;;  %v2486_v14 = vmul.f32 1.442695, %v2435_v22  ;;  %v2301_v18 = vpop.permute.xlu0 %2300 }
 0x2eb   : > { %2577 = vst.msk [vmem:[%s5692_s24 + $0x8] sm:$0xff] %vm1756_vm0, %v2545_v54  ;;  %v2560_v30 = vsel %vm2400_vm7, %v2368_v7, %v2845_v12  ;;  %v2847_v38 = vadd.f32 -1.0, %v3638_v47  ;;  %v2419_v46 = vmin.f32 %v2355_v6, 0.0  ;;  %v2194_v63 = vpop.f32.mrf.mxu3  ;;  %vm2387_vm11 = vcmp.gt.f32.partialorder %v2355_v6, 0.0 }
 0x2ec   : > { %2592 = vst.msk [vmem:[%s5692_s24 + $0x80] sm:$0xff] %vm1756_vm0, %v2560_v30  ;;  %3641 = vpow2.f32 %v2486_v14  ;;  %v2195_v61 = vadd.f32 %v5674_v57, %v2194_v63 }
 0x2ed   : > { %v3640_v53 = vpop.eup %3639  ;;  %v2562_v32 = vsel %vm2402_vm8, %v2370_v40, %v2847_v38  ;;  %v2454_v31 = vmul.f32 1.442695, %v2419_v46  ;;  %v2303_v46 = vpop.permute.xlu1 %2302 }
 0x2ee   : > { %2594 = vst.msk [vmem:[%s5692_s24 + $0x90] sm:$0xff] %vm1756_vm0, %v2562_v32  ;;  %v2831_v11 = vadd.f32 -1.0, %v3640_v53  ;;  %v2372_v25 = vadd.f32 %v2297_v45, %v2195_v61  ;;  %v2154_v8 = vpop.f32.mrf.mxu1 }
 0x2ef   : > { %3643 = vpow2.f32 %v2454_v31  ;;  %v2155_v59 = vadd.f32 %v5674_v57, %v2154_v8 }
 0x2f0   : > { %v2546_v37 = vsel %vm2386_vm9, %v2354_v50, %v2831_v11  ;;  %v2436_v27 = vmin.f32 %v2372_v25, 0.0  ;;  %vm2404_vm12 = vcmp.gt.f32.partialorder %v2372_v25, 0.0 }
 0x2f1   : > { %2578 = vst.msk [vmem:[%s5692_s24 + $0x10] sm:$0xff] %vm1756_vm0, %v2546_v37  ;;  %v2356_v7 = vadd.f32 %v5655_v1, %v2155_v59 }
 0x2f2   : > { %v3642_v15 = vpop.eup %3641  ;;  %v2488_v62 = vmul.f32 1.442695, %v2436_v27 }
 0x2f3   : > { %v2848_v16 = vadd.f32 -1.0, %v3642_v15  ;;  %v2420_v0 = vmin.f32 %v2356_v7, 0.0  ;;  %v2196_v2 = vpop.f32.mrf.mxu3  ;;  %vm2388_vm13 = vcmp.gt.f32.partialorder %v2356_v7, 0.0 }
 0x2f4   : > { %3645 = vpow2.f32 %v2488_v62  ;;  %v2197_v58 = vadd.f32 %v5674_v57, %v2196_v2 }
 0x2f5   : > { %v3644_v40 = vpop.eup %3643  ;;  %v2563_v56 = vsel %vm2403_vm10, %v2371_v48, %v2848_v16  ;;  %v2456_v34 = vmul.f32 1.442695, %v2420_v0  ;;  %v2305_v16 = vpop.permute.xlu2 %2304 }
 0x2f6   : > { %2595 = vst.msk [vmem:[%s5692_s24 + $0x98] sm:$0xff] %vm1756_vm0, %v2563_v56  ;;  %v2832_v10 = vadd.f32 -1.0, %v3644_v40  ;;  %v2373_v41 = vadd.f32 %v2299_v43, %v2197_v58  ;;  %v2156_v20 = vpop.f32.mrf.mxu1 }
 0x2f7   : > { %3647 = vpow2.f32 %v2456_v34  ;;  %v2157_v1 = vadd.f32 %v5674_v57, %v2156_v20 }
 0x2f8   : > { %v2547_v50 = vsel %vm2387_vm11, %v2355_v6, %v2832_v10  ;;  %v2437_v26 = vmin.f32 %v2373_v41, 0.0  ;;  %vm2405_vm14 = vcmp.gt.f32.partialorder %v2373_v41, 0.0 }
 0x2f9   : > { %2579 = vst.msk [vmem:[%s5692_s24 + $0x18] sm:$0xff] %vm1756_vm0, %v2547_v50  ;;  %v2357_v3 = vadd.f32 %v5651_v60, %v2157_v1 }
 0x2fa   : > { %v3646_v35 = vpop.eup %3645  ;;  %v2490_v9 = vmul.f32 1.442695, %v2437_v26 }
 0x2fb   : > { %v2849_v23 = vadd.f32 -1.0, %v3646_v35  ;;  %v2421_v5 = vmin.f32 %v2357_v3, 0.0  ;;  %v2199_v17 = vpop.f32.mrf.mxu3  ;;  %vm2389_vm2 = vcmp.gt.f32.partialorder %v2357_v3, 0.0 }
 0x2fc   : > { %3649 = vpow2.f32 %v2490_v9  ;;  %v2200_v51 = vadd.f32 %v5674_v57, %v2199_v17  ;;  %v2307_v9 = vpop.permute.xlu0 %2306 }
 0x2fd   : > { %v3648_v28 = vpop.eup %3647  ;;  %v2564_v29 = vsel %vm2404_vm12, %v2372_v25, %v2849_v23  ;;  %v2458_v48 = vmul.f32 1.442695, %v2421_v5 }
 0x2fe   : > { %2596 = vst.msk [vmem:[%s5692_s24 + $0xa0] sm:$0xff] %vm1756_vm0, %v2564_v29  ;;  %v2833_v44 = vadd.f32 -1.0, %v3648_v28  ;;  %v2374_v39 = vadd.f32 %v2301_v18, %v2200_v51  ;;  %v2159_v33 = vpop.f32.mrf.mxu1 }
 0x2ff   : > { %3651 = vpow2.f32 %v2458_v48  ;;  %v2160_v60 = vadd.f32 %v5674_v57, %v2159_v33 }
 0x300   : > { %v2548_v54 = vsel %vm2388_vm13, %v2356_v7, %v2833_v44  ;;  %v2438_v12 = vmin.f32 %v2374_v39, 0.0  ;;  %vm2406_vm4 = vcmp.gt.f32.partialorder %v2374_v39, 0.0 }
 0x301   : > { %2580 = vst.msk [vmem:[%s5692_s24 + $0x20] sm:$0xff] %vm1756_vm0, %v2548_v54  ;;  %v2358_v22 = vadd.f32 %v5649_v21, %v2160_v60 }
 0x302   : > { %v3650_v6 = vpop.eup %3649  ;;  %v2492_v47 = vmul.f32 1.442695, %v2438_v12 }
 0x303   : > { %v2850_v30 = vadd.f32 -1.0, %v3650_v6  ;;  %v2422_v14 = vmin.f32 %v2358_v22, 0.0  ;;  %v2201_v38 = vpop.f32.mrf.mxu3  ;;  %vm2390_vm5 = vcmp.gt.f32.partialorder %v2358_v22, 0.0  ;;  %v2309_v6 = vpop.permute.xlu1 %2308 }
 0x304   : > { %3653 = vpow2.f32 %v2492_v47  ;;  %v2202_v63 = vadd.f32 %v5674_v57, %v2201_v38 }
 0x305   : > { %v3652_v45 = vpop.eup %3651  ;;  %v2565_v61 = vsel %vm2405_vm14, %v2373_v41, %v2850_v30  ;;  %v2460_v53 = vmul.f32 1.442695, %v2422_v14 }
 0x306   : > { %2597 = vst.msk [vmem:[%s5692_s24 + $0xa8] sm:$0xff] %vm1756_vm0, %v2565_v61  ;;  %v2834_v32 = vadd.f32 -1.0, %v3652_v45  ;;  %v2375_v31 = vadd.f32 %v2303_v46, %v2202_v63  ;;  %v2161_v11 = vpop.f32.mrf.mxu1 }
 0x307   : > { %3655 = vpow2.f32 %v2460_v53  ;;  %v2162_v21 = vadd.f32 %v5674_v57, %v2161_v11 }
 0x308   : > { %v2549_v25 = vsel %vm2389_vm2, %v2357_v3, %v2834_v32  ;;  %v2439_v8 = vmin.f32 %v2375_v31, 0.0  ;;  %vm2407_vm15 = vcmp.gt.f32.partialorder %v2375_v31, 0.0 }
 0x309   : > { %2581 = vst.msk [vmem:[%s5692_s24 + $0x28] sm:$0xff] %vm1756_vm0, %v2549_v25  ;;  %v2359_v59 = vadd.f32 %v5663_v42, %v2162_v21 }
 0x30a   : > { %v3654_v37 = vpop.eup %3653  ;;  %v2494_v27 = vmul.f32 1.442695, %v2439_v8 }
 0x30b   : > { %v2851_v7 = vadd.f32 -1.0, %v3654_v37  ;;  %v2423_v15 = vmin.f32 %v2359_v59, 0.0  ;;  %v2204_v62 = vpop.f32.mrf.mxu3  ;;  %vm2391_vm1 = vcmp.gt.f32.partialorder %v2359_v59, 0.0 }
 0x30c   : > { %3657 = vpow2.f32 %v2494_v27  ;;  %v2205_v0 = vadd.f32 %v5674_v57, %v2204_v62 }
 0x30d   : > { %v3656_v2 = vpop.eup %3655  ;;  %v2566_v43 = vsel %vm2406_vm4, %v2374_v39, %v2851_v7  ;;  %v2462_v58 = vmul.f32 1.442695, %v2423_v15 }
 0x30e   : > { %2598 = vst.msk [vmem:[%s5692_s24 + $0xb0] sm:$0xff] %vm1756_vm0, %v2566_v43  ;;  %v2835_v40 = vadd.f32 -1.0, %v3656_v2  ;;  %v2376_v56 = vadd.f32 %v2305_v16, %v2205_v0  ;;  %v2164_v34 = vpop.f32.mrf.mxu1 }
 0x30f   : > { %3659 = vpow2.f32 %v2462_v58  ;;  %v2165_v42 = vadd.f32 %v5674_v57, %v2164_v34 }
 0x310   : > { %v2550_v10 = vsel %vm2390_vm5, %v2358_v22, %v2835_v40  ;;  %v2440_v41 = vmin.f32 %v2376_v56, 0.0  ;;  %vm2408_vm3 = vcmp.gt.f32.partialorder %v2376_v56, 0.0 }
 0x311   : > { %2582 = vst.msk [vmem:[%s5692_s24 + $0x30] sm:$0xff] %vm1756_vm0, %v2550_v10  ;;  %v2360_v20 = vadd.f32 %v5659_v36, %v2165_v42 }
 0x312   : > { %v3658_v1 = vpop.eup %3657  ;;  %v2496_v50 = vmul.f32 1.442695, %v2440_v41  ;;  %v2313_v41 = vpop.permute.xlu0 %2312 }
 0x313   : > { %v2852_v26 = vadd.f32 -1.0, %v3658_v1  ;;  %v2424_v3 = vmin.f32 %v2360_v20, 0.0  ;;  %v2206_v35 = vpop.f32.mrf.mxu3  ;;  %vm2392_vm6 = vcmp.gt.f32.partialorder %v2360_v20, 0.0 }
 0x314   : > { %3661 = vpow2.f32 %v2496_v50  ;;  %v2207_v23 = vadd.f32 %v5674_v57, %v2206_v35 }
 0x315   : > { %v3660_v5 = vpop.eup %3659  ;;  %v2567_v17 = vsel %vm2407_vm15, %v2375_v31, %v2852_v26  ;;  %v2464_v18 = vmul.f32 1.442695, %v2424_v3 }
 0x316   : > { %2599 = vst.msk [vmem:[%s5692_s24 + $0xb8] sm:$0xff] %vm1756_vm0, %v2567_v17  ;;  %v2836_v51 = vadd.f32 -1.0, %v3660_v5  ;;  %v2377_v28 = vadd.f32 %v2307_v9, %v2207_v23  ;;  %v2166_v29 = vpop.f32.mrf.mxu1 }
 0x317   : > { %3663 = vpow2.f32 %v2464_v18  ;;  %v2167_v36 = vadd.f32 %v5674_v57, %v2166_v29 }
 0x318   : > { %v2551_v48 = vsel %vm2391_vm1, %v2359_v59, %v2836_v51  ;;  %v2441_v44 = vmin.f32 %v2377_v28, 0.0  ;;  %v2311_v59 = vpop.permute.xlu2 %2310  ;;  %vm2409_vm7 = vcmp.gt.f32.partialorder %v2377_v28, 0.0 }
 0x319   : > { %2583 = vst.msk [vmem:[%s5692_s24 + $0x38] sm:$0xff] %vm1756_vm0, %v2551_v48  ;;  %v2361_v39 = vadd.f32 %v5657_v13, %v2167_v36  ;;  %v2315_v48 = vpop.permute.xlu1 %2314 }
 0x31a   : > { %v3662_v33 = vpop.eup %3661  ;;  %v2498_v60 = vmul.f32 1.442695, %v2441_v44 }
 0x31b   : > { %v2853_v54 = vadd.f32 -1.0, %v3662_v33  ;;  %v2425_v12 = vmin.f32 %v2361_v39, 0.0  ;;  %v2209_v22 = vpop.f32.mrf.mxu3  ;;  %vm2393_vm8 = vcmp.gt.f32.partialorder %v2361_v39, 0.0 }
 0x31c   : > { %3665 = vpow2.f32 %v2498_v60  ;;  %v2210_v47 = vadd.f32 %v5674_v57, %v2209_v22 }
 0x31d   : > { %v3664_v30 = vpop.eup %3663  ;;  %v2568_v14 = vsel %vm2408_vm3, %v2376_v56, %v2853_v54  ;;  %v2466_v38 = vmul.f32 1.442695, %v2425_v12 }
 0x31e   : > { %2600 = vst.msk [vmem:[%s5692_s24 + $0xc0] sm:$0xff] %vm1756_vm0, %v2568_v14  ;;  %v2837_v46 = vadd.f32 -1.0, %v3664_v30  ;;  %v2378_v63 = vadd.f32 %v2309_v6, %v2210_v47  ;;  %v2169_v45 = vpop.f32.mrf.mxu1 }
 0x31f   : > { %3667 = vpow2.f32 %v2466_v38  ;;  %v2170_v13 = vadd.f32 %v5674_v57, %v2169_v45 }
 0x320   : > { %v2552_v61 = vsel %vm2392_vm6, %v2360_v20, %v2837_v46  ;;  %v2442_v53 = vmin.f32 %v2378_v63, 0.0  ;;  %vm2410_vm9 = vcmp.gt.f32.partialorder %v2378_v63, 0.0 }
 0x321   : > { %2584 = vst.msk [vmem:[%s5692_s24 + $0x40] sm:$0xff] %vm1756_vm0, %v2552_v61  ;;  %v2362_v32 = vadd.f32 %v5669_v19, %v2170_v13  ;;  %v2317_v13 = vpop.permute.xlu2 %2316 }
 0x322   : > { %v3666_v31 = vpop.eup %3665  ;;  %v2500_v11 = vmul.f32 1.442695, %v2442_v53 }
 0x323   : > { %v2854_v21 = vadd.f32 -1.0, %v3666_v31  ;;  %v2426_v25 = vmin.f32 %v2362_v32, 0.0  ;;  %v2211_v8 = vpop.f32.mrf.mxu3  ;;  %vm2394_vm10 = vcmp.gt.f32.partialorder %v2362_v32, 0.0 }
 0x324   : > { %3669 = vpow2.f32 %v2500_v11  ;;  %v2212_v37 = vadd.f32 %v5674_v57, %v2211_v8 }
 0x325   : > { %v3668_v27 = vpop.eup %3667  ;;  %v2569_v7 = vsel %vm2409_vm7, %v2377_v28, %v2854_v21  ;;  %v2468_v15 = vmul.f32 1.442695, %v2426_v25 }
 0x326   : > { %2601 = vst.msk [vmem:[%s5692_s24 + $0xc8] sm:$0xff] %vm1756_vm0, %v2569_v7  ;;  %v2838_v62 = vadd.f32 -1.0, %v3668_v27  ;;  %v2379_v16 = vadd.f32 %v2311_v59, %v2212_v37  ;;  %v2171_v0 = vpop.f32.mrf.mxu1 }
 0x327   : > { %3671 = vpow2.f32 %v2468_v15  ;;  %v2172_v19 = vadd.f32 %v5674_v57, %v2171_v0  ;;  %v2319_v0 = vpop.permute.xlu0 %2318 }
 0x328   : > { %v2553_v2 = vsel %vm2393_vm8, %v2361_v39, %v2838_v62  ;;  %v2443_v43 = vmin.f32 %v2379_v16, 0.0  ;;  %vm2411_vm11 = vcmp.gt.f32.partialorder %v2379_v16, 0.0 }
 0x329   : > { %2585 = vst.msk [vmem:[%s5692_s24 + $0x48] sm:$0xff] %vm1756_vm0, %v2553_v2  ;;  %v2363_v58 = vadd.f32 %v5665_v4, %v2172_v19 }
 0x32a   : > { %v3670_v40 = vpop.eup %3669  ;;  %v2502_v56 = vmul.f32 1.442695, %v2443_v43 }
 0x32b   : > { %v2855_v34 = vadd.f32 -1.0, %v3670_v40  ;;  %v2427_v42 = vmin.f32 %v2363_v58, 0.0  ;;  %v2214_v10 = vpop.f32.mrf.mxu3  ;;  %vm2395_vm12 = vcmp.gt.f32.partialorder %v2363_v58, 0.0 }
 0x32c   : > { %3673 = vpow2.f32 %v2502_v56  ;;  %v2215_v20 = vadd.f32 %v5674_v57, %v2214_v10 }
 0x32d   : > { %v3672_v1 = vpop.eup %3671  ;;  %v2570_v50 = vsel %vm2410_vm9, %v2378_v63, %v2855_v34  ;;  %v2470_v26 = vmul.f32 1.442695, %v2427_v42 }
 0x32e   : > { %2602 = vst.msk [vmem:[%s5692_s24 + $0xd0] sm:$0xff] %vm1756_vm0, %v2570_v50  ;;  %v2839_v3 = vadd.f32 -1.0, %v3672_v1  ;;  %v2380_v35 = vadd.f32 %v2313_v41, %v2215_v20  ;;  %v2174_v9 = vpop.f32.mrf.mxu1 }
 0x32f   : > { %3675 = vpow2.f32 %v2470_v26  ;;  %v2175_v4 = vadd.f32 %v5674_v57, %v2174_v9 }
 0x330   : > { %v2554_v23 = vsel %vm2394_vm10, %v2362_v32, %v2839_v3  ;;  %v2444_v5 = vmin.f32 %v2380_v35, 0.0  ;;  %vm2412_vm13 = vcmp.gt.f32.partialorder %v2380_v35, 0.0 }
 0x331   : > { %2586 = vst.msk [vmem:[%s5692_s24 + $0x50] sm:$0xff] %vm1756_vm0, %v2554_v23  ;;  %v2364_v17 = vadd.f32 %v5667_v49, %v2175_v4 }
 0x332   : > { %v3674_v18 = vpop.eup %3673  ;;  %v2504_v51 = vmul.f32 1.442695, %v2444_v5 }
 0x333   : > { %v2856_v28 = vadd.f32 -1.0, %v3674_v18  ;;  %v2428_v29 = vmin.f32 %v2364_v17, 0.0  ;;  %v2216_v36 = vpop.f32.mrf.mxu3  ;;  %vm2396_vm14 = vcmp.gt.f32.partialorder %v2364_v17, 0.0 }
 0x334   : > { %3677 = vpow2.f32 %v2504_v51  ;;  %v2217_v44 = vadd.f32 %v5674_v57, %v2216_v36 }
 0x335   : > { %v3676_v39 = vpop.eup %3675  ;;  %v2571_v33 = vsel %vm2411_vm11, %v2379_v16, %v2856_v28  ;;  %v2472_v60 = vmul.f32 1.442695, %v2428_v29 }
 0x336   : > { %2603 = vst.msk [vmem:[%s5692_s24 + $0xd8] sm:$0xff] %vm1756_vm0, %v2571_v33  ;;  %v2840_v54 = vadd.f32 -1.0, %v3676_v39  ;;  %v2381_v12 = vadd.f32 %v2315_v48, %v2217_v44  ;;  %v2176_v22 = vpop.f32.mrf.mxu1 }
 0x337   : > { %3679 = vpow2.f32 %v2472_v60  ;;  %v2177_v49 = vadd.f32 %v5674_v57, %v2176_v22 }
 0x338   : > { %v2555_v6 = vsel %vm2395_vm12, %v2363_v58, %v2840_v54  ;;  %v2445_v47 = vmin.f32 %v2381_v12, 0.0  ;;  %vm2413_vm2 = vcmp.gt.f32.partialorder %v2381_v12, 0.0 }
 0x339   : > { %2587 = vst.msk [vmem:[%s5692_s24 + $0x58] sm:$0xff] %vm1756_vm0, %v2555_v6  ;;  %v2365_v30 = vadd.f32 %v5681_v55, %v2177_v49 }
 0x33a   : > { %v3678_v14 = vpop.eup %3677  ;;  %v2506_v38 = vmul.f32 1.442695, %v2445_v47 }
 0x33b   : > { %v2857_v46 = vadd.f32 -1.0, %v3678_v14  ;;  %v2429_v63 = vmin.f32 %v2365_v30, 0.0  ;;  %v2219_v45 = vpop.f32.mrf.mxu3  ;;  %vm2397_vm4 = vcmp.gt.f32.partialorder %v2365_v30, 0.0 }
 0x33c   : > { %3681 = vpow2.f32 %v2506_v38  ;;  %v2220_v61 = vadd.f32 %v5674_v57, %v2219_v45 }
 0x33d   : > { %v3680_v53 = vpop.eup %3679  ;;  %v2572_v32 = vsel %vm2412_vm13, %v2380_v35, %v2857_v46  ;;  %v2474_v31 = vmul.f32 1.442695, %v2429_v63 }
 0x33e   : > { %2604 = vst.msk [vmem:[%s5692_s24 + $0xe0] sm:$0xff] %vm1756_vm0, %v2572_v32  ;;  %v2841_v11 = vadd.f32 -1.0, %v3680_v53  ;;  %v2382_v21 = vadd.f32 %v2317_v13, %v2220_v61  ;;  %v2179_v25 = vpop.f32.mrf.mxu1 }
 0x33f   : > { %3683 = vpow2.f32 %v2474_v31  ;;  %v2180_v55 = vadd.f32 %v5674_v57, %v2179_v25 }
 0x340   : > { %v2556_v8 = vsel %vm2396_vm14, %v2364_v17, %v2841_v11  ;;  %v2446_v59 = vmin.f32 %v2382_v21, 0.0  ;;  %vm2414_vm5 = vcmp.gt.f32.partialorder %v2382_v21, 0.0 }
 0x341   : > { %2588 = vst.msk [vmem:[%s5692_s24 + $0x60] sm:$0xff] %vm1756_vm0, %v2556_v8  ;;  %v2366_v37 = vadd.f32 %v5676_v24, %v2180_v55 }
 0x342   : > { %v3682_v27 = vpop.eup %3681  ;;  %v2508_v7 = vmul.f32 1.442695, %v2446_v59 }
 0x343   : > { %v2858_v15 = vadd.f32 -1.0, %v3682_v27  ;;  %v2430_v62 = vmin.f32 %v2366_v37, 0.0  ;;  %v2221_v16 = vpop.f32.mrf.mxu3  ;;  %vm2398_vm15 = vcmp.gt.f32.partialorder %v2366_v37, 0.0 }
 0x344   : > { %3685 = vpow2.f32 %v2508_v7  ;;  %v2222_v19 = vadd.f32 %v5674_v57, %v2221_v16 }
 0x345   : > { %v3684_v2 = vpop.eup %3683  ;;  %v2573_v43 = vsel %vm2413_vm2, %v2381_v12, %v2858_v15  ;;  %v2476_v58 = vmul.f32 1.442695, %v2430_v62 }
 0x346   : > { %2605 = vst.msk [vmem:[%s5692_s24 + $0xe8] sm:$0xff] %vm1756_vm0, %v2573_v43  ;;  %v2842_v40 = vadd.f32 -1.0, %v3684_v2  ;;  %v2383_v56 = vadd.f32 %v2319_v0, %v2222_v19  ;;  %v2181_v34 = vpop.f32.mrf.mxu1 }
 0x347   : > { %3687 = vpow2.f32 %v2476_v58  ;;  %v2182_v24 = vadd.f32 %v5674_v57, %v2181_v34 }
 0x348   : > { %v2557_v42 = vsel %vm2397_vm4, %v2365_v30, %v2842_v40  ;;  %v2447_v10 = vmin.f32 %v2383_v56, 0.0  ;;  %vm2415_vm1 = vcmp.gt.f32.partialorder %v2383_v56, 0.0 }
 0x349   : > { %2589 = vst.msk [vmem:[%s5692_s24 + $0x68] sm:$0xff] %vm1756_vm0, %v2557_v42  ;;  %v2367_v41 = vadd.f32 %v5679_v52, %v2182_v24 }
 0x34a   : > { %v3686_v20 = vpop.eup %3685  ;;  %v2510_v1 = vmul.f32 1.442695, %v2447_v10 }
 0x34b   : > { %v2859_v50 = vadd.f32 -1.0, %v3686_v20  ;;  %v2431_v26 = vmin.f32 %v2367_v41, 0.0  ;;  %vm2399_vm3 = vcmp.gt.f32.partialorder %v2367_v41, 0.0 }
 0x34c   : > { %3689 = vpow2.f32 %v2510_v1 }
 0x34d   : > { %v3688_v3 = vpop.eup %3687  ;;  %v2574_v35 = vsel %vm2414_vm5, %v2382_v21, %v2859_v50  ;;  %v2478_v9 = vmul.f32 1.442695, %v2431_v26 }
 0x34e   : > { %2606 = vst.msk [vmem:[%s5692_s24 + $0xf0] sm:$0xff] %vm1756_vm0, %v2574_v35  ;;  %v2843_v57 = vadd.f32 -1.0, %v3688_v3 }
 0x34f   : > { %3691 = vpow2.f32 %v2478_v9 }
 0x350   : > { %v2558_v4 = vsel %vm2398_vm15, %v2366_v37, %v2843_v57 }
 0x351   : > { %2590 = vst.msk [vmem:[%s5692_s24 + $0x70] sm:$0xff] %vm1756_vm0, %v2558_v4 }
 0x352   : > { %v3690_v52 = vpop.eup %3689 }
 0x353   : > { %v2860_v23 = vadd.f32 -1.0, %v3690_v52 }
 0x355   : > { %v3692_v5 = vpop.eup %3691  ;;  %v2575_v17 = vsel %vm2415_vm1, %v2383_v56, %v2860_v23 }
 0x356   : > { %2607 = vst.msk [vmem:[%s5692_s24 + $0xf8] sm:$0xff] %vm1756_vm0, %v2575_v17  ;;  %v2844_v18 = vadd.f32 -1.0, %v3692_v5 }
 0x358   : > { %v2559_v51 = vsel %vm2399_vm3, %v2367_v41, %v2844_v18 }
 0x359   : > { %2591 = vst.msk [vmem:[%s5692_s24 + $0x78] sm:$0xff] %vm1756_vm0, %v2559_v51 }
 0x35a PF: > { %p15_p7 = scmp.ge.s32.totalorder %s3856_s23, 4   ;;  %s5963_s18 = smov %s3782_s19 }
 0x35b   : > { %s5964_s19 = smov %s3786_s20  ;;  %s5965_s20 = smov %s3866_s26 }
 0x35c   : > { %s5966_s21 = smov %s3856_s23  ;;  %17 = sbr.rel (!%p15_p7) target bundleno = 3 (0x3), region = 80 }
 0x361   :  { %2629 = vsyncpa [#allocation3], 1 }
 0x362   :  { %2631 = vsyncpa [#allocation3 + $0x1], 1 }

</bundles_post_ra>
